<compile_context>
chip_gen: v6e
topology: v6e:2x2x1
jax: 0.10.0
libtpu: 0.0.40
codegen_flags: <defaults>
</compile_context>

<pallas_src>
import functools

import jax
import jax.numpy as jnp
import numpy as np
from jax.experimental import pallas as pl
from jax.experimental.pallas import tpu as pltpu

HIDDEN = 512
NUM_CLASSES = 12
RES_FEAT = 2048    # res101 output channels
RES3D_FEAT = 512   # res3d output channels


def _round_up(n, m):
    return ((n + m - 1) // m) * m


def _serloc_kernel(x_mean_ref, x3d_ref, fv_ref, u_ref,
                   wr_ref, br_ref, wo1_ref, bo1_ref,
                   wf1a_ref, wf1b_ref, w3d_ref, bf1_ref,
                   wf2_ref, bf2_ref, out_ref, *, dropout_p):
    f32 = jnp.float32
    bf16 = jnp.bfloat16

    # res101 stand-in + spatial mean + linear_res1, folded offline into one
    # tiny [Cin, 512] matmul (exact: mean and 1x1 conv are both linear).
    x_res1 = jnp.maximum(
        jnp.dot(x_mean_ref[...], wr_ref[...], preferred_element_type=f32)
        + br_ref[...], 0.0)                                           # [TB, 512]

    # linear_o1 on the precomputed feature vector (large matmul, bf16 weights).
    x_o1 = jnp.maximum(
        jnp.dot(fv_ref[...], wo1_ref[...], preferred_element_type=f32)
        + bo1_ref[...], 0.0)                                          # [TB, 512]

    # res3d stand-in (last voxel) folded with final1's third weight slice
    # (exact: no nonlinearity in between); its bias is folded into bf1.
    x_3d_f1 = jnp.dot(x3d_ref[...], w3d_ref[...],
                      preferred_element_type=f32)                     # [TB, 512]

    # final1 over cat([x_res1, x_o1, x_res3d1], axis=1) as split matmuls.
    dense1 = (jnp.dot(x_res1.astype(bf16), wf1a_ref[...], preferred_element_type=f32)
              + jnp.dot(x_o1.astype(bf16), wf1b_ref[...], preferred_element_type=f32)
              + x_3d_f1 + bf1_ref[...])
    dense1 = jnp.maximum(dense1, 0.0)

    # Dropout (train mode) from host-side uniforms; each batch row has its own
    # randoms, so batch tiles never reuse a mask.
    if dropout_p > 0.0:
        keep = u_ref[...] >= jnp.float32(dropout_p)
        dense1 = jnp.where(keep, dense1 * (1.0 / (1.0 - dropout_p)), 0.0)

    # final2
    out_ref[...] = (jnp.dot(dense1, wf2_ref[...], preferred_element_type=f32)
                    + bf2_ref[...])                                   # [TB, 12]


def serloc_b_anomaly(params, x, x3d, fv, *, dropout_p=0.4, seed=0):
    """x: [B,C,H,W] (NCHW), x3d: [B,C3,T,H3,W3], fv: [B,2048] -> [B,12]."""
    dropout_p = float(dropout_p)
    if not (0.0 <= dropout_p < 1.0):
        raise ValueError("dropout_p must be in [0, 1)")

    wc, bc, w3d, b3d, wr1, br1, wo1, bo1, wf1, bf1, wf2, bf2 = params

    # ---- offline algebraic folds (exact; no nonlinearity is crossed) ----
    w_r = (wc @ wr1).astype(jnp.float32)                   # [Cin, 512]
    b_r = (bc @ wr1 + br1).astype(jnp.float32)             # [1, 512]
    wf1_a = wf1[0 * HIDDEN:1 * HIDDEN].astype(jnp.bfloat16)
    wf1_b = wf1[1 * HIDDEN:2 * HIDDEN].astype(jnp.bfloat16)
    wf1_c = wf1[2 * HIDDEN:3 * HIDDEN]                     # stays f32 for folds
    w_3d = (w3d @ wf1_c).astype(jnp.float32)               # [C3, 512]
    bf1_eff = (bf1 + b3d @ wf1_c).astype(jnp.float32)      # [1, 512]
    wo1_b = wo1.astype(jnp.bfloat16)                       # [2048, 512]

    # ---- backbone stand-ins hoisted out of the kernel (tiny outputs) ----
    # TODO(synk): real ResNet-101 / 3D-ResNet backbones are externally injected
    # modules; their role here is the linear stand-ins folded above.
    B = x.shape[0]
    x_mean = jnp.mean(x.astype(jnp.float32), axis=(2, 3))          # [B, Cin]
    x3d_last = x3d[:, :, -1, -1, -1].astype(jnp.float32)           # [B, C3]
    fv_b = fv.astype(jnp.bfloat16)                                 # [B, 2048]

    # ---- batch tiling: sublane-aligned tiles, weights resident in VMEM ----
    tb = _round_up(B, 8) if B <= 256 else 256
    b_pad = _round_up(B, tb)

    def pad_b(a):
        if b_pad == B:
            return a
        return jnp.pad(a, ((0, b_pad - B), (0, 0)))

    x_mean = pad_b(x_mean)
    x3d_last = pad_b(x3d_last)
    fv_b = pad_b(fv_b)

    # Dropout uniforms (deterministic; unique per batch row).
    u = jax.random.uniform(jax.random.PRNGKey(seed), (b_pad, HIDDEN), jnp.float32)

    weights = (w_r, b_r, wo1_b, bo1.astype(jnp.float32),
               wf1_a, wf1_b, w_3d, bf1_eff,
               wf2.astype(jnp.float32), bf2.astype(jnp.float32))

    def act_spec(f):
        return pl.BlockSpec((tb, f), lambda i: (i, 0))

    def res_spec(w):
        return pl.BlockSpec(w.shape, lambda i: (0, 0))   # resident across grid

    kernel = functools.partial(_serloc_kernel, dropout_p=dropout_p)

    out = pl.pallas_call(
        kernel,
        out_shape=jax.ShapeDtypeStruct((b_pad, NUM_CLASSES), jnp.float32),
        grid=(b_pad // tb,),
        in_specs=[act_spec(x_mean.shape[1]),
                  act_spec(x3d_last.shape[1]),
                  act_spec(RES_FEAT),
                  act_spec(HIDDEN)]
                 + [res_spec(w) for w in weights],
        out_specs=pl.BlockSpec((tb, NUM_CLASSES), lambda i: (i, 0)),
        compiler_params=pltpu.CompilerParams(
            dimension_semantics=("parallel",),
            vmem_limit_bytes=32 * 1024 * 1024),
    )(x_mean, x3d_last, fv_b, u, *weights)

    return out[:B]


def init_params(key, cin=4, c3d=4):
    """Deterministic param init (weights stored as (fan_in, fan_out))."""
    def linear(k, fin, fout):
        kw, kb = jax.random.split(k)
        bound = 1.0 / np.sqrt(fin)
        w = jax.random.uniform(kw, (fin, fout), jnp.float32, -bound, bound)
        b = jax.random.uniform(kb, (1, fout), jnp.float32, -bound, bound)
        return w, b

    k = jax.random.split(key, 6)
    wc, bc = linear(k[0], cin, RES_FEAT)          # res101 stand-in (1x1 conv)
    w3d, b3d = linear(k[1], c3d, RES3D_FEAT)      # res3d stand-in (1x1x1 conv)
    wr1, br1 = linear(k[2], RES_FEAT, HIDDEN)     # linear_res1 (2048 -> 512)
    wo1, bo1 = linear(k[3], RES_FEAT, HIDDEN)     # linear_o1   (2048 -> 512)
    wf1, bf1 = linear(k[4], 3 * HIDDEN, HIDDEN)   # final1      (1536 -> 512)
    wf2, bf2 = linear(k[5], HIDDEN, NUM_CLASSES)  # final2      (512  -> 12)
    return (wc, bc, w3d, b3d, wr1, br1, wo1, bo1, wf1, bf1, wf2, bf2)


def ref_forward(params, x, x3d, fv):
    """Pure-JAX f32 reference (dropout disabled), following the torch op order."""
    wc, bc, w3d, b3d, wr1, br1, wo1, bo1, wf1, bf1, wf2, bf2 = params
    feat = jnp.einsum('bchw,cd->bdhw', x, wc) + bc.reshape(1, -1, 1, 1)
    x_res = feat.mean(axis=(2, 3))
    x_res1 = jax.nn.relu(x_res @ wr1 + br1)
    x_o1 = jax.nn.relu(fv @ wo1 + bo1)
    feat3d = jnp.einsum('bcthw,cd->bdthw', x3d, w3d) + b3d.reshape(1, -1, 1, 1, 1)
    x_res3d1 = feat3d[:, :, -1, -1, -1]
    cat1 = jnp.concatenate([x_res1, x_o1, x_res3d1], axis=1)
    dense1 = jax.nn.relu(cat1 @ wf1 + bf1)
    return dense1 @ wf2 + bf2


if __name__ == "__main__":
    key = jax.random.PRNGKey(0)
    kp, kx, k3, kf = jax.random.split(key, 4)

    B, C, H, W = 2, 4, 16, 16
    C3, T, H3, W3 = 4, 4, 8, 8

    params = init_params(kp, cin=C, c3d=C3)
    x = jax.random.normal(kx, (B, C, H, W), jnp.float32)
    x3d = jax.random.normal(k3, (B, C3, T, H3, W3), jnp.float32)
    fv = jax.random.normal(kf, (B, RES_FEAT), jnp.float32)

    # Correctness check with dropout disabled (deterministic path).
    out_nodrop = serloc_b_anomaly(params, x, x3d, fv, dropout_p=0.0)
    jax.block_until_ready(out_nodrop)
    ref = ref_forward(params, x, x3d, fv)
    np.testing.assert_allclose(np.asarray(out_nodrop), np.asarray(ref),
                               rtol=2e-2, atol=2e-2)

    # Full forward with train-mode dropout (p=0.4, deterministic seed).
    out = serloc_b_anomaly(params, x, x3d, fv, dropout_p=0.4, seed=123)
    out = jax.block_until_ready(out)
    assert out.shape == (B, NUM_CLASSES)
    assert bool(jnp.all(jnp.isfinite(out)))

    print("KERNEL_OK")
</pallas_src>

<mosaic_0001>
module attributes {stable_mosaic.version = 11 : i64} {
  func.func @_serloc_kernel(%arg0: i32, %arg1: memref<8x4xf32, #tpu.memory_space<vmem>>, %arg2: memref<8x4xf32, #tpu.memory_space<vmem>>, %arg3: memref<8x2048xbf16, #tpu.memory_space<vmem>>, %arg4: memref<8x512xf32, #tpu.memory_space<vmem>>, %arg5: memref<4x512xf32, #tpu.memory_space<vmem>>, %arg6: memref<1x512xf32, #tpu.memory_space<vmem>>, %arg7: memref<2048x512xbf16, #tpu.memory_space<vmem>>, %arg8: memref<1x512xf32, #tpu.memory_space<vmem>>, %arg9: memref<512x512xbf16, #tpu.memory_space<vmem>>, %arg10: memref<512x512xbf16, #tpu.memory_space<vmem>>, %arg11: memref<4x512xf32, #tpu.memory_space<vmem>>, %arg12: memref<1x512xf32, #tpu.memory_space<vmem>>, %arg13: memref<512x12xf32, #tpu.memory_space<vmem>>, %arg14: memref<1x12xf32, #tpu.memory_space<vmem>>, %arg15: memref<8x12xf32, #tpu.memory_space<vmem>>) attributes {dimension_semantics = [#tpu.dimension_semantics<parallel>], iteration_bounds = array<i64: 1>, scalar_prefetch = 0 : i64, scratch_operands = 0 : i64, tpu.core_type = #tpu.core_type<tc>, window_params = [{transform_indices = @transform_0, window_bounds = array<i64: 8, 4>}, {transform_indices = @transform_1, window_bounds = array<i64: 8, 4>}, {transform_indices = @transform_2, window_bounds = array<i64: 8, 2048>}, {transform_indices = @transform_3, window_bounds = array<i64: 8, 512>}, {pipeline_mode = #tpu.pipeline_mode<synchronous>, transform_indices = @transform_4, window_bounds = array<i64: 4, 512>}, {pipeline_mode = #tpu.pipeline_mode<synchronous>, transform_indices = @transform_5, window_bounds = array<i64: 1, 512>}, {pipeline_mode = #tpu.pipeline_mode<synchronous>, transform_indices = @transform_6, window_bounds = array<i64: 2048, 512>}, {pipeline_mode = #tpu.pipeline_mode<synchronous>, transform_indices = @transform_7, window_bounds = array<i64: 1, 512>}, {pipeline_mode = #tpu.pipeline_mode<synchronous>, transform_indices = @transform_8, window_bounds = array<i64: 512, 512>}, {pipeline_mode = #tpu.pipeline_mode<synchronous>, transform_indices = @transform_9, window_bounds = array<i64: 512, 512>}, {pipeline_mode = #tpu.pipeline_mode<synchronous>, transform_indices = @transform_10, window_bounds = array<i64: 4, 512>}, {pipeline_mode = #tpu.pipeline_mode<synchronous>, transform_indices = @transform_11, window_bounds = array<i64: 1, 512>}, {pipeline_mode = #tpu.pipeline_mode<synchronous>, transform_indices = @transform_12, window_bounds = array<i64: 512, 12>}, {pipeline_mode = #tpu.pipeline_mode<synchronous>, transform_indices = @transform_13, window_bounds = array<i64: 1, 12>}, {transform_indices = @transform_14, window_bounds = array<i64: 8, 12>}]} {
    %c0 = arith.constant 0 : index
    %c0_0 = arith.constant 0 : index
    %0 = vector.load %arg1[%c0, %c0_0] : memref<8x4xf32, #tpu.memory_space<vmem>>, vector<8x4xf32>
    %c0_1 = arith.constant 0 : index
    %c0_2 = arith.constant 0 : index
    %1 = vector.load %arg5[%c0_1, %c0_2] : memref<4x512xf32, #tpu.memory_space<vmem>>, vector<4x512xf32>
    %cst = arith.constant dense<0.000000e+00> : vector<8x512xf32>
    %2 = tpu.matmul %0, %1, %cst {dimension_numbers = #tpu.dot_dimension_numbers<[1], [0], [0], [1], [0, 0, 1, 1], [], []>} : vector<8x4xf32>, vector<4x512xf32>, vector<8x512xf32> -> vector<8x512xf32>
    %c0_3 = arith.constant 0 : index
    %c0_4 = arith.constant 0 : index
    %3 = vector.load %arg6[%c0_3, %c0_4] : memref<1x512xf32, #tpu.memory_space<vmem>>, vector<1x512xf32>
    %4 = vector.broadcast %3 : vector<1x512xf32> to vector<8x512xf32>
    %5 = arith.addf %2, %4 : vector<8x512xf32>
    %cst_5 = arith.constant 0.000000e+00 : f32
    %6 = vector.broadcast %cst_5 : f32 to vector<8x512xf32>
    %7 = arith.maximumf %5, %6 : vector<8x512xf32>
    %c0_6 = arith.constant 0 : index
    %c0_7 = arith.constant 0 : index
    %8 = vector.load %arg3[%c0_6, %c0_7] : memref<8x2048xbf16, #tpu.memory_space<vmem>>, vector<8x2048xbf16>
    %c0_8 = arith.constant 0 : index
    %c0_9 = arith.constant 0 : index
    %9 = vector.load %arg7[%c0_8, %c0_9] : memref<2048x512xbf16, #tpu.memory_space<vmem>>, vector<2048x512xbf16>
    %cst_10 = arith.constant dense<0.000000e+00> : vector<8x512xf32>
    %10 = tpu.matmul %8, %9, %cst_10 {dimension_numbers = #tpu.dot_dimension_numbers<[1], [0], [0], [1], [0, 0, 1, 1], [], []>} : vector<8x2048xbf16>, vector<2048x512xbf16>, vector<8x512xf32> -> vector<8x512xf32>
    %c0_11 = arith.constant 0 : index
    %c0_12 = arith.constant 0 : index
    %11 = vector.load %arg8[%c0_11, %c0_12] : memref<1x512xf32, #tpu.memory_space<vmem>>, vector<1x512xf32>
    %12 = vector.broadcast %11 : vector<1x512xf32> to vector<8x512xf32>
    %13 = arith.addf %10, %12 : vector<8x512xf32>
    %cst_13 = arith.constant 0.000000e+00 : f32
    %14 = vector.broadcast %cst_13 : f32 to vector<8x512xf32>
    %15 = arith.maximumf %13, %14 : vector<8x512xf32>
    %c0_14 = arith.constant 0 : index
    %c0_15 = arith.constant 0 : index
    %16 = vector.load %arg2[%c0_14, %c0_15] : memref<8x4xf32, #tpu.memory_space<vmem>>, vector<8x4xf32>
    %c0_16 = arith.constant 0 : index
    %c0_17 = arith.constant 0 : index
    %17 = vector.load %arg11[%c0_16, %c0_17] : memref<4x512xf32, #tpu.memory_space<vmem>>, vector<4x512xf32>
    %cst_18 = arith.constant dense<0.000000e+00> : vector<8x512xf32>
    %18 = tpu.matmul %16, %17, %cst_18 {dimension_numbers = #tpu.dot_dimension_numbers<[1], [0], [0], [1], [0, 0, 1, 1], [], []>} : vector<8x4xf32>, vector<4x512xf32>, vector<8x512xf32> -> vector<8x512xf32>
    %19 = arith.truncf %7 : vector<8x512xf32> to vector<8x512xbf16>
    %c0_19 = arith.constant 0 : index
    %c0_20 = arith.constant 0 : index
    %20 = vector.load %arg9[%c0_19, %c0_20] : memref<512x512xbf16, #tpu.memory_space<vmem>>, vector<512x512xbf16>
    %cst_21 = arith.constant dense<0.000000e+00> : vector<8x512xf32>
    %21 = tpu.matmul %19, %20, %cst_21 {dimension_numbers = #tpu.dot_dimension_numbers<[1], [0], [0], [1], [0, 0, 1, 1], [], []>} : vector<8x512xbf16>, vector<512x512xbf16>, vector<8x512xf32> -> vector<8x512xf32>
    %22 = arith.truncf %15 : vector<8x512xf32> to vector<8x512xbf16>
    %c0_22 = arith.constant 0 : index
    %c0_23 = arith.constant 0 : index
    %23 = vector.load %arg10[%c0_22, %c0_23] : memref<512x512xbf16, #tpu.memory_space<vmem>>, vector<512x512xbf16>
    %cst_24 = arith.constant dense<0.000000e+00> : vector<8x512xf32>
    %24 = tpu.matmul %22, %23, %cst_24 {dimension_numbers = #tpu.dot_dimension_numbers<[1], [0], [0], [1], [0, 0, 1, 1], [], []>} : vector<8x512xbf16>, vector<512x512xbf16>, vector<8x512xf32> -> vector<8x512xf32>
    %25 = arith.addf %21, %24 : vector<8x512xf32>
    %26 = arith.addf %25, %18 : vector<8x512xf32>
    %c0_25 = arith.constant 0 : index
    %c0_26 = arith.constant 0 : index
    %27 = vector.load %arg12[%c0_25, %c0_26] : memref<1x512xf32, #tpu.memory_space<vmem>>, vector<1x512xf32>
    %28 = vector.broadcast %27 : vector<1x512xf32> to vector<8x512xf32>
    %29 = arith.addf %26, %28 : vector<8x512xf32>
    %cst_27 = arith.constant 0.000000e+00 : f32
    %30 = vector.broadcast %cst_27 : f32 to vector<8x512xf32>
    %31 = arith.maximumf %29, %30 : vector<8x512xf32>
    %c0_28 = arith.constant 0 : index
    %c0_29 = arith.constant 0 : index
    %32 = vector.load %arg13[%c0_28, %c0_29] : memref<512x12xf32, #tpu.memory_space<vmem>>, vector<512x12xf32>
    %cst_30 = arith.constant dense<0.000000e+00> : vector<8x12xf32>
    %33 = tpu.matmul %31, %32, %cst_30 {dimension_numbers = #tpu.dot_dimension_numbers<[1], [0], [0], [1], [0, 0, 1, 1], [], []>} : vector<8x512xf32>, vector<512x12xf32>, vector<8x12xf32> -> vector<8x12xf32>
    %c0_31 = arith.constant 0 : index
    %c0_32 = arith.constant 0 : index
    %34 = vector.load %arg14[%c0_31, %c0_32] : memref<1x12xf32, #tpu.memory_space<vmem>>, vector<1x12xf32>
    %35 = vector.broadcast %34 : vector<1x12xf32> to vector<8x12xf32>
    %36 = arith.addf %33, %35 : vector<8x12xf32>
    %c0_33 = arith.constant 0 : index
    %c0_34 = arith.constant 0 : index
    %37 = vector.load %arg15[%c0_33, %c0_34] : memref<8x12xf32, #tpu.memory_space<vmem>>, vector<8x12xf32>
    tpu.vector_store %arg15[%c0_33, %c0_34], %36 {strides = array<i32>} : memref<8x12xf32, #tpu.memory_space<vmem>>, vector<8x12xf32>,
    return
  }
  func.func @transform_0(%arg0: i32) -> (i32, i32) {
    %c0_i32 = arith.constant 0 : i32
    %c0_i32_0 = arith.constant 0 : i32
    return %arg0, %c0_i32 : i32, i32
  }
  func.func @transform_1(%arg0: i32) -> (i32, i32) {
    %c0_i32 = arith.constant 0 : i32
    %c0_i32_0 = arith.constant 0 : i32
    return %arg0, %c0_i32 : i32, i32
  }
  func.func @transform_2(%arg0: i32) -> (i32, i32) {
    %c0_i32 = arith.constant 0 : i32
    %c0_i32_0 = arith.constant 0 : i32
    return %arg0, %c0_i32 : i32, i32
  }
  func.func @transform_3(%arg0: i32) -> (i32, i32) {
    %c0_i32 = arith.constant 0 : i32
    %c0_i32_0 = arith.constant 0 : i32
    return %arg0, %c0_i32 : i32, i32
  }
  func.func @transform_4(%arg0: i32) -> (i32, i32) {
    %c0_i32 = arith.constant 0 : i32
    %c0_i32_0 = arith.constant 0 : i32
    %c0_i32_1 = arith.constant 0 : i32
    return %c0_i32, %c0_i32_0 : i32, i32
  }
  func.func @transform_5(%arg0: i32) -> (i32, i32) {
    %c0_i32 = arith.constant 0 : i32
    %c0_i32_0 = arith.constant 0 : i32
    %c0_i32_1 = arith.constant 0 : i32
    return %c0_i32, %c0_i32_0 : i32, i32
  }
  func.func @transform_6(%arg0: i32) -> (i32, i32) {
    %c0_i32 = arith.constant 0 : i32
    %c0_i32_0 = arith.constant 0 : i32
    %c0_i32_1 = arith.constant 0 : i32
    return %c0_i32, %c0_i32_0 : i32, i32
  }
  func.func @transform_7(%arg0: i32) -> (i32, i32) {
    %c0_i32 = arith.constant 0 : i32
    %c0_i32_0 = arith.constant 0 : i32
    %c0_i32_1 = arith.constant 0 : i32
    return %c0_i32, %c0_i32_0 : i32, i32
  }
  func.func @transform_8(%arg0: i32) -> (i32, i32) {
    %c0_i32 = arith.constant 0 : i32
    %c0_i32_0 = arith.constant 0 : i32
    %c0_i32_1 = arith.constant 0 : i32
    return %c0_i32, %c0_i32_0 : i32, i32
  }
  func.func @transform_9(%arg0: i32) -> (i32, i32) {
    %c0_i32 = arith.constant 0 : i32
    %c0_i32_0 = arith.constant 0 : i32
    %c0_i32_1 = arith.constant 0 : i32
    return %c0_i32, %c0_i32_0 : i32, i32
  }
  func.func @transform_10(%arg0: i32) -> (i32, i32) {
    %c0_i32 = arith.constant 0 : i32
    %c0_i32_0 = arith.constant 0 : i32
    %c0_i32_1 = arith.constant 0 : i32
    return %c0_i32, %c0_i32_0 : i32, i32
  }
  func.func @transform_11(%arg0: i32) -> (i32, i32) {
    %c0_i32 = arith.constant 0 : i32
    %c0_i32_0 = arith.constant 0 : i32
    %c0_i32_1 = arith.constant 0 : i32
    return %c0_i32, %c0_i32_0 : i32, i32
  }
  func.func @transform_12(%arg0: i32) -> (i32, i32) {
    %c0_i32 = arith.constant 0 : i32
    %c0_i32_0 = arith.constant 0 : i32
    %c0_i32_1 = arith.constant 0 : i32
    return %c0_i32, %c0_i32_0 : i32, i32
  }
  func.func @transform_13(%arg0: i32) -> (i32, i32) {
    %c0_i32 = arith.constant 0 : i32
    %c0_i32_0 = arith.constant 0 : i32
    %c0_i32_1 = arith.constant 0 : i32
    return %c0_i32, %c0_i32_0 : i32, i32
  }
  func.func @transform_14(%arg0: i32) -> (i32, i32) {
    %c0_i32 = arith.constant 0 : i32
    %c0_i32_0 = arith.constant 0 : i32
    return %arg0, %c0_i32 : i32, i32
  }
}

</mosaic_0001>

<bundles_post_ra>
// kernel: tpu_custom_call.1
= control target key start
LH: loop header
LB: loop body
LE: loop exit
PB: predicated region body
PF: predicated region fallthrough
CT: control target
= control target key end

     0   :  { %19 = vsyncpa [#allocation3], 0  ;;  %s9390_s0 = inlined_call_operand.vmem [shape: f32[8,4], index: 0, kind: input, shape index: {}]   ;;  %s9391_s1 = inlined_call_operand.vmem [shape: f32[8,4], index: 1, kind: input, shape index: {}]   ;;  %s9392_s2 = inlined_call_operand.hbm [shape: bf16[8,2048], index: 2, kind: input, shape index: {}]   ;;  %s9393_s3 = inlined_call_operand.hbm [shape: f32[8,512], index: 3, kind: input, shape index: {}]   ;;  %s9394_s4 = inlined_call_operand.hbm [shape: f32[4,512], index: 4, kind: input, shape index: {}]   ;;  %s9395_s5 = inlined_call_operand.hbm [shape: f32[1,512], index: 5, kind: input, shape index: {}]   ;;  %s9396_s6 = inlined_call_operand.hbm [shape: bf16[2048,512], index: 6, kind: input, shape index: {}]   ;;  %s9397_s7 = inlined_call_operand.hbm [shape: f32[1,512], index: 7, kind: input, shape index: {}]   ;;  %s9398_s8 = inlined_call_operand.hbm [shape: bf16[512,512], index: 8, kind: input, shape index: {}]   ;;  %s9399_s9 = inlined_call_operand.hbm [shape: bf16[512,512], index: 9, kind: input, shape index: {}]   ;;  %s9400_s10 = inlined_call_operand.hbm [shape: f32[4,512], index: 10, kind: input, shape index: {}]   ;;  %s9401_s11 = inlined_call_operand.hbm [shape: f32[1,512], index: 11, kind: input, shape index: {}]   ;;  %s9402_s12 = inlined_call_operand.vmem [shape: f32[512,12], index: 12, kind: input, shape index: {}]   ;;  %s9403_s13 = inlined_call_operand.hbm [shape: f32[1,12], index: 13, kind: input, shape index: {}]   ;;  %s9404_s14 = inlined_call_operand.hbm [shape: f32[8,12], index: 14, kind: output, shape index: {}]  }
   0x1   :  { %20 = vsyncpa [#allocation6], 0 }
   0x2   :  { %21 = vsyncpa [#allocation9], 0 }
   0x3   :  { %22 = vsyncpa [#allocation12], 0 }
   0x4   :  { %23 = vsyncpa [#allocation15], 0 }
   0x5   :  { %24 = vsyncpa [#allocation18], 0 }
   0x6   :  { %25 = vsyncpa [#allocation4], 0  ;;  %s8796_s29 = smov [#allocation5]   ;;  %s8797_s15 = smov [#allocation8]  }
   0x7   :  { %s46_s30 = sshll.u32 %s8796_s29, 4  ;;  %s66_s16 = sshll.u32 %s8797_s15, 4  ;;  %s47_s30 = int_to_ptr.vmem [resolvable:$true] %s46_s30  ;;  %s67_s16 = int_to_ptr.vmem [resolvable:$true] %s66_s16 }
   0x8   :  { %s8550_s17 = scalar_lea.vmem %s47_s30, 512  ;;  %p8555_p1 = scmp.lt.s32.totalorder %s47_s30, %s47_s30 }
   0x9   :  { %p8551_p0 = scmp.ne.s32.totalorder %s47_s30, %s8550_s17  ;;  %p8556_p2 = scmp.lt.s32.totalorder %s8550_s17, %s8550_s17 }
   0xb   :  { %p8557_p3 = por %p8556_p2, %p8555_p1 }
   0xd   :  { %p8558_p4 = pnand %p8557_p3, %p8551_p0 }
   0xf   :  { %8561 = shalt.err (!%p8558_p4)
}
  0x10   :  { %49 = dma.hbm_to_vmem [thread:$0]  %s9393_s3, 512, %s47_s30, [#allocation6]  }
  0x11   :  { %s8570_s20 = scalar_lea.vmem %s67_s16, 64  ;;  %p8575_p6 = scmp.lt.s32.totalorder %s67_s16, %s67_s16 }
  0x12   :  { %p8571_p5 = scmp.ne.s32.totalorder %s67_s16, %s8570_s20  ;;  %p8576_p7 = scmp.lt.s32.totalorder %s8570_s20, %s8570_s20 }
  0x14   :  { %p8577_p8 = por %p8576_p7, %p8575_p6 }
  0x16   :  { %p8578_p9 = pnand %p8577_p8, %p8571_p5 }
  0x18   :  { %8581 = shalt.err (!%p8578_p9)
}
  0x19   :  { %69 = dma.hbm_to_vmem [thread:$0]  %s9395_s5, 64, %s67_s16, [#allocation9]  }
  0x1a   :  { %s8798_s23 = smov [#allocation11]  }
  0x1b   :  { %s88_s24 = sshll.u32 %s8798_s23, 4  ;;  %s89_s24 = int_to_ptr.vmem [resolvable:$true] %s88_s24 }
  0x1c   :  { %s8590_s25 = scalar_lea.vmem %s89_s24, 64  ;;  %p8595_p11 = scmp.lt.s32.totalorder %s89_s24, %s89_s24 }
  0x1d   :  { %p8591_p10 = scmp.ne.s32.totalorder %s89_s24, %s8590_s25  ;;  %p8596_p12 = scmp.lt.s32.totalorder %s8590_s25, %s8590_s25 }
  0x1f   :  { %p8597_p13 = por %p8596_p12, %p8595_p11 }
  0x21   :  { %p8598_p0 = pnand %p8597_p13, %p8591_p10 }
  0x23   :  { %8601 = shalt.err (!%p8598_p0)
}
  0x24   :  { %91 = dma.hbm_to_vmem [thread:$0]  %s9397_s7, 64, %s89_s24, [#allocation12]  }
  0x25   :  { %s8799_s27 = smov [#allocation14]   ;;  %s8800_s29 = smov [#allocation17]  }
  0x26   :  { %s109_s28 = sshll.u32 %s8799_s27, 4  ;;  %s132_s30 = sshll.u32 %s8800_s29, 4  ;;  %s110_s28 = int_to_ptr.vmem [resolvable:$true] %s109_s28  ;;  %s133_s30 = int_to_ptr.vmem [resolvable:$true] %s132_s30 }
  0x27   :  { %s8610_s5 = scalar_lea.vmem %s110_s28, 16384  ;;  %p8615_p2 = scmp.lt.s32.totalorder %s110_s28, %s110_s28 }
  0x28   :  { %p8611_p1 = scmp.ne.s32.totalorder %s110_s28, %s8610_s5  ;;  %p8616_p3 = scmp.lt.s32.totalorder %s8610_s5, %s8610_s5 }
  0x2a   :  { %p8617_p4 = por %p8616_p3, %p8615_p2 }
  0x2c   :  { %p8618_p5 = pnand %p8617_p4, %p8611_p1 }
  0x2e   :  { %8621 = shalt.err (!%p8618_p5)
}
  0x2f   :  { %s8801_s15 = smov 256   ;;  %s8802_s16 = smov 16  }
  0x30   :  { %115 = dma.hbm_to_vmem [thread:$0]  %s9399_s9, 16384, %s110_s28, [#allocation15], %s8801_s15, %s8801_s15, %s8802_s16  }
  0x31   :  { %s8630_s7 = scalar_lea.vmem %s133_s30, 64  ;;  %p8635_p7 = scmp.lt.s32.totalorder %s133_s30, %s133_s30 }
  0x32   :  { %p8631_p6 = scmp.ne.s32.totalorder %s133_s30, %s8630_s7  ;;  %p8636_p8 = scmp.lt.s32.totalorder %s8630_s7, %s8630_s7 }
  0x34   :  { %p8637_p9 = por %p8636_p8, %p8635_p7 }
  0x36   :  { %p8638_p10 = pnand %p8637_p9, %p8631_p6 }
  0x38   :  { %8641 = shalt.err (!%p8638_p10)
}
  0x39   :  { %135 = dma.hbm_to_vmem [thread:$0]  %s9401_s11, 64, %s133_s30, [#allocation18]  }
  0x3a   :  { %s8803_s21 = smov [#allocation2]   ;;  %s8804_s23 = smov [#allocation7]  }
  0x3b   :  { %s36_s22 = sshll.u32 %s8803_s21, 4  ;;  %s56_s24 = sshll.u32 %s8804_s23, 4  ;;  %s37_s22 = int_to_ptr.vmem [resolvable:$true] %s36_s22  ;;  %s57_s24 = int_to_ptr.vmem [resolvable:$true] %s56_s24 }
  0x3c   :  { %s8650_s25 = scalar_lea.vmem %s37_s22, 1024  ;;  %p8655_p12 = scmp.lt.s32.totalorder %s37_s22, %s37_s22 }
  0x3d   :  { %p8651_p11 = scmp.ne.s32.totalorder %s37_s22, %s8650_s25  ;;  %p8656_p13 = scmp.lt.s32.totalorder %s8650_s25, %s8650_s25 }
  0x3f   :  { %p8657_p0 = por %p8656_p13, %p8655_p12 }
  0x41   :  { %p8658_p1 = pnand %p8657_p0, %p8651_p11 }
  0x43   :  { %8661 = shalt.err (!%p8658_p1)
}
  0x44   :  { %39 = dma.hbm_to_vmem [thread:$0]  %s9392_s2, 1024, %s37_s22, [#allocation3]  }
  0x45   :  { %s8670_s26 = scalar_lea.vmem %s57_s24, 256  ;;  %p8675_p3 = scmp.lt.s32.totalorder %s57_s24, %s57_s24 }
  0x46   :  { %p8671_p2 = scmp.ne.s32.totalorder %s57_s24, %s8670_s26  ;;  %p8676_p4 = scmp.lt.s32.totalorder %s8670_s26, %s8670_s26 }
  0x48   :  { %p8677_p5 = por %p8676_p4, %p8675_p3 }
  0x4a   :  { %p8678_p6 = pnand %p8677_p5, %p8671_p2 }
  0x4c   :  { %8681 = shalt.err (!%p8678_p6)
}
  0x4d   :  { %59 = dma.hbm_to_vmem [thread:$0]  %s9394_s4, 256, %s57_s24, [#allocation6]  }
  0x4e   :  { %s8805_s28 = smov [#allocation10]   ;;  %s8806_s30 = smov [#allocation13]  }
  0x4f   :  { %s75_s29 = sshll.u32 %s8805_s28, 4  ;;  %s97_s5 = sshll.u32 %s8806_s30, 4  ;;  %s76_s29 = int_to_ptr.vmem [resolvable:$true] %s75_s29  ;;  %s98_s5 = int_to_ptr.vmem [resolvable:$true] %s97_s5 }
  0x50   :  { %s8690_s17 = scalar_lea.vmem %s76_s29, 65536  ;;  %p8695_p8 = scmp.lt.s32.totalorder %s76_s29, %s76_s29 }
  0x51   :  { %p8691_p7 = scmp.ne.s32.totalorder %s76_s29, %s8690_s17  ;;  %p8696_p9 = scmp.lt.s32.totalorder %s8690_s17, %s8690_s17 }
  0x53   :  { %p8697_p10 = por %p8696_p9, %p8695_p8 }
  0x55   :  { %p8698_p11 = pnand %p8697_p10, %p8691_p7 }
  0x57   :  { %8701 = shalt.err (!%p8698_p11)
}
  0x58   :  { %81 = dma.hbm_to_vmem [thread:$0]  %s9396_s6, 65536, %s76_s29, [#allocation9], %s8801_s15, %s8801_s15, %s8802_s16  }
  0x59   :  { %s8710_s4 = scalar_lea.vmem %s98_s5, 16384  ;;  %p8715_p13 = scmp.lt.s32.totalorder %s98_s5, %s98_s5 }
  0x5a   :  { %p8711_p12 = scmp.ne.s32.totalorder %s98_s5, %s8710_s4  ;;  %p8716_p0 = scmp.lt.s32.totalorder %s8710_s4, %s8710_s4 }
  0x5c   :  { %p8717_p1 = por %p8716_p0, %p8715_p13 }
  0x5e   :  { %p8718_p2 = pnand %p8717_p1, %p8711_p12 }
  0x60   :  { %8721 = shalt.err (!%p8718_p2)
}
  0x61   :  { %103 = dma.hbm_to_vmem [thread:$0]  %s9398_s8, 16384, %s98_s5, [#allocation12], %s8801_s15, %s8801_s15, %s8802_s16  }
  0x62   :  { %s8807_s20 = smov [#allocation16]   ;;  %s8808_s22 = smov [#allocation19]  }
  0x63   :  { %s122_s21 = sshll.u32 %s8807_s20, 4  ;;  %s144_s6 = sshll.u32 %s8808_s22, 4  ;;  %s123_s21 = int_to_ptr.vmem [resolvable:$true] %s122_s21  ;;  %s145_s6 = int_to_ptr.vmem [resolvable:$true] %s144_s6 }
  0x64   :  { %s8730_s23 = scalar_lea.vmem %s123_s21, 256  ;;  %p8735_p4 = scmp.lt.s32.totalorder %s123_s21, %s123_s21 }
  0x65   :  { %p8731_p3 = scmp.ne.s32.totalorder %s123_s21, %s8730_s23  ;;  %p8736_p5 = scmp.lt.s32.totalorder %s8730_s23, %s8730_s23 }
  0x67   :  { %p8737_p6 = por %p8736_p5, %p8735_p4 }
  0x69   :  { %p8738_p7 = pnand %p8737_p6, %p8731_p3 }
  0x6b   :  { %8741 = shalt.err (!%p8738_p7)
}
  0x6c   :  { %125 = dma.hbm_to_vmem [thread:$0]  %s9400_s10, 256, %s123_s21, [#allocation15]  }
  0x6d   :  { %s8750_s9 = scalar_lea.vmem %s145_s6, 16  ;;  %s8754_s8 = scalar_lea.vmem %s145_s6, 32 }
  0x6e   :  { %p8751_p8 = scmp.ne.s32.totalorder %s145_s6, %s8750_s9  ;;  %p8755_p9 = scmp.lt.s32.totalorder %s145_s6, %s145_s6 }
  0x6f   :  { %p8756_p10 = scmp.lt.s32.totalorder %s8754_s8, %s8750_s9 }
  0x71   :  { %p8757_p11 = por %p8756_p10, %p8755_p9 }
  0x73   :  { %p8758_p12 = pnand %p8757_p11, %p8751_p8 }
  0x75   :  { %8761 = shalt.err (!%p8758_p12)
}
  0x76   :  { %147 = dma.hbm_to_vmem [thread:$0]  %s9403_s13, 16, %s145_s6, [#allocation18]  }
  0x77   :  { %8782 = dma.done.wait [#allocation3], 1024  }
  0x78   :  { %8783 = vsyncadd [#allocation3], 4294966272 }
  0x79   :  { %8784 = dma.done.wait [#allocation6], 768  }
  0x7a   :  { %8785 = vsyncadd [#allocation6], 4294966528 }
  0x7b   :  { %8786 = dma.done.wait [#allocation9], 65600  }
  0x7c   :  { %8787 = vsyncadd [#allocation9], 4294901696 }
  0x7d   :  { %8788 = dma.done.wait [#allocation12], 16448  }
  0x7e   :  { %8789 = vsyncadd [#allocation12], 4294950848 }
  0x7f   :  { %8790 = dma.done.wait [#allocation15], 16640  }
  0x80   :  { %8791 = vsyncadd [#allocation15], 4294950656 }
  0x81   :  { %8792 = dma.done.wait [#allocation18], 80  }
  0x82   :  { %8793 = vsyncadd [#allocation18], 4294967216  ;;  %v8809_v0 = vmov 0.0   ;;  %v182_v1 = vld [vmem:[#allocation7] sm:$0xff]  ;;  %vm214_vm0 = vcmask 1043456   ;;  %v183_v2 = vld [vmem:[#allocation7 + $0x8] sm:$0xff] }
  0x83   :  { %287 = vmatprep.mubr.f32.mxu0 %v8809_v0  ;;  %358 = vmatprep.mubr.f32.mxu1 %v8809_v0  ;;  %v181_v3 = vld [vmem:[%s9390_s0] sm:$0xff]  ;;  %v208_v4 = vcombine.high %v182_v1, %v182_v1  ;;  %v209_v5 = vcombine.high %v183_v2, %v183_v2  ;;  %vm210_vm1 = vcmask 31744   ;;  %v7372_v7 = vld [vmem:[#allocation10 + $0xe4] ss:$16 sps:$4 sm:$0xff]   ;;  %vm6464_vm2 = vcmask 97280  }
  0x84   :  { %v7370_v6 = vld [vmem:[#allocation10 + $0xe0] ss:$16 sps:$4 sm:$0xff]   ;;  %v7375_v9 = vld [vmem:[#allocation10 + $0x2e4] ss:$16 sps:$4 sm:$0xff]  }
  0x85   :  { %6486 = vmatprep.subr.msk.mxu0 %vm214_vm0, %v208_v4  ;;  %6489 = vmatprep.subr.msk.mxu1 %vm214_vm0, %v209_v5  ;;  %v7373_v8 = vld [vmem:[#allocation10 + $0x2e0] ss:$16 sps:$4 sm:$0xff]   ;;  %v7378_v10 = vld [vmem:[#allocation10 + $0xc4] ss:$16 sps:$4 sm:$0xff]  }
  0x86   :  { %6487 = vmatpush1.msk.msra.mxu0 %vm214_vm0, %v182_v1  ;;  %6490 = vmatpush1.msk.msra.mxu1 %vm214_vm0, %v183_v2  ;;  %v7381_v11 = vld [vmem:[#allocation10 + $0x2c4] ss:$16 sps:$4 sm:$0xff]   ;;  %v7376_v12 = vld [vmem:[#allocation10 + $0xc0] ss:$16 sps:$4 sm:$0xff]  }
  0x87   :  { %6488 = vmatmul.mubr.msk.f32.vlgmr.msra.gmra.mxu0 %vm210_vm1, %v181_v3  ;;  %3527 = vmatprep.subr.bf16.mxu0 %v7372_v7  ;;  %v7379_v13 = vld [vmem:[#allocation10 + $0x2c0] ss:$16 sps:$4 sm:$0xff]   ;;  %v7384_v14 = vld [vmem:[#allocation10 + $0xa4] ss:$16 sps:$4 sm:$0xff]  }
  0x88   :  { %3568 = vmatprep.subr.bf16.mxu1 %v7375_v9  ;;  %6491 = vmatmul.mubr.msk.f32.vlgmr.msra.gmra.mxu1 %vm210_vm1, %v181_v3  ;;  %v7387_v15 = vld [vmem:[#allocation10 + $0x2a4] ss:$16 sps:$4 sm:$0xff]   ;;  %v7382_v16 = vld [vmem:[#allocation10 + $0xa0] ss:$16 sps:$4 sm:$0xff]  }
  0x89   :  { %3528 = vmatpush1.bf16.msra.mxu0 %v7370_v6  ;;  %3569 = vmatpush1.bf16.msra.mxu1 %v7373_v8  ;;  %v7385_v17 = vld [vmem:[#allocation10 + $0x2a0] ss:$16 sps:$4 sm:$0xff]   ;;  %v7390_v18 = vld [vmem:[#allocation10 + $0x84] ss:$16 sps:$4 sm:$0xff]  }
  0x8a   :  { %3529 = vmatprep.subr.bf16.mxu0 %v7378_v10  ;;  %3570 = vmatprep.subr.bf16.mxu1 %v7381_v11  ;;  %v7393_v19 = vld [vmem:[#allocation10 + $0x284] ss:$16 sps:$4 sm:$0xff]   ;;  %v7388_v20 = vld [vmem:[#allocation10 + $0x80] ss:$16 sps:$4 sm:$0xff]  }
  0x8b   :  { %v7391_v21 = vld [vmem:[#allocation10 + $0x280] ss:$16 sps:$4 sm:$0xff]   ;;  %v7396_v22 = vld [vmem:[#allocation10 + $0x64] ss:$16 sps:$4 sm:$0xff]  }
  0x8c   :  { %v7399_v23 = vld [vmem:[#allocation10 + $0x264] ss:$16 sps:$4 sm:$0xff]   ;;  %v7394_v24 = vld [vmem:[#allocation10 + $0x60] ss:$16 sps:$4 sm:$0xff]  }
  0x8d   :  { %3530 = vmatpush1.bf16.msra.mxu0 %v7376_v12  ;;  %3571 = vmatpush1.bf16.msra.mxu1 %v7379_v13  ;;  %v7397_v25 = vld [vmem:[#allocation10 + $0x260] ss:$16 sps:$4 sm:$0xff]   ;;  %v7402_v26 = vld [vmem:[#allocation10 + $0x44] ss:$16 sps:$4 sm:$0xff]  }
  0x8e   :  { %3531 = vmatprep.subr.bf16.mxu0 %v7384_v14  ;;  %3572 = vmatprep.subr.bf16.mxu1 %v7387_v15  ;;  %v7405_v27 = vld [vmem:[#allocation10 + $0x244] ss:$16 sps:$4 sm:$0xff]   ;;  %v7400_v28 = vld [vmem:[#allocation10 + $0x40] ss:$16 sps:$4 sm:$0xff]  }
  0x8f   :  { %v7403_v29 = vld [vmem:[#allocation10 + $0x240] ss:$16 sps:$4 sm:$0xff]   ;;  %v7408_v30 = vld [vmem:[#allocation10 + $0x24] ss:$16 sps:$4 sm:$0xff]  }
  0x90   :  { %v7411_v31 = vld [vmem:[#allocation10 + $0x224] ss:$16 sps:$4 sm:$0xff]   ;;  %v7406_v32 = vld [vmem:[#allocation10 + $0x20] ss:$16 sps:$4 sm:$0xff]  }
  0x91   :  { %3532 = vmatpush1.bf16.msra.mxu0 %v7382_v16  ;;  %3573 = vmatpush1.bf16.msra.mxu1 %v7385_v17  ;;  %v7409_v33 = vld [vmem:[#allocation10 + $0x220] ss:$16 sps:$4 sm:$0xff]   ;;  %v7414_v34 = vld [vmem:[#allocation10 + $0x4] ss:$16 sps:$4 sm:$0xff]  }
  0x92   :  { %3533 = vmatprep.subr.bf16.mxu0 %v7390_v18  ;;  %3574 = vmatprep.subr.bf16.mxu1 %v7393_v19  ;;  %v7417_v35 = vld [vmem:[#allocation10 + $0x204] ss:$16 sps:$4 sm:$0xff]   ;;  %v7412_v36 = vld [vmem:[#allocation10] ss:$16 sps:$4 sm:$0xff]  }
  0x93   :  { %v7415_v37 = vld [vmem:[#allocation10 + $0x200] ss:$16 sps:$4 sm:$0xff]   ;;  %v7420_v38 = vld [vmem:[#allocation10 + $0x1e4] ss:$16 sps:$4 sm:$0xff]  }
  0x94   :  { %v7423_v39 = vld [vmem:[#allocation10 + $0x3e4] ss:$16 sps:$4 sm:$0xff]   ;;  %v7418_v40 = vld [vmem:[#allocation10 + $0x1e0] ss:$16 sps:$4 sm:$0xff]  }
  0x95   :  { %3534 = vmatpush1.bf16.msra.mxu0 %v7388_v20  ;;  %3575 = vmatpush1.bf16.msra.mxu1 %v7391_v21  ;;  %v7421_v41 = vld [vmem:[#allocation10 + $0x3e0] ss:$16 sps:$4 sm:$0xff]   ;;  %v7426_v42 = vld [vmem:[#allocation10 + $0x1c4] ss:$16 sps:$4 sm:$0xff]  }
  0x96   :  { %3535 = vmatprep.subr.bf16.mxu0 %v7396_v22  ;;  %3576 = vmatprep.subr.bf16.mxu1 %v7399_v23  ;;  %v7429_v43 = vld [vmem:[#allocation10 + $0x3c4] ss:$16 sps:$4 sm:$0xff]   ;;  %v7424_v44 = vld [vmem:[#allocation10 + $0x1c0] ss:$16 sps:$4 sm:$0xff]  }
  0x97   :  { %v7427_v45 = vld [vmem:[#allocation10 + $0x3c0] ss:$16 sps:$4 sm:$0xff]   ;;  %v7432_v46 = vld [vmem:[#allocation10 + $0x1a4] ss:$16 sps:$4 sm:$0xff]  }
  0x98   :  { %v7435_v47 = vld [vmem:[#allocation10 + $0x3a4] ss:$16 sps:$4 sm:$0xff]   ;;  %v7430_v48 = vld [vmem:[#allocation10 + $0x1a0] ss:$16 sps:$4 sm:$0xff]  }
  0x99   :  { %3536 = vmatpush1.bf16.msra.mxu0 %v7394_v24  ;;  %3577 = vmatpush1.bf16.msra.mxu1 %v7397_v25  ;;  %v7433_v49 = vld [vmem:[#allocation10 + $0x3a0] ss:$16 sps:$4 sm:$0xff]   ;;  %v7438_v50 = vld [vmem:[#allocation10 + $0x184] ss:$16 sps:$4 sm:$0xff]  }
  0x9a   :  { %3537 = vmatprep.subr.bf16.mxu0 %v7402_v26  ;;  %3578 = vmatprep.subr.bf16.mxu1 %v7405_v27  ;;  %v7441_v51 = vld [vmem:[#allocation10 + $0x384] ss:$16 sps:$4 sm:$0xff]   ;;  %v369_v52 = vld [vmem:[#allocation2] sm:$0xff] }
  0x9b   :  { %v8939_v53 = vcombine.high %v369_v52, %v369_v52  ;;  %v370_v54 = vld [vmem:[#allocation2 + $0x8] sm:$0xff]  ;;  %v7436_v56 = vld [vmem:[#allocation10 + $0x180] ss:$16 sps:$4 sm:$0xff]   ;;  %v8945_v13 = vcombine.low %v369_v52, %v369_v52 }
  0x9c   :  { %v8941_v55 = vcombine.high %v370_v54, %v370_v54  ;;  %v7439_v57 = vld [vmem:[#allocation10 + $0x380] ss:$16 sps:$4 sm:$0xff]   ;;  %v7444_v58 = vld [vmem:[#allocation10 + $0x164] ss:$16 sps:$4 sm:$0xff]   ;;  %v8947_v14 = vcombine.low %v370_v54, %v370_v54 }
  0x9d   :  { %3538 = vmatpush1.bf16.msra.mxu0 %v7400_v28  ;;  %3579 = vmatpush1.bf16.msra.mxu1 %v7403_v29  ;;  %v7447_v59 = vld [vmem:[#allocation10 + $0x364] ss:$16 sps:$4 sm:$0xff]   ;;  %v7442_v60 = vld [vmem:[#allocation10 + $0x160] ss:$16 sps:$4 sm:$0xff]  }
  0x9e   :  { %3539 = vmatprep.subr.bf16.mxu0 %v7408_v30  ;;  %3580 = vmatprep.subr.bf16.mxu1 %v7411_v31  ;;  %v7445_v61 = vld [vmem:[#allocation10 + $0x360] ss:$16 sps:$4 sm:$0xff]   ;;  %v7450_v62 = vld [vmem:[#allocation10 + $0x144] ss:$16 sps:$4 sm:$0xff]  }
  0x9f   :  { %3559 = vmatprep.mubr.bf16.mxu0 %v8939_v53  ;;  %3600 = vmatprep.mubr.bf16.mxu1 %v8941_v55  ;;  %v7453_v63 = vld [vmem:[#allocation10 + $0x344] ss:$16 sps:$4 sm:$0xff]   ;;  %v7448_v1 = vld [vmem:[#allocation10 + $0x140] ss:$16 sps:$4 sm:$0xff]  }
  0xa0   :  { %v7451_v2 = vld [vmem:[#allocation10 + $0x340] ss:$16 sps:$4 sm:$0xff]   ;;  %v7456_v3 = vld [vmem:[#allocation10 + $0x124] ss:$16 sps:$4 sm:$0xff]  }
  0xa1   :  { %3540 = vmatpush1.bf16.msra.mxu0 %v7406_v32  ;;  %3581 = vmatpush1.bf16.msra.mxu1 %v7409_v33  ;;  %v7459_v4 = vld [vmem:[#allocation10 + $0x324] ss:$16 sps:$4 sm:$0xff]   ;;  %v7454_v5 = vld [vmem:[#allocation10 + $0x120] ss:$16 sps:$4 sm:$0xff]  }
  0xa2   :  { %3541 = vmatprep.subr.bf16.mxu0 %v7414_v34  ;;  %3582 = vmatprep.subr.bf16.mxu1 %v7417_v35  ;;  %v7457_v6 = vld [vmem:[#allocation10 + $0x320] ss:$16 sps:$4 sm:$0xff]   ;;  %v7462_v7 = vld [vmem:[#allocation10 + $0x104] ss:$16 sps:$4 sm:$0xff]  }
  0xa3   :  { %v7465_v8 = vld [vmem:[#allocation10 + $0x304] ss:$16 sps:$4 sm:$0xff]   ;;  %v7460_v9 = vld [vmem:[#allocation10 + $0x100] ss:$16 sps:$4 sm:$0xff]  }
  0xa4   :  { %v7463_v10 = vld [vmem:[#allocation10 + $0x300] ss:$16 sps:$4 sm:$0xff]   ;;  %v7472_v11 = vld [vmem:[#allocation10 + $0x4e4] ss:$16 sps:$4 sm:$0xff]  }
  0xa5   :  { %3542 = vmatpush1.bf16.msra.mxu0 %v7412_v36  ;;  %3583 = vmatpush1.bf16.msra.mxu1 %v7415_v37  ;;  %v7475_v12 = vld [vmem:[#allocation10 + $0x6e4] ss:$16 sps:$4 sm:$0xff]   ;;  %v7470_v15 = vld [vmem:[#allocation10 + $0x4e0] ss:$16 sps:$4 sm:$0xff]  }
  0xa6   :  { %3543 = vmatprep.subr.bf16.mxu0 %v7420_v38  ;;  %3584 = vmatprep.subr.bf16.mxu1 %v7423_v39  ;;  %v7473_v16 = vld [vmem:[#allocation10 + $0x6e0] ss:$16 sps:$4 sm:$0xff]   ;;  %v7478_v17 = vld [vmem:[#allocation10 + $0x4c4] ss:$16 sps:$4 sm:$0xff]  }
  0xa7   :  { %v7481_v18 = vld [vmem:[#allocation10 + $0x6c4] ss:$16 sps:$4 sm:$0xff]   ;;  %v7476_v19 = vld [vmem:[#allocation10 + $0x4c0] ss:$16 sps:$4 sm:$0xff]  }
  0xa8   :  { %v7479_v20 = vld [vmem:[#allocation10 + $0x6c0] ss:$16 sps:$4 sm:$0xff]   ;;  %v7484_v21 = vld [vmem:[#allocation10 + $0x4a4] ss:$16 sps:$4 sm:$0xff]  }
  0xa9   :  { %3544 = vmatpush2.bf16.msra.mxu0 %v7418_v40  ;;  %3585 = vmatpush2.bf16.msra.mxu1 %v7421_v41  ;;  %v7487_v22 = vld [vmem:[#allocation10 + $0x6a4] ss:$16 sps:$4 sm:$0xff]   ;;  %v7482_v23 = vld [vmem:[#allocation10 + $0x4a0] ss:$16 sps:$4 sm:$0xff]  }
  0xaa   :  { %3545 = vmatprep.subr.bf16.mxu0 %v7426_v42  ;;  %3586 = vmatprep.subr.bf16.mxu1 %v7429_v43  ;;  %v7485_v24 = vld [vmem:[#allocation10 + $0x6a0] ss:$16 sps:$4 sm:$0xff]   ;;  %v7490_v25 = vld [vmem:[#allocation10 + $0x484] ss:$16 sps:$4 sm:$0xff]  }
  0xab   :  { %v7493_v26 = vld [vmem:[#allocation10 + $0x684] ss:$16 sps:$4 sm:$0xff]   ;;  %v7488_v27 = vld [vmem:[#allocation10 + $0x480] ss:$16 sps:$4 sm:$0xff]  }
  0xac   :  { %v7491_v28 = vld [vmem:[#allocation10 + $0x680] ss:$16 sps:$4 sm:$0xff]   ;;  %v7496_v29 = vld [vmem:[#allocation10 + $0x464] ss:$16 sps:$4 sm:$0xff]  }
  0xad   :  { %3546 = vmatpush2.bf16.msra.mxu0 %v7424_v44  ;;  %3587 = vmatpush2.bf16.msra.mxu1 %v7427_v45  ;;  %v7499_v30 = vld [vmem:[#allocation10 + $0x664] ss:$16 sps:$4 sm:$0xff]   ;;  %v7494_v31 = vld [vmem:[#allocation10 + $0x460] ss:$16 sps:$4 sm:$0xff]  }
  0xae   :  { %3547 = vmatprep.subr.bf16.mxu0 %v7432_v46  ;;  %3588 = vmatprep.subr.bf16.mxu1 %v7435_v47  ;;  %v7497_v32 = vld [vmem:[#allocation10 + $0x660] ss:$16 sps:$4 sm:$0xff]   ;;  %v7502_v33 = vld [vmem:[#allocation10 + $0x444] ss:$16 sps:$4 sm:$0xff]  }
  0xaf   :  { %v7505_v34 = vld [vmem:[#allocation10 + $0x644] ss:$16 sps:$4 sm:$0xff]   ;;  %v7500_v35 = vld [vmem:[#allocation10 + $0x440] ss:$16 sps:$4 sm:$0xff]  }
  0xb0   :  { %v7503_v36 = vld [vmem:[#allocation10 + $0x640] ss:$16 sps:$4 sm:$0xff]   ;;  %v8953_v38 = vld [vmem:[#allocation2 + $0x18] sm:$0xff] }
  0xb1   :  { %3548 = vmatpush2.bf16.msra.mxu0 %v7430_v48  ;;  %3589 = vmatpush2.bf16.msra.mxu1 %v7433_v49  ;;  %v8951_v37 = vld [vmem:[#allocation2 + $0x10] sm:$0xff]  ;;  %v7508_v39 = vld [vmem:[#allocation10 + $0x424] ss:$16 sps:$4 sm:$0xff]   ;;  %v8961_v42 = vcombine.high %v8953_v38, %v8953_v38 }
  0xb2   :  { %3549 = vmatprep.subr.bf16.mxu0 %v7438_v50  ;;  %3590 = vmatprep.subr.bf16.mxu1 %v7441_v51  ;;  %v7511_v40 = vld [vmem:[#allocation10 + $0x624] ss:$16 sps:$4 sm:$0xff]   ;;  %v8957_v41 = vcombine.high %v8951_v37, %v8951_v37  ;;  %v7506_v43 = vld [vmem:[#allocation10 + $0x420] ss:$16 sps:$4 sm:$0xff]  }
  0xb3   :  { %v7509_v44 = vld [vmem:[#allocation10 + $0x620] ss:$16 sps:$4 sm:$0xff]   ;;  %v7514_v45 = vld [vmem:[#allocation10 + $0x404] ss:$16 sps:$4 sm:$0xff]  }
  0xb4   :  { %v7517_v46 = vld [vmem:[#allocation10 + $0x604] ss:$16 sps:$4 sm:$0xff]   ;;  %v7512_v47 = vld [vmem:[#allocation10 + $0x400] ss:$16 sps:$4 sm:$0xff]  }
  0xb5   :  { %3550 = vmatpush2.bf16.msra.mxu0 %v7436_v56  ;;  %3591 = vmatpush2.bf16.msra.mxu1 %v7439_v57  ;;  %v7515_v48 = vld [vmem:[#allocation10 + $0x600] ss:$16 sps:$4 sm:$0xff]   ;;  %v7520_v49 = vld [vmem:[#allocation10 + $0x5e4] ss:$16 sps:$4 sm:$0xff]  }
  0xb6   :  { %3551 = vmatprep.subr.bf16.mxu0 %v7444_v58  ;;  %3592 = vmatprep.subr.bf16.mxu1 %v7447_v59  ;;  %v7523_v50 = vld [vmem:[#allocation10 + $0x7e4] ss:$16 sps:$4 sm:$0xff]   ;;  %v7518_v51 = vld [vmem:[#allocation10 + $0x5e0] ss:$16 sps:$4 sm:$0xff]  }
  0xb7   :  { %v7521_v52 = vld [vmem:[#allocation10 + $0x7e0] ss:$16 sps:$4 sm:$0xff]   ;;  %v7526_v54 = vld [vmem:[#allocation10 + $0x5c4] ss:$16 sps:$4 sm:$0xff]  }
  0xb8   :  { %v7529_v56 = vld [vmem:[#allocation10 + $0x7c4] ss:$16 sps:$4 sm:$0xff]   ;;  %v7524_v57 = vld [vmem:[#allocation10 + $0x5c0] ss:$16 sps:$4 sm:$0xff]  }
  0xb9   :  { %3552 = vmatpush2.bf16.msra.mxu0 %v7442_v60  ;;  %3593 = vmatpush2.bf16.msra.mxu1 %v7445_v61  ;;  %v7527_v58 = vld [vmem:[#allocation10 + $0x7c0] ss:$16 sps:$4 sm:$0xff]   ;;  %v7532_v59 = vld [vmem:[#allocation10 + $0x5a4] ss:$16 sps:$4 sm:$0xff]  }
  0xba   :  { %3553 = vmatprep.subr.bf16.mxu0 %v7450_v62  ;;  %3594 = vmatprep.subr.bf16.mxu1 %v7453_v63  ;;  %v7535_v60 = vld [vmem:[#allocation10 + $0x7a4] ss:$16 sps:$4 sm:$0xff]   ;;  %v7530_v61 = vld [vmem:[#allocation10 + $0x5a0] ss:$16 sps:$4 sm:$0xff]  }
  0xbb   :  { %v7533_v62 = vld [vmem:[#allocation10 + $0x7a0] ss:$16 sps:$4 sm:$0xff]   ;;  %v7538_v63 = vld [vmem:[#allocation10 + $0x584] ss:$16 sps:$4 sm:$0xff]  }
  0xbd   :  { %3554 = vmatpush2.bf16.msra.mxu0 %v7448_v1  ;;  %3595 = vmatpush2.bf16.msra.mxu1 %v7451_v2  ;;  %v7541_v1 = vld [vmem:[#allocation10 + $0x784] ss:$16 sps:$4 sm:$0xff]   ;;  %v7536_v2 = vld [vmem:[#allocation10 + $0x580] ss:$16 sps:$4 sm:$0xff]  }
  0xbe   :  { %3555 = vmatprep.subr.bf16.mxu0 %v7456_v3  ;;  %3596 = vmatprep.subr.bf16.mxu1 %v7459_v4  ;;  %v7539_v3 = vld [vmem:[#allocation10 + $0x780] ss:$16 sps:$4 sm:$0xff]   ;;  %v7544_v4 = vld [vmem:[#allocation10 + $0x564] ss:$16 sps:$4 sm:$0xff]  }
  0xc1   :  { %3556 = vmatpush2.bf16.msra.mxu0 %v7454_v5  ;;  %3597 = vmatpush2.bf16.msra.mxu1 %v7457_v6  ;;  %v7547_v5 = vld [vmem:[#allocation10 + $0x764] ss:$16 sps:$4 sm:$0xff]   ;;  %v7542_v6 = vld [vmem:[#allocation10 + $0x560] ss:$16 sps:$4 sm:$0xff]  }
  0xc2   :  { %3557 = vmatprep.subr.bf16.mxu0 %v7462_v7  ;;  %3598 = vmatprep.subr.bf16.mxu1 %v7465_v8  ;;  %v7545_v7 = vld [vmem:[#allocation10 + $0x760] ss:$16 sps:$4 sm:$0xff]   ;;  %v7550_v8 = vld [vmem:[#allocation10 + $0x544] ss:$16 sps:$4 sm:$0xff]  }
  0xc5   :  { %3558 = vmatpush2.bf16.msra.mxu0 %v7460_v9  ;;  %3599 = vmatpush2.bf16.msra.mxu1 %v7463_v10  ;;  %v7553_v9 = vld [vmem:[#allocation10 + $0x744] ss:$16 sps:$4 sm:$0xff]   ;;  %v7548_v10 = vld [vmem:[#allocation10 + $0x540] ss:$16 sps:$4 sm:$0xff]  }
  0xc6   :  { %3609 = vmatprep.subr.bf16.mxu0 %v7472_v11  ;;  %3650 = vmatprep.subr.bf16.mxu1 %v7475_v12  ;;  %v7551_v11 = vld [vmem:[#allocation10 + $0x740] ss:$16 sps:$4 sm:$0xff]   ;;  %v7556_v12 = vld [vmem:[#allocation10 + $0x524] ss:$16 sps:$4 sm:$0xff]  }
  0xc8   :  { %3560 = vmatmul.mubr.bf16.vlgmr.msra.gmra.mxu0 %v8945_v13  ;;  %3601 = vmatmul.mubr.bf16.vlgmr.msra.gmra.mxu1 %v8947_v14 }
  0xc9   :  { %3610 = vmatpush1.bf16.msra.mxu0 %v7470_v15  ;;  %3651 = vmatpush1.bf16.msra.mxu1 %v7473_v16  ;;  %v7559_v15 = vld [vmem:[#allocation10 + $0x724] ss:$16 sps:$4 sm:$0xff]   ;;  %v7554_v16 = vld [vmem:[#allocation10 + $0x520] ss:$16 sps:$4 sm:$0xff]  }
  0xca   :  { %3611 = vmatprep.subr.bf16.mxu0 %v7478_v17  ;;  %3652 = vmatprep.subr.bf16.mxu1 %v7481_v18  ;;  %v7557_v17 = vld [vmem:[#allocation10 + $0x720] ss:$16 sps:$4 sm:$0xff]   ;;  %v7562_v18 = vld [vmem:[#allocation10 + $0x504] ss:$16 sps:$4 sm:$0xff]  }
  0xcb   :  { %3641 = vmatprep.mubr.bf16.mxu0 %v8957_v41  ;;  %3682 = vmatprep.mubr.bf16.mxu1 %v8961_v42 }
  0xcd   :  { %3612 = vmatpush1.bf16.msra.mxu0 %v7476_v19  ;;  %3653 = vmatpush1.bf16.msra.mxu1 %v7479_v20  ;;  %v7565_v19 = vld [vmem:[#allocation10 + $0x704] ss:$16 sps:$4 sm:$0xff]   ;;  %v7560_v20 = vld [vmem:[#allocation10 + $0x500] ss:$16 sps:$4 sm:$0xff]  }
  0xce   :  { %3613 = vmatprep.subr.bf16.mxu0 %v7484_v21  ;;  %3654 = vmatprep.subr.bf16.mxu1 %v7487_v22  ;;  %v7563_v21 = vld [vmem:[#allocation10 + $0x700] ss:$16 sps:$4 sm:$0xff]   ;;  %v7572_v22 = vld [vmem:[#allocation10 + $0x8e4] ss:$16 sps:$4 sm:$0xff]  }
  0xd1   :  { %3614 = vmatpush1.bf16.msra.mxu0 %v7482_v23  ;;  %3655 = vmatpush1.bf16.msra.mxu1 %v7485_v24  ;;  %v7575_v23 = vld [vmem:[#allocation10 + $0xae4] ss:$16 sps:$4 sm:$0xff]   ;;  %v8967_v24 = vcombine.low %v8951_v37, %v8951_v37 }
  0xd2   :  { %3615 = vmatprep.subr.bf16.mxu0 %v7490_v25  ;;  %3656 = vmatprep.subr.bf16.mxu1 %v7493_v26  ;;  %v8971_v25 = vcombine.low %v8953_v38, %v8953_v38  ;;  %v7570_v26 = vld [vmem:[#allocation10 + $0x8e0] ss:$16 sps:$4 sm:$0xff]   ;;  %v7587_v37 = vld [vmem:[#allocation10 + $0xaa4] ss:$16 sps:$4 sm:$0xff]  }
  0xd3   :  { %v7582_v38 = vld [vmem:[#allocation10 + $0x8a0] ss:$16 sps:$4 sm:$0xff]  }
  0xd5   :  { %3616 = vmatpush1.bf16.msra.mxu0 %v7488_v27  ;;  %3657 = vmatpush1.bf16.msra.mxu1 %v7491_v28  ;;  %v8973_v27 = vld [vmem:[#allocation2 + $0x20] sm:$0xff]  ;;  %v8975_v28 = vld [vmem:[#allocation2 + $0x28] sm:$0xff] }
  0xd6   :  { %3617 = vmatprep.subr.bf16.mxu0 %v7496_v29  ;;  %3658 = vmatprep.subr.bf16.mxu1 %v7499_v30  ;;  %v7573_v29 = vld [vmem:[#allocation10 + $0xae0] ss:$16 sps:$4 sm:$0xff]   ;;  %v7578_v30 = vld [vmem:[#allocation10 + $0x8c4] ss:$16 sps:$4 sm:$0xff]  }
  0xd9   :  { %3618 = vmatpush1.bf16.msra.mxu0 %v7494_v31  ;;  %3659 = vmatpush1.bf16.msra.mxu1 %v7497_v32  ;;  %v7581_v31 = vld [vmem:[#allocation10 + $0xac4] ss:$16 sps:$4 sm:$0xff]   ;;  %v8979_v32 = vcombine.high %v8973_v27, %v8973_v27 }
  0xda   :  { %3619 = vmatprep.subr.bf16.mxu0 %v7502_v33  ;;  %3660 = vmatprep.subr.bf16.mxu1 %v7505_v34  ;;  %v8983_v33 = vcombine.high %v8975_v28, %v8975_v28  ;;  %v7576_v34 = vld [vmem:[#allocation10 + $0x8c0] ss:$16 sps:$4 sm:$0xff]  }
  0xdd   :  { %3620 = vmatpush1.bf16.msra.mxu0 %v7500_v35  ;;  %3661 = vmatpush1.bf16.msra.mxu1 %v7503_v36  ;;  %v7579_v35 = vld [vmem:[#allocation10 + $0xac0] ss:$16 sps:$4 sm:$0xff]   ;;  %v7584_v36 = vld [vmem:[#allocation10 + $0x8a4] ss:$16 sps:$4 sm:$0xff]  }
  0xde   :  { %3621 = vmatprep.subr.bf16.mxu0 %v7508_v39  ;;  %3662 = vmatprep.subr.bf16.mxu1 %v7511_v40  ;;  %v7585_v39 = vld [vmem:[#allocation10 + $0xaa0] ss:$16 sps:$4 sm:$0xff]   ;;  %v7590_v40 = vld [vmem:[#allocation10 + $0x884] ss:$16 sps:$4 sm:$0xff]  }
  0xe1   :  { %3622 = vmatpush1.bf16.msra.mxu0 %v7506_v43  ;;  %3663 = vmatpush1.bf16.msra.mxu1 %v7509_v44  ;;  %v7593_v43 = vld [vmem:[#allocation10 + $0xa84] ss:$16 sps:$4 sm:$0xff]   ;;  %v7588_v44 = vld [vmem:[#allocation10 + $0x880] ss:$16 sps:$4 sm:$0xff]  }
  0xe2   :  { %3623 = vmatprep.subr.bf16.mxu0 %v7514_v45  ;;  %3664 = vmatprep.subr.bf16.mxu1 %v7517_v46  ;;  %v7591_v45 = vld [vmem:[#allocation10 + $0xa80] ss:$16 sps:$4 sm:$0xff]   ;;  %v7596_v46 = vld [vmem:[#allocation10 + $0x864] ss:$16 sps:$4 sm:$0xff]  }
  0xe5   :  { %3624 = vmatpush1.bf16.msra.mxu0 %v7512_v47  ;;  %3665 = vmatpush1.bf16.msra.mxu1 %v7515_v48  ;;  %v7599_v47 = vld [vmem:[#allocation10 + $0xa64] ss:$16 sps:$4 sm:$0xff]   ;;  %v7594_v48 = vld [vmem:[#allocation10 + $0x860] ss:$16 sps:$4 sm:$0xff]  }
  0xe6   :  { %3625 = vmatprep.subr.bf16.mxu0 %v7520_v49  ;;  %3666 = vmatprep.subr.bf16.mxu1 %v7523_v50  ;;  %v7597_v49 = vld [vmem:[#allocation10 + $0xa60] ss:$16 sps:$4 sm:$0xff]   ;;  %v7602_v50 = vld [vmem:[#allocation10 + $0x844] ss:$16 sps:$4 sm:$0xff]  }
  0xe9   :  { %3626 = vmatpush2.bf16.msra.mxu0 %v7518_v51  ;;  %3667 = vmatpush2.bf16.msra.mxu1 %v7521_v52  ;;  %v7605_v51 = vld [vmem:[#allocation10 + $0xa44] ss:$16 sps:$4 sm:$0xff]   ;;  %v7600_v52 = vld [vmem:[#allocation10 + $0x840] ss:$16 sps:$4 sm:$0xff]  }
  0xea   :  { %3627 = vmatprep.subr.bf16.mxu0 %v7526_v54  ;;  %3668 = vmatprep.subr.bf16.mxu1 %v7529_v56  ;;  %v7603_v54 = vld [vmem:[#allocation10 + $0xa40] ss:$16 sps:$4 sm:$0xff]   ;;  %v7608_v56 = vld [vmem:[#allocation10 + $0x824] ss:$16 sps:$4 sm:$0xff]  }
  0xed   :  { %3628 = vmatpush2.bf16.msra.mxu0 %v7524_v57  ;;  %3669 = vmatpush2.bf16.msra.mxu1 %v7527_v58  ;;  %v7611_v57 = vld [vmem:[#allocation10 + $0xa24] ss:$16 sps:$4 sm:$0xff]   ;;  %v7606_v58 = vld [vmem:[#allocation10 + $0x820] ss:$16 sps:$4 sm:$0xff]  }
  0xee   :  { %3629 = vmatprep.subr.bf16.mxu0 %v7532_v59  ;;  %3670 = vmatprep.subr.bf16.mxu1 %v7535_v60  ;;  %v7609_v59 = vld [vmem:[#allocation10 + $0xa20] ss:$16 sps:$4 sm:$0xff]   ;;  %v7614_v60 = vld [vmem:[#allocation10 + $0x804] ss:$16 sps:$4 sm:$0xff]  }
  0xf1   :  { %3630 = vmatpush2.bf16.msra.mxu0 %v7530_v61  ;;  %3671 = vmatpush2.bf16.msra.mxu1 %v7533_v62  ;;  %v7617_v61 = vld [vmem:[#allocation10 + $0xa04] ss:$16 sps:$4 sm:$0xff]   ;;  %v7612_v62 = vld [vmem:[#allocation10 + $0x800] ss:$16 sps:$4 sm:$0xff]  }
  0xf2   :  { %3631 = vmatprep.subr.bf16.mxu0 %v7538_v63  ;;  %3672 = vmatprep.subr.bf16.mxu1 %v7541_v1  ;;  %v7615_v63 = vld [vmem:[#allocation10 + $0xa00] ss:$16 sps:$4 sm:$0xff]   ;;  %v7620_v1 = vld [vmem:[#allocation10 + $0x9e4] ss:$16 sps:$4 sm:$0xff]  }
  0xf5   :  { %3632 = vmatpush2.bf16.msra.mxu0 %v7536_v2  ;;  %3673 = vmatpush2.bf16.msra.mxu1 %v7539_v3  ;;  %v7623_v2 = vld [vmem:[#allocation10 + $0xbe4] ss:$16 sps:$4 sm:$0xff]   ;;  %v7618_v3 = vld [vmem:[#allocation10 + $0x9e0] ss:$16 sps:$4 sm:$0xff]  }
  0xf6   :  { %3633 = vmatprep.subr.bf16.mxu0 %v7544_v4  ;;  %3674 = vmatprep.subr.bf16.mxu1 %v7547_v5  ;;  %v7621_v4 = vld [vmem:[#allocation10 + $0xbe0] ss:$16 sps:$4 sm:$0xff]   ;;  %v7626_v5 = vld [vmem:[#allocation10 + $0x9c4] ss:$16 sps:$4 sm:$0xff]  }
  0xf9   :  { %3634 = vmatpush2.bf16.msra.mxu0 %v7542_v6  ;;  %3675 = vmatpush2.bf16.msra.mxu1 %v7545_v7  ;;  %v7629_v6 = vld [vmem:[#allocation10 + $0xbc4] ss:$16 sps:$4 sm:$0xff]   ;;  %v7624_v7 = vld [vmem:[#allocation10 + $0x9c0] ss:$16 sps:$4 sm:$0xff]  }
  0xfa   :  { %3635 = vmatprep.subr.bf16.mxu0 %v7550_v8  ;;  %3676 = vmatprep.subr.bf16.mxu1 %v7553_v9  ;;  %v7627_v8 = vld [vmem:[#allocation10 + $0xbc0] ss:$16 sps:$4 sm:$0xff]   ;;  %v7632_v9 = vld [vmem:[#allocation10 + $0x9a4] ss:$16 sps:$4 sm:$0xff]  }
  0xfd   :  { %3636 = vmatpush2.bf16.msra.mxu0 %v7548_v10  ;;  %3677 = vmatpush2.bf16.msra.mxu1 %v7551_v11  ;;  %v7635_v10 = vld [vmem:[#allocation10 + $0xba4] ss:$16 sps:$4 sm:$0xff]   ;;  %v7630_v11 = vld [vmem:[#allocation10 + $0x9a0] ss:$16 sps:$4 sm:$0xff]  }
  0xfe   :  { %3637 = vmatprep.subr.bf16.mxu0 %v7556_v12  ;;  %3678 = vmatprep.subr.bf16.mxu1 %v7559_v15  ;;  %v7633_v12 = vld [vmem:[#allocation10 + $0xba0] ss:$16 sps:$4 sm:$0xff]   ;;  %v7638_v15 = vld [vmem:[#allocation10 + $0x984] ss:$16 sps:$4 sm:$0xff]  }
 0x101   :  { %3638 = vmatpush2.bf16.msra.mxu0 %v7554_v16  ;;  %3679 = vmatpush2.bf16.msra.mxu1 %v7557_v17  ;;  %v7641_v16 = vld [vmem:[#allocation10 + $0xb84] ss:$16 sps:$4 sm:$0xff]   ;;  %v7636_v17 = vld [vmem:[#allocation10 + $0x980] ss:$16 sps:$4 sm:$0xff]  }
 0x102   :  { %3639 = vmatprep.subr.bf16.mxu0 %v7562_v18  ;;  %3680 = vmatprep.subr.bf16.mxu1 %v7565_v19  ;;  %v7639_v18 = vld [vmem:[#allocation10 + $0xb80] ss:$16 sps:$4 sm:$0xff]   ;;  %v7644_v19 = vld [vmem:[#allocation10 + $0x964] ss:$16 sps:$4 sm:$0xff]  }
 0x105   :  { %3640 = vmatpush2.bf16.msra.mxu0 %v7560_v20  ;;  %3681 = vmatpush2.bf16.msra.mxu1 %v7563_v21  ;;  %v7647_v20 = vld [vmem:[#allocation10 + $0xb64] ss:$16 sps:$4 sm:$0xff]   ;;  %v7642_v21 = vld [vmem:[#allocation10 + $0x960] ss:$16 sps:$4 sm:$0xff]  }
 0x106   :  { %3691 = vmatprep.subr.bf16.mxu0 %v7572_v22  ;;  %3732 = vmatprep.subr.bf16.mxu1 %v7575_v23  ;;  %v7645_v22 = vld [vmem:[#allocation10 + $0xb60] ss:$16 sps:$4 sm:$0xff]   ;;  %v7650_v23 = vld [vmem:[#allocation10 + $0x944] ss:$16 sps:$4 sm:$0xff]  }
 0x108   :  { %3642 = vmatmul.mubr.bf16.vlgmr.msra.gmra.mxu0 %v8967_v24  ;;  %3683 = vmatmul.mubr.bf16.vlgmr.msra.gmra.mxu1 %v8971_v25 }
 0x109   :  { %3692 = vmatpush1.bf16.msra.mxu0 %v7570_v26  ;;  %3733 = vmatpush1.bf16.msra.mxu1 %v7573_v29  ;;  %v7653_v26 = vld [vmem:[#allocation10 + $0xb44] ss:$16 sps:$4 sm:$0xff]   ;;  %v7648_v29 = vld [vmem:[#allocation10 + $0x940] ss:$16 sps:$4 sm:$0xff]  }
 0x10a   :  { %3693 = vmatprep.subr.bf16.mxu0 %v7578_v30  ;;  %3734 = vmatprep.subr.bf16.mxu1 %v7581_v31  ;;  %v7651_v30 = vld [vmem:[#allocation10 + $0xb40] ss:$16 sps:$4 sm:$0xff]   ;;  %v7656_v31 = vld [vmem:[#allocation10 + $0x924] ss:$16 sps:$4 sm:$0xff]  }
 0x10b   :  { %3723 = vmatprep.mubr.bf16.mxu0 %v8979_v32  ;;  %3764 = vmatprep.mubr.bf16.mxu1 %v8983_v33 }
 0x10d   :  { %3694 = vmatpush1.bf16.msra.mxu0 %v7576_v34  ;;  %3735 = vmatpush1.bf16.msra.mxu1 %v7579_v35  ;;  %v7659_v34 = vld [vmem:[#allocation10 + $0xb24] ss:$16 sps:$4 sm:$0xff]   ;;  %v186_v35 = vlaneseq }
 0x10e   :  { %3695 = vmatprep.subr.bf16.mxu0 %v7584_v36  ;;  %3736 = vmatprep.subr.bf16.mxu1 %v7587_v37  ;;  %v7654_v36 = vld [vmem:[#allocation10 + $0x920] ss:$16 sps:$4 sm:$0xff]  }
 0x10f   :  { %v7657_v37 = vld [vmem:[#allocation10 + $0xb20] ss:$16 sps:$4 sm:$0xff]  }
 0x111   :  { %3696 = vmatpush1.bf16.msra.mxu0 %v7582_v38  ;;  %3737 = vmatpush1.bf16.msra.mxu1 %v7585_v39  ;;  %v7662_v38 = vld [vmem:[#allocation10 + $0x904] ss:$16 sps:$4 sm:$0xff]  }
 0x112   :  { %3697 = vmatprep.subr.bf16.mxu0 %v7590_v40  ;;  %3738 = vmatprep.subr.bf16.mxu1 %v7593_v43  ;;  %v7665_v39 = vld [vmem:[#allocation10 + $0xb04] ss:$16 sps:$4 sm:$0xff]   ;;  %v8989_v40 = vshrl.u32 %v186_v35, 7  ;;  %v7660_v43 = vld [vmem:[#allocation10 + $0x900] ss:$16 sps:$4 sm:$0xff]  }
 0x113   :  { %v7712_v35 = vld [vmem:[#allocation10 + $0xc00] ss:$16 sps:$4 sm:$0xff]  }
 0x115   :  { %3698 = vmatpush1.bf16.msra.mxu0 %v7588_v44  ;;  %3739 = vmatpush1.bf16.msra.mxu1 %v7591_v45  ;;  %v7663_v44 = vld [vmem:[#allocation10 + $0xb00] ss:$16 sps:$4 sm:$0xff]   ;;  %v7672_v45 = vld [vmem:[#allocation10 + $0xce4] ss:$16 sps:$4 sm:$0xff]  }
 0x116   :  { %3699 = vmatprep.subr.bf16.mxu0 %v7596_v46  ;;  %3740 = vmatprep.subr.bf16.mxu1 %v7599_v47  ;;  %v8992_v46 = vsub.s32 2, %v8989_v40  ;;  %v184_v47 = vld [vmem:[#allocation8] sm:$0xf] }
 0x119   :  { %3700 = vmatpush1.bf16.msra.mxu0 %v7594_v48  ;;  %3741 = vmatpush1.bf16.msra.mxu1 %v7597_v49  ;;  %v7675_v48 = vld [vmem:[#allocation10 + $0xee4] ss:$16 sps:$4 sm:$0xff]   ;;  %v7670_v49 = vld [vmem:[#allocation10 + $0xce0] ss:$16 sps:$4 sm:$0xff]  }
 0x11a   :  { %3701 = vmatprep.subr.bf16.mxu0 %v7602_v50  ;;  %3742 = vmatprep.subr.bf16.mxu1 %v7605_v51  ;;  %v7673_v50 = vld [vmem:[#allocation10 + $0xee0] ss:$16 sps:$4 sm:$0xff]   ;;  %v8995_v51 = vsub.s32 3, %v8989_v40 }
 0x11d   :  { %3702 = vmatpush1.bf16.msra.mxu0 %v7600_v52  ;;  %3743 = vmatpush1.bf16.msra.mxu1 %v7603_v54  ;;  %v8999_v52 = vcombine.low %v8973_v27, %v8973_v27  ;;  %v9003_v54 = vcombine.low %v8975_v28, %v8975_v28 }
 0x11e   :  { %3703 = vmatprep.subr.bf16.mxu0 %v7608_v56  ;;  %3744 = vmatprep.subr.bf16.mxu1 %v7611_v57  ;;  %v9005_v56 = vld [vmem:[#allocation2 + $0x30] sm:$0xff]  ;;  %v9007_v57 = vld [vmem:[#allocation2 + $0x38] sm:$0xff] }
 0x11f   :  { %v9013_v27 = vcombine.high %v9005_v56, %v9005_v56  ;;  %v9017_v28 = vcombine.high %v9007_v57, %v9007_v57 }
 0x121   :  { %3704 = vmatpush1.bf16.msra.mxu0 %v7606_v58  ;;  %3745 = vmatpush1.bf16.msra.mxu1 %v7609_v59  ;;  %v197_v58 = vrot.slane %v184_v47, %v8992_v46  ;;  %v7678_v59 = vld [vmem:[#allocation10 + $0xcc4] ss:$16 sps:$4 sm:$0xff]  }
 0x122   :  { %3705 = vmatprep.subr.bf16.mxu0 %v7614_v60  ;;  %3746 = vmatprep.subr.bf16.mxu1 %v7617_v61  ;;  %v7681_v60 = vld [vmem:[#allocation10 + $0xec4] ss:$16 sps:$4 sm:$0xff]   ;;  %v201_v61 = vrot.slane %v184_v47, %v8995_v51  ;;  %v7724_v47 = vld [vmem:[#allocation10 + $0xdc0] ss:$16 sps:$4 sm:$0xff]  }
 0x125   :  { %3706 = vmatpush1.bf16.msra.mxu0 %v7612_v62  ;;  %3747 = vmatpush1.bf16.msra.mxu1 %v7615_v63  ;;  %v7676_v63 = vld [vmem:[#allocation10 + $0xcc0] ss:$16 sps:$4 sm:$0xff]  }
 0x126   :  { %3707 = vmatprep.subr.bf16.mxu0 %v7620_v1  ;;  %3748 = vmatprep.subr.bf16.mxu1 %v7623_v2  ;;  %v7679_v1 = vld [vmem:[#allocation10 + $0xec0] ss:$16 sps:$4 sm:$0xff]  }
 0x129   :  { %3708 = vmatpush2.bf16.msra.mxu0 %v7618_v3  ;;  %3749 = vmatpush2.bf16.msra.mxu1 %v7621_v4  ;;  %v7684_v3 = vld [vmem:[#allocation10 + $0xca4] ss:$16 sps:$4 sm:$0xff]  }
 0x12a   :  { %3709 = vmatprep.subr.bf16.mxu0 %v7626_v5  ;;  %3750 = vmatprep.subr.bf16.mxu1 %v7629_v6  ;;  %v7687_v5 = vld [vmem:[#allocation10 + $0xea4] ss:$16 sps:$4 sm:$0xff]  }
 0x12d   :  { %3710 = vmatpush2.bf16.msra.mxu0 %v7624_v7  ;;  %3751 = vmatpush2.bf16.msra.mxu1 %v7627_v8  ;;  %v7682_v7 = vld [vmem:[#allocation10 + $0xca0] ss:$16 sps:$4 sm:$0xff]  }
 0x12e   :  { %3711 = vmatprep.subr.bf16.mxu0 %v7632_v9  ;;  %3752 = vmatprep.subr.bf16.mxu1 %v7635_v10  ;;  %v7685_v8 = vld [vmem:[#allocation10 + $0xea0] ss:$16 sps:$4 sm:$0xff]   ;;  %v7690_v9 = vld [vmem:[#allocation10 + $0xc84] ss:$16 sps:$4 sm:$0xff]  }
 0x12f   :  { %v7693_v10 = vld [vmem:[#allocation10 + $0xe84] ss:$16 sps:$4 sm:$0xff]  }
 0x131   :  { %3712 = vmatpush2.bf16.msra.mxu0 %v7630_v11  ;;  %3753 = vmatpush2.bf16.msra.mxu1 %v7633_v12  ;;  %v7688_v11 = vld [vmem:[#allocation10 + $0xc80] ss:$16 sps:$4 sm:$0xff]  }
 0x132   :  { %3713 = vmatprep.subr.bf16.mxu0 %v7638_v15  ;;  %3754 = vmatprep.subr.bf16.mxu1 %v7641_v16  ;;  %v7691_v12 = vld [vmem:[#allocation10 + $0xe80] ss:$16 sps:$4 sm:$0xff]   ;;  %v7696_v15 = vld [vmem:[#allocation10 + $0xc64] ss:$16 sps:$4 sm:$0xff]  }
 0x133   :  { %v7699_v16 = vld [vmem:[#allocation10 + $0xe64] ss:$16 sps:$4 sm:$0xff]  }
 0x135   :  { %3714 = vmatpush2.bf16.msra.mxu0 %v7636_v17  ;;  %3755 = vmatpush2.bf16.msra.mxu1 %v7639_v18  ;;  %v7694_v17 = vld [vmem:[#allocation10 + $0xc60] ss:$16 sps:$4 sm:$0xff]  }
 0x136   :  { %3715 = vmatprep.subr.bf16.mxu0 %v7644_v19  ;;  %3756 = vmatprep.subr.bf16.mxu1 %v7647_v20  ;;  %v7697_v18 = vld [vmem:[#allocation10 + $0xe60] ss:$16 sps:$4 sm:$0xff]   ;;  %v7702_v19 = vld [vmem:[#allocation10 + $0xc44] ss:$16 sps:$4 sm:$0xff]  }
 0x137   :  { %v7705_v20 = vld [vmem:[#allocation10 + $0xe44] ss:$16 sps:$4 sm:$0xff]  }
 0x139   :  { %3716 = vmatpush2.bf16.msra.mxu0 %v7642_v21  ;;  %3757 = vmatpush2.bf16.msra.mxu1 %v7645_v22  ;;  %v7700_v21 = vld [vmem:[#allocation10 + $0xc40] ss:$16 sps:$4 sm:$0xff]  }
 0x13a   :  { %3717 = vmatprep.subr.bf16.mxu0 %v7650_v23  ;;  %3758 = vmatprep.subr.bf16.mxu1 %v7653_v26  ;;  %v7703_v22 = vld [vmem:[#allocation10 + $0xe40] ss:$16 sps:$4 sm:$0xff]   ;;  %v7708_v23 = vld [vmem:[#allocation10 + $0xc24] ss:$16 sps:$4 sm:$0xff]  }
 0x13b   :  { %v7711_v26 = vld [vmem:[#allocation10 + $0xe24] ss:$16 sps:$4 sm:$0xff]  }
 0x13d   :  { %3718 = vmatpush2.bf16.msra.mxu0 %v7648_v29  ;;  %3759 = vmatpush2.bf16.msra.mxu1 %v7651_v30  ;;  %v7706_v29 = vld [vmem:[#allocation10 + $0xc20] ss:$16 sps:$4 sm:$0xff]  }
 0x13e   :  { %3719 = vmatprep.subr.bf16.mxu0 %v7656_v31  ;;  %3760 = vmatprep.subr.bf16.mxu1 %v7659_v34  ;;  %v7709_v30 = vld [vmem:[#allocation10 + $0xe20] ss:$16 sps:$4 sm:$0xff]   ;;  %v7714_v31 = vld [vmem:[#allocation10 + $0xc04] ss:$16 sps:$4 sm:$0xff]  }
 0x13f   :  { %v7717_v34 = vld [vmem:[#allocation10 + $0xe04] ss:$16 sps:$4 sm:$0xff]  }
 0x141   :  { %3720 = vmatpush2.bf16.msra.mxu0 %v7654_v36  ;;  %3761 = vmatpush2.bf16.msra.mxu1 %v7657_v37  ;;  %v7715_v36 = vld [vmem:[#allocation10 + $0xe00] ss:$16 sps:$4 sm:$0xff]   ;;  %v7720_v37 = vld [vmem:[#allocation10 + $0xde4] ss:$16 sps:$4 sm:$0xff]  }
 0x142   :  { %3721 = vmatprep.subr.bf16.mxu0 %v7662_v38  ;;  %3762 = vmatprep.subr.bf16.mxu1 %v7665_v39  ;;  %v7723_v38 = vld [vmem:[#allocation10 + $0xfe4] ss:$16 sps:$4 sm:$0xff]   ;;  %v7718_v39 = vld [vmem:[#allocation10 + $0xde0] ss:$16 sps:$4 sm:$0xff]  }
 0x145   :  { %3722 = vmatpush2.bf16.msra.mxu0 %v7660_v43  ;;  %3763 = vmatpush2.bf16.msra.mxu1 %v7663_v44  ;;  %v7721_v43 = vld [vmem:[#allocation10 + $0xfe0] ss:$16 sps:$4 sm:$0xff]   ;;  %v7726_v44 = vld [vmem:[#allocation10 + $0xdc4] ss:$16 sps:$4 sm:$0xff]  }
 0x146   :  { %3773 = vmatprep.subr.bf16.mxu0 %v7672_v45  ;;  %3814 = vmatprep.subr.bf16.mxu1 %v7675_v48  ;;  %v7729_v45 = vld [vmem:[#allocation10 + $0xfc4] ss:$16 sps:$4 sm:$0xff]   ;;  %v7727_v48 = vld [vmem:[#allocation10 + $0xfc0] ss:$16 sps:$4 sm:$0xff]  }
 0x148   :  { %3724 = vmatmul.mubr.bf16.vlgmr.msra.gmra.mxu0 %v8999_v52  ;;  %3765 = vmatmul.mubr.bf16.vlgmr.msra.gmra.mxu1 %v9003_v54  ;;  %v360_v62 = vpop.f32.mrf.mxu1 }
 0x149   :  { %v9021_v2 = vadd.f32 %v360_v62, %v197_v58  ;;  %3774 = vmatpush1.bf16.msra.mxu0 %v7670_v49  ;;  %3815 = vmatpush1.bf16.msra.mxu1 %v7673_v50  ;;  %v7732_v49 = vld [vmem:[#allocation10 + $0xda4] ss:$16 sps:$4 sm:$0xff]   ;;  %v7730_v58 = vld [vmem:[#allocation10 + $0xda0] ss:$16 sps:$4 sm:$0xff]  }
 0x14a   :  { %v362_v4 = vpop.f32.mrf.mxu1  ;;  %3775 = vmatprep.subr.bf16.mxu0 %v7678_v59  ;;  %3816 = vmatprep.subr.bf16.mxu1 %v7681_v60  ;;  %v7735_v50 = vld [vmem:[#allocation10 + $0xfa4] ss:$16 sps:$4 sm:$0xff]   ;;  %v7733_v59 = vld [vmem:[#allocation10 + $0xfa0] ss:$16 sps:$4 sm:$0xff]  }
 0x14b   :  { %v9023_v6 = vadd.f32 %v362_v4, %v201_v61  ;;  %3805 = vmatprep.mubr.bf16.mxu0 %v9013_v27  ;;  %3846 = vmatprep.mubr.bf16.mxu1 %v9017_v28  ;;  %v7738_v60 = vld [vmem:[#allocation10 + $0xd84] ss:$16 sps:$4 sm:$0xff]   ;;  %v7736_v62 = vld [vmem:[#allocation10 + $0xd80] ss:$16 sps:$4 sm:$0xff]  }
 0x14c   :  { %v7741_v61 = vld [vmem:[#allocation10 + $0xf84] ss:$16 sps:$4 sm:$0xff]   ;;  %v7742_v4 = vld [vmem:[#allocation10 + $0xd60] ss:$16 sps:$4 sm:$0xff]  }
 0x14d   :  { %3776 = vmatpush1.bf16.msra.mxu0 %v7676_v63  ;;  %3817 = vmatpush1.bf16.msra.mxu1 %v7679_v1  ;;  %v7739_v63 = vld [vmem:[#allocation10 + $0xf80] ss:$16 sps:$4 sm:$0xff]   ;;  %v7744_v1 = vld [vmem:[#allocation10 + $0xd64] ss:$16 sps:$4 sm:$0xff]  }
 0x14e   :  { %3777 = vmatprep.subr.bf16.mxu0 %v7684_v3  ;;  %3818 = vmatprep.subr.bf16.mxu1 %v7687_v5  ;;  %v7747_v3 = vld [vmem:[#allocation10 + $0xf64] ss:$16 sps:$4 sm:$0xff]   ;;  %v7745_v5 = vld [vmem:[#allocation10 + $0xf60] ss:$16 sps:$4 sm:$0xff]  }
 0x151   :  { %3778 = vmatpush1.bf16.msra.mxu0 %v7682_v7  ;;  %3819 = vmatpush1.bf16.msra.mxu1 %v7685_v8  ;;  %v7750_v7 = vld [vmem:[#allocation10 + $0xd44] ss:$16 sps:$4 sm:$0xff]  }
 0x152   :  { %3779 = vmatprep.subr.bf16.mxu0 %v7690_v9  ;;  %3820 = vmatprep.subr.bf16.mxu1 %v7693_v10  ;;  %v7753_v8 = vld [vmem:[#allocation10 + $0xf44] ss:$16 sps:$4 sm:$0xff]   ;;  %v7748_v9 = vld [vmem:[#allocation10 + $0xd40] ss:$16 sps:$4 sm:$0xff]  }
 0x153   :  { %v7751_v10 = vld [vmem:[#allocation10 + $0xf40] ss:$16 sps:$4 sm:$0xff]  }
 0x155   :  { %3780 = vmatpush1.bf16.msra.mxu0 %v7688_v11  ;;  %3821 = vmatpush1.bf16.msra.mxu1 %v7691_v12  ;;  %v7756_v11 = vld [vmem:[#allocation10 + $0xd24] ss:$16 sps:$4 sm:$0xff]  }
 0x156   :  { %3781 = vmatprep.subr.bf16.mxu0 %v7696_v15  ;;  %3822 = vmatprep.subr.bf16.mxu1 %v7699_v16  ;;  %v7759_v12 = vld [vmem:[#allocation10 + $0xf24] ss:$16 sps:$4 sm:$0xff]   ;;  %v7754_v15 = vld [vmem:[#allocation10 + $0xd20] ss:$16 sps:$4 sm:$0xff]  }
 0x157   :  { %v7757_v16 = vld [vmem:[#allocation10 + $0xf20] ss:$16 sps:$4 sm:$0xff]  }
 0x159   :  { %3782 = vmatpush1.bf16.msra.mxu0 %v7694_v17  ;;  %3823 = vmatpush1.bf16.msra.mxu1 %v7697_v18  ;;  %v7762_v17 = vld [vmem:[#allocation10 + $0xd04] ss:$16 sps:$4 sm:$0xff]  }
 0x15a   :  { %3783 = vmatprep.subr.bf16.mxu0 %v7702_v19  ;;  %3824 = vmatprep.subr.bf16.mxu1 %v7705_v20  ;;  %v7765_v18 = vld [vmem:[#allocation10 + $0xf04] ss:$16 sps:$4 sm:$0xff]   ;;  %v7760_v19 = vld [vmem:[#allocation10 + $0xd00] ss:$16 sps:$4 sm:$0xff]  }
 0x15b   :  { %v7763_v20 = vld [vmem:[#allocation10 + $0xf00] ss:$16 sps:$4 sm:$0xff]  }
 0x15d   :  { %3784 = vmatpush1.bf16.msra.mxu0 %v7700_v21  ;;  %3825 = vmatpush1.bf16.msra.mxu1 %v7703_v22  ;;  %v889_v21 = vld [vmem:[#allocation11] sm:$0xf]  ;;  %v7772_v22 = vld [vmem:[#allocation10 + $0xec] ss:$16 sps:$4 sm:$0xff]  }
 0x15e   :  { %3785 = vmatprep.subr.bf16.mxu0 %v7708_v23  ;;  %3826 = vmatprep.subr.bf16.mxu1 %v7711_v26  ;;  %v9027_v23 = vpop.f32.mrf.mxu0  ;;  %v7775_v26 = vld [vmem:[#allocation10 + $0x2ec] ss:$16 sps:$4 sm:$0xff]  }
 0x161   :  { %3786 = vmatpush1.bf16.msra.mxu0 %v7706_v29  ;;  %3827 = vmatpush1.bf16.msra.mxu1 %v7709_v30  ;;  %v9030_v29 = vsub.s32 0, %v8989_v40  ;;  %v9034_v30 = vcombine.low %v9005_v56, %v9005_v56  ;;  %v7781_v56 = vld [vmem:[#allocation10 + $0x2cc] ss:$16 sps:$4 sm:$0xff]  }
 0x162   :  { %3787 = vmatprep.subr.bf16.mxu0 %v7714_v31  ;;  %3828 = vmatprep.subr.bf16.mxu1 %v7717_v34  ;;  %v9038_v31 = vcombine.low %v9007_v57, %v9007_v57  ;;  %v7770_v34 = vld [vmem:[#allocation10 + $0xe8] ss:$16 sps:$4 sm:$0xff]  }
 0x165   :  { %3788 = vmatpush1.bf16.msra.mxu0 %v7712_v35  ;;  %3829 = vmatpush1.bf16.msra.mxu1 %v7715_v36  ;;  %v7773_v35 = vld [vmem:[#allocation10 + $0x2e8] ss:$16 sps:$4 sm:$0xff]   ;;  %v9041_v36 = vsub.s32 1, %v8989_v40 }
 0x166   :  { %3789 = vmatprep.subr.bf16.mxu0 %v7720_v37  ;;  %3830 = vmatprep.subr.bf16.mxu1 %v7723_v38  ;;  %v894_v37 = vrot.slane %v889_v21, %v9030_v29  ;;  %v7778_v38 = vld [vmem:[#allocation10 + $0xcc] ss:$16 sps:$4 sm:$0xff]   ;;  %v7776_v40 = vld [vmem:[#allocation10 + $0xc8] ss:$16 sps:$4 sm:$0xff]  }
 0x169   :  { %3790 = vmatpush2.bf16.msra.mxu0 %v7718_v39  ;;  %3831 = vmatpush2.bf16.msra.mxu1 %v7721_v43  ;;  %v9044_v39 = vpop.f32.mrf.mxu0  ;;  %v898_v43 = vrot.slane %v889_v21, %v9041_v36  ;;  %v7806_v21 = vld [vmem:[#allocation10 + $0x28] ss:$16 sps:$4 sm:$0xff]  }
 0x16a   :  { %3791 = vmatprep.subr.bf16.mxu0 %v7726_v44  ;;  %3832 = vmatprep.subr.bf16.mxu1 %v7729_v45  ;;  %v7779_v45 = vld [vmem:[#allocation10 + $0x2c8] ss:$16 sps:$4 sm:$0xff]  }
 0x16d   :  { %3792 = vmatpush2.bf16.msra.mxu0 %v7724_v47  ;;  %3833 = vmatpush2.bf16.msra.mxu1 %v7727_v48 }
 0x16e   :  { %3793 = vmatprep.subr.bf16.mxu0 %v7732_v49  ;;  %3834 = vmatprep.subr.bf16.mxu1 %v7735_v50  ;;  %v7784_v50 = vld [vmem:[#allocation10 + $0xac] ss:$16 sps:$4 sm:$0xff]  }
 0x171   :  { %3794 = vmatpush2.bf16.msra.mxu0 %v7730_v58  ;;  %3835 = vmatpush2.bf16.msra.mxu1 %v7733_v59  ;;  %v7787_v58 = vld [vmem:[#allocation10 + $0x2ac] ss:$16 sps:$4 sm:$0xff]  }
 0x172   :  { %3795 = vmatprep.subr.bf16.mxu0 %v7738_v60  ;;  %3836 = vmatprep.subr.bf16.mxu1 %v7741_v61  ;;  %v7782_v61 = vld [vmem:[#allocation10 + $0xa8] ss:$16 sps:$4 sm:$0xff]  }
 0x175   :  { %3796 = vmatpush2.bf16.msra.mxu0 %v7736_v62  ;;  %3837 = vmatpush2.bf16.msra.mxu1 %v7739_v63  ;;  %v7785_v62 = vld [vmem:[#allocation10 + $0x2a8] ss:$16 sps:$4 sm:$0xff]  }
 0x176   :  { %3797 = vmatprep.subr.bf16.mxu0 %v7744_v1  ;;  %3838 = vmatprep.subr.bf16.mxu1 %v7747_v3 }
 0x179   :  { %3798 = vmatpush2.bf16.msra.mxu0 %v7742_v4  ;;  %3839 = vmatpush2.bf16.msra.mxu1 %v7745_v5 }
 0x17a   :  { %3799 = vmatprep.subr.bf16.mxu0 %v7750_v7  ;;  %3840 = vmatprep.subr.bf16.mxu1 %v7753_v8  ;;  %v7790_v7 = vld [vmem:[#allocation10 + $0x8c] ss:$16 sps:$4 sm:$0xff]  }
 0x17b   :  { %v7793_v8 = vld [vmem:[#allocation10 + $0x28c] ss:$16 sps:$4 sm:$0xff]  }
 0x17d   :  { %3800 = vmatpush2.bf16.msra.mxu0 %v7748_v9  ;;  %3841 = vmatpush2.bf16.msra.mxu1 %v7751_v10  ;;  %v7788_v9 = vld [vmem:[#allocation10 + $0x88] ss:$16 sps:$4 sm:$0xff]  }
 0x17e   :  { %3801 = vmatprep.subr.bf16.mxu0 %v7756_v11  ;;  %3842 = vmatprep.subr.bf16.mxu1 %v7759_v12  ;;  %v7791_v10 = vld [vmem:[#allocation10 + $0x288] ss:$16 sps:$4 sm:$0xff]  }
 0x17f   :  { %v7794_v11 = vld [vmem:[#allocation10 + $0x68] ss:$16 sps:$4 sm:$0xff]  }
 0x180   :  { %v7797_v12 = vld [vmem:[#allocation10 + $0x268] ss:$16 sps:$4 sm:$0xff]  }
 0x181   :  { %3802 = vmatpush2.bf16.msra.mxu0 %v7754_v15  ;;  %3843 = vmatpush2.bf16.msra.mxu1 %v7757_v16  ;;  %v7802_v15 = vld [vmem:[#allocation10 + $0x4c] ss:$16 sps:$4 sm:$0xff]  }
 0x182   :  { %3803 = vmatprep.subr.bf16.mxu0 %v7762_v17  ;;  %3844 = vmatprep.subr.bf16.mxu1 %v7765_v18  ;;  %v7805_v16 = vld [vmem:[#allocation10 + $0x24c] ss:$16 sps:$4 sm:$0xff]   ;;  %v7800_v17 = vld [vmem:[#allocation10 + $0x48] ss:$16 sps:$4 sm:$0xff]  }
 0x183   :  { %v7803_v18 = vld [vmem:[#allocation10 + $0x248] ss:$16 sps:$4 sm:$0xff]  }
 0x185   :  { %3804 = vmatpush2.bf16.msra.mxu0 %v7760_v19  ;;  %3845 = vmatpush2.bf16.msra.mxu1 %v7763_v20  ;;  %v7808_v19 = vld [vmem:[#allocation10 + $0x2c] ss:$16 sps:$4 sm:$0xff]  }
 0x186   :  { %3855 = vmatprep.subr.bf16.mxu0 %v7772_v22  ;;  %3896 = vmatprep.subr.bf16.mxu1 %v7775_v26  ;;  %v7811_v20 = vld [vmem:[#allocation10 + $0x22c] ss:$16 sps:$4 sm:$0xff]   ;;  %v7809_v22 = vld [vmem:[#allocation10 + $0x228] ss:$16 sps:$4 sm:$0xff]  }
 0x187   :  { %v7814_v26 = vld [vmem:[#allocation10 + $0xc] ss:$16 sps:$4 sm:$0xff]  }
 0x188   :  { %v3561_v44 = vpop.f32.mrf.mxu0  ;;  %v3602_v57 = vpop.f32.mrf.mxu1  ;;  %3806 = vmatmul.mubr.bf16.vlgmr.msra.gmra.mxu0 %v9034_v30  ;;  %3847 = vmatmul.mubr.bf16.vlgmr.msra.gmra.mxu1 %v9038_v31 }
 0x189   :  { %v3562_v47 = vadd.f32 %v3561_v44, %v894_v37  ;;  %3856 = vmatpush1.bf16.msra.mxu0 %v7770_v34  ;;  %3897 = vmatpush1.bf16.msra.mxu1 %v7773_v35  ;;  %v7817_v34 = vld [vmem:[#allocation10 + $0x20c] ss:$16 sps:$4 sm:$0xff]   ;;  %v7812_v35 = vld [vmem:[#allocation10 + $0x8] ss:$16 sps:$4 sm:$0xff]  }
 0x18a   :  { %v3563_v48 = vpop.f32.mrf.mxu0  ;;  %v3604_v49 = vpop.f32.mrf.mxu1  ;;  %3857 = vmatprep.subr.bf16.mxu0 %v7778_v38  ;;  %3898 = vmatprep.subr.bf16.mxu1 %v7781_v56  ;;  %v7815_v37 = vld [vmem:[#allocation10 + $0x208] ss:$16 sps:$4 sm:$0xff]   ;;  %v7820_v38 = vld [vmem:[#allocation10 + $0x1ec] ss:$16 sps:$4 sm:$0xff]  }
 0x18b   :  { %v9049_v59 = vadd.f32 %v3602_v57, %v3562_v47  ;;  %v3564_v60 = vadd.f32 %v3563_v48, %v898_v43  ;;  %3887 = vmatprep.mubr.bf16.mxu0 %v8939_v53  ;;  %3928 = vmatprep.mubr.bf16.mxu1 %v8941_v55  ;;  %v7796_v53 = vld [vmem:[#allocation10 + $0x6c] ss:$16 sps:$4 sm:$0xff]   ;;  %v7818_v43 = vld [vmem:[#allocation10 + $0x1e8] ss:$16 sps:$4 sm:$0xff]  }
 0x18c   :  { %v3565_v63 = vpop.f32.mrf.mxu0  ;;  %v3606_v1 = vpop.f32.mrf.mxu1  ;;  %v7799_v55 = vld [vmem:[#allocation10 + $0x26c] ss:$16 sps:$4 sm:$0xff]   ;;  %v7821_v44 = vld [vmem:[#allocation10 + $0x3e8] ss:$16 sps:$4 sm:$0xff]  }
 0x18d   :  { %v9053_v3 = vadd.f32 %v3604_v49, %v3564_v60  ;;  %3858 = vmatpush1.bf16.msra.mxu0 %v7776_v40  ;;  %3899 = vmatpush1.bf16.msra.mxu1 %v7779_v45  ;;  %v7823_v56 = vld [vmem:[#allocation10 + $0x3ec] ss:$16 sps:$4 sm:$0xff]   ;;  %v7824_v45 = vld [vmem:[#allocation10 + $0x1c8] ss:$16 sps:$4 sm:$0xff]  }
 0x18e   :  { %v3566_v4 = vpop.f32.mrf.mxu0  ;;  %v3607_v5 = vpop.f32.mrf.mxu1  ;;  %3859 = vmatprep.subr.bf16.mxu0 %v7784_v50  ;;  %3900 = vmatprep.subr.bf16.mxu1 %v7787_v58  ;;  %v7826_v57 = vld [vmem:[#allocation10 + $0x1cc] ss:$16 sps:$4 sm:$0xff]   ;;  %v7827_v47 = vld [vmem:[#allocation10 + $0x3c8] ss:$16 sps:$4 sm:$0xff]  }
 0x18f   :  { %v7829_v40 = vld [vmem:[#allocation10 + $0x3cc] ss:$16 sps:$4 sm:$0xff]   ;;  %v7830_v50 = vld [vmem:[#allocation10 + $0x1a8] ss:$16 sps:$4 sm:$0xff]  }
 0x190   :  { %v7832_v48 = vld [vmem:[#allocation10 + $0x1ac] ss:$16 sps:$4 sm:$0xff]   ;;  %v7833_v58 = vld [vmem:[#allocation10 + $0x3a8] ss:$16 sps:$4 sm:$0xff]  }
 0x191   :  { %3860 = vmatpush1.bf16.msra.mxu0 %v7782_v61  ;;  %3901 = vmatpush1.bf16.msra.mxu1 %v7785_v62  ;;  %v7835_v49 = vld [vmem:[#allocation10 + $0x3ac] ss:$16 sps:$4 sm:$0xff]   ;;  %v7836_v62 = vld [vmem:[#allocation10 + $0x188] ss:$16 sps:$4 sm:$0xff]  }
 0x192   :  { %3861 = vmatprep.subr.bf16.mxu0 %v7790_v7  ;;  %3902 = vmatprep.subr.bf16.mxu1 %v7793_v8  ;;  %v7838_v60 = vld [vmem:[#allocation10 + $0x18c] ss:$16 sps:$4 sm:$0xff]   ;;  %v7839_v63 = vld [vmem:[#allocation10 + $0x388] ss:$16 sps:$4 sm:$0xff]  }
 0x193   :  { %v7841_v61 = vld [vmem:[#allocation10 + $0x38c] ss:$16 sps:$4 sm:$0xff]   ;;  %v7842_v5 = vld [vmem:[#allocation10 + $0x168] ss:$16 sps:$4 sm:$0xff]  }
 0x194   :  { %v7844_v1 = vld [vmem:[#allocation10 + $0x16c] ss:$16 sps:$4 sm:$0xff]   ;;  %v7845_v7 = vld [vmem:[#allocation10 + $0x368] ss:$16 sps:$4 sm:$0xff]  }
 0x195   :  { %3862 = vmatpush1.bf16.msra.mxu0 %v7788_v9  ;;  %3903 = vmatpush1.bf16.msra.mxu1 %v7791_v10  ;;  %v7847_v4 = vld [vmem:[#allocation10 + $0x36c] ss:$16 sps:$4 sm:$0xff]   ;;  %v7848_v10 = vld [vmem:[#allocation10 + $0x148] ss:$16 sps:$4 sm:$0xff]  }
 0x196   :  { %3863 = vmatprep.subr.bf16.mxu0 %v7796_v53  ;;  %3904 = vmatprep.subr.bf16.mxu1 %v7799_v55  ;;  %v7850_v8 = vld [vmem:[#allocation10 + $0x14c] ss:$16 sps:$4 sm:$0xff]   ;;  %v7851_v53 = vld [vmem:[#allocation10 + $0x348] ss:$16 sps:$4 sm:$0xff]  }
 0x197   :  { %v7853_v9 = vld [vmem:[#allocation10 + $0x34c] ss:$16 sps:$4 sm:$0xff]  }
 0x198   :  { %v7856_v55 = vld [vmem:[#allocation10 + $0x12c] ss:$16 sps:$4 sm:$0xff]  }
 0x199   :  { %3864 = vmatpush1.bf16.msra.mxu0 %v7794_v11  ;;  %3905 = vmatpush1.bf16.msra.mxu1 %v7797_v12  ;;  %v7859_v11 = vld [vmem:[#allocation10 + $0x32c] ss:$16 sps:$4 sm:$0xff]   ;;  %v7854_v12 = vld [vmem:[#allocation10 + $0x128] ss:$16 sps:$4 sm:$0xff]  }
 0x19a   :  { %3865 = vmatprep.subr.bf16.mxu0 %v7802_v15  ;;  %3906 = vmatprep.subr.bf16.mxu1 %v7805_v16  ;;  %v7857_v15 = vld [vmem:[#allocation10 + $0x328] ss:$16 sps:$4 sm:$0xff]   ;;  %v7862_v16 = vld [vmem:[#allocation10 + $0x10c] ss:$16 sps:$4 sm:$0xff]  }
 0x19d   :  { %3866 = vmatpush1.bf16.msra.mxu0 %v7800_v17  ;;  %3907 = vmatpush1.bf16.msra.mxu1 %v7803_v18  ;;  %v7865_v17 = vld [vmem:[#allocation10 + $0x30c] ss:$16 sps:$4 sm:$0xff]   ;;  %v7860_v18 = vld [vmem:[#allocation10 + $0x108] ss:$16 sps:$4 sm:$0xff]  }
 0x19e   :  { %3867 = vmatprep.subr.bf16.mxu0 %v7808_v19  ;;  %3908 = vmatprep.subr.bf16.mxu1 %v7811_v20  ;;  %v7863_v19 = vld [vmem:[#allocation10 + $0x308] ss:$16 sps:$4 sm:$0xff]   ;;  %v7868_v20 = vld [vmem:[#allocation10 + $0x4ec] ss:$16 sps:$4 sm:$0xff]  }
 0x1a1   :  { %3868 = vmatpush1.bf16.msra.mxu0 %v7806_v21  ;;  %3909 = vmatpush1.bf16.msra.mxu1 %v7809_v22  ;;  %v7871_v21 = vld [vmem:[#allocation10 + $0x6ec] ss:$16 sps:$4 sm:$0xff]   ;;  %v7866_v22 = vld [vmem:[#allocation10 + $0x4e8] ss:$16 sps:$4 sm:$0xff]  }
 0x1a2   :  { %3869 = vmatprep.subr.bf16.mxu0 %v7814_v26  ;;  %3910 = vmatprep.subr.bf16.mxu1 %v7817_v34  ;;  %v7869_v26 = vld [vmem:[#allocation10 + $0x6e8] ss:$16 sps:$4 sm:$0xff]   ;;  %v7874_v34 = vld [vmem:[#allocation10 + $0x4cc] ss:$16 sps:$4 sm:$0xff]  }
 0x1a5   :  { %3870 = vmatpush1.bf16.msra.mxu0 %v7812_v35  ;;  %3911 = vmatpush1.bf16.msra.mxu1 %v7815_v37  ;;  %v7877_v35 = vld [vmem:[#allocation10 + $0x6cc] ss:$16 sps:$4 sm:$0xff]   ;;  %v7872_v37 = vld [vmem:[#allocation10 + $0x4c8] ss:$16 sps:$4 sm:$0xff]  }
 0x1a6   :  { %3871 = vmatprep.subr.bf16.mxu0 %v7820_v38  ;;  %3912 = vmatprep.subr.bf16.mxu1 %v7823_v56  ;;  %v7875_v38 = vld [vmem:[#allocation10 + $0x6c8] ss:$16 sps:$4 sm:$0xff]  }
 0x1a9   :  { %3872 = vmatpush2.bf16.msra.mxu0 %v7818_v43  ;;  %3913 = vmatpush2.bf16.msra.mxu1 %v7821_v44 }
 0x1aa   :  { %3873 = vmatprep.subr.bf16.mxu0 %v7826_v57  ;;  %3914 = vmatprep.subr.bf16.mxu1 %v7829_v40 }
 0x1ad   :  { %3874 = vmatpush2.bf16.msra.mxu0 %v7824_v45  ;;  %3915 = vmatpush2.bf16.msra.mxu1 %v7827_v47  ;;  %v7880_v45 = vld [vmem:[#allocation10 + $0x4ac] ss:$16 sps:$4 sm:$0xff]  }
 0x1ae   :  { %3875 = vmatprep.subr.bf16.mxu0 %v7832_v48  ;;  %3916 = vmatprep.subr.bf16.mxu1 %v7835_v49  ;;  %v7883_v47 = vld [vmem:[#allocation10 + $0x6ac] ss:$16 sps:$4 sm:$0xff]  }
 0x1b1   :  { %3876 = vmatpush2.bf16.msra.mxu0 %v7830_v50  ;;  %3917 = vmatpush2.bf16.msra.mxu1 %v7833_v58  ;;  %v7878_v50 = vld [vmem:[#allocation10 + $0x4a8] ss:$16 sps:$4 sm:$0xff]  }
 0x1b2   :  { %3877 = vmatprep.subr.bf16.mxu0 %v7838_v60  ;;  %3918 = vmatprep.subr.bf16.mxu1 %v7841_v61  ;;  %v7881_v58 = vld [vmem:[#allocation10 + $0x6a8] ss:$16 sps:$4 sm:$0xff]  }
 0x1b5   :  { %3878 = vmatpush2.bf16.msra.mxu0 %v7836_v62  ;;  %3919 = vmatpush2.bf16.msra.mxu1 %v7839_v63  ;;  %v7886_v62 = vld [vmem:[#allocation10 + $0x48c] ss:$16 sps:$4 sm:$0xff]  }
 0x1b6   :  { %3879 = vmatprep.subr.bf16.mxu0 %v7844_v1  ;;  %3920 = vmatprep.subr.bf16.mxu1 %v7847_v4  ;;  %v7889_v63 = vld [vmem:[#allocation10 + $0x68c] ss:$16 sps:$4 sm:$0xff]   ;;  %v7887_v1 = vld [vmem:[#allocation10 + $0x688] ss:$16 sps:$4 sm:$0xff]  }
 0x1b7   :  { %v7890_v4 = vld [vmem:[#allocation10 + $0x468] ss:$16 sps:$4 sm:$0xff]  }
 0x1b9   :  { %3880 = vmatpush2.bf16.msra.mxu0 %v7842_v5  ;;  %3921 = vmatpush2.bf16.msra.mxu1 %v7845_v7  ;;  %v7893_v5 = vld [vmem:[#allocation10 + $0x668] ss:$16 sps:$4 sm:$0xff]   ;;  %v7898_v7 = vld [vmem:[#allocation10 + $0x44c] ss:$16 sps:$4 sm:$0xff]  }
 0x1ba   :  { %3881 = vmatprep.subr.bf16.mxu0 %v7850_v8  ;;  %3922 = vmatprep.subr.bf16.mxu1 %v7853_v9  ;;  %v7901_v8 = vld [vmem:[#allocation10 + $0x64c] ss:$16 sps:$4 sm:$0xff]   ;;  %v7896_v9 = vld [vmem:[#allocation10 + $0x448] ss:$16 sps:$4 sm:$0xff]  }
 0x1bd   :  { %3882 = vmatpush2.bf16.msra.mxu0 %v7848_v10  ;;  %3923 = vmatpush2.bf16.msra.mxu1 %v7851_v53  ;;  %v7899_v10 = vld [vmem:[#allocation10 + $0x648] ss:$16 sps:$4 sm:$0xff]   ;;  %v7904_v53 = vld [vmem:[#allocation10 + $0x42c] ss:$16 sps:$4 sm:$0xff]  }
 0x1be   :  { %3883 = vmatprep.subr.bf16.mxu0 %v7856_v55  ;;  %3924 = vmatprep.subr.bf16.mxu1 %v7859_v11  ;;  %v7907_v55 = vld [vmem:[#allocation10 + $0x62c] ss:$16 sps:$4 sm:$0xff]   ;;  %v7902_v11 = vld [vmem:[#allocation10 + $0x428] ss:$16 sps:$4 sm:$0xff]  }
 0x1c1   :  { %3884 = vmatpush2.bf16.msra.mxu0 %v7854_v12  ;;  %3925 = vmatpush2.bf16.msra.mxu1 %v7857_v15  ;;  %v7905_v12 = vld [vmem:[#allocation10 + $0x628] ss:$16 sps:$4 sm:$0xff]   ;;  %v7910_v15 = vld [vmem:[#allocation10 + $0x40c] ss:$16 sps:$4 sm:$0xff]  }
 0x1c2   :  { %3885 = vmatprep.subr.bf16.mxu0 %v7862_v16  ;;  %3926 = vmatprep.subr.bf16.mxu1 %v7865_v17  ;;  %v7913_v16 = vld [vmem:[#allocation10 + $0x60c] ss:$16 sps:$4 sm:$0xff]   ;;  %v7908_v17 = vld [vmem:[#allocation10 + $0x408] ss:$16 sps:$4 sm:$0xff]  }
 0x1c5   :  { %3886 = vmatpush2.bf16.msra.mxu0 %v7860_v18  ;;  %3927 = vmatpush2.bf16.msra.mxu1 %v7863_v19  ;;  %v7911_v18 = vld [vmem:[#allocation10 + $0x608] ss:$16 sps:$4 sm:$0xff]   ;;  %v7916_v19 = vld [vmem:[#allocation10 + $0x5ec] ss:$16 sps:$4 sm:$0xff]  }
 0x1c6   :  { %3937 = vmatprep.subr.bf16.mxu0 %v7868_v20  ;;  %3978 = vmatprep.subr.bf16.mxu1 %v7871_v21  ;;  %v7919_v20 = vld [vmem:[#allocation10 + $0x7ec] ss:$16 sps:$4 sm:$0xff]   ;;  %v7914_v21 = vld [vmem:[#allocation10 + $0x5e8] ss:$16 sps:$4 sm:$0xff]  }
 0x1c8   :  { %v3643_v56 = vpop.f32.mrf.mxu0  ;;  %v3684_v43 = vpop.f32.mrf.mxu1  ;;  %3888 = vmatmul.mubr.bf16.vlgmr.msra.gmra.mxu0 %v8945_v13  ;;  %3929 = vmatmul.mubr.bf16.vlgmr.msra.gmra.mxu1 %v8947_v14 }
 0x1c9   :  { %v3644_v44 = vadd.f32 %v3643_v56, %v9049_v59  ;;  %3938 = vmatpush1.bf16.msra.mxu0 %v7866_v22  ;;  %3979 = vmatpush1.bf16.msra.mxu1 %v7869_v26  ;;  %v7917_v22 = vld [vmem:[#allocation10 + $0x7e8] ss:$16 sps:$4 sm:$0xff]   ;;  %v7922_v26 = vld [vmem:[#allocation10 + $0x5cc] ss:$16 sps:$4 sm:$0xff]  }
 0x1ca   :  { %v3645_v57 = vpop.f32.mrf.mxu0  ;;  %v3686_v40 = vpop.f32.mrf.mxu1  ;;  %3939 = vmatprep.subr.bf16.mxu0 %v7874_v34  ;;  %3980 = vmatprep.subr.bf16.mxu1 %v7877_v35  ;;  %v7925_v34 = vld [vmem:[#allocation10 + $0x7cc] ss:$16 sps:$4 sm:$0xff]   ;;  %v7920_v35 = vld [vmem:[#allocation10 + $0x5c8] ss:$16 sps:$4 sm:$0xff]  }
 0x1cb   :  { %v9058_v48 = vadd.f32 %v3684_v43, %v3644_v44  ;;  %v3646_v49 = vadd.f32 %v3645_v57, %v9053_v3  ;;  %3969 = vmatprep.mubr.bf16.mxu0 %v8957_v41  ;;  %4010 = vmatprep.mubr.bf16.mxu1 %v8961_v42  ;;  %v7884_v3 = vld [vmem:[#allocation10 + $0x488] ss:$16 sps:$4 sm:$0xff]   ;;  %v7892_v41 = vld [vmem:[#allocation10 + $0x46c] ss:$16 sps:$4 sm:$0xff]  }
 0x1cc   :  { %v3647_v13 = vpop.f32.mrf.mxu0  ;;  %v3688_v14 = vpop.f32.mrf.mxu1  ;;  %v7895_v42 = vld [vmem:[#allocation10 + $0x66c] ss:$16 sps:$4 sm:$0xff]   ;;  %v7926_v43 = vld [vmem:[#allocation10 + $0x5a8] ss:$16 sps:$4 sm:$0xff]  }
 0x1cd   :  { %v9063_v59 = vadd.f32 %v3686_v40, %v3646_v49  ;;  %3940 = vmatpush1.bf16.msra.mxu0 %v7872_v37  ;;  %3981 = vmatpush1.bf16.msra.mxu1 %v7875_v38  ;;  %v7923_v37 = vld [vmem:[#allocation10 + $0x7c8] ss:$16 sps:$4 sm:$0xff]   ;;  %v7928_v38 = vld [vmem:[#allocation10 + $0x5ac] ss:$16 sps:$4 sm:$0xff]  }
 0x1ce   :  { %v3648_v60 = vpop.f32.mrf.mxu0  ;;  %v3689_v61 = vpop.f32.mrf.mxu1  ;;  %3941 = vmatprep.subr.bf16.mxu0 %v7880_v45  ;;  %3982 = vmatprep.subr.bf16.mxu1 %v7883_v47  ;;  %v7931_v56 = vld [vmem:[#allocation10 + $0x7ac] ss:$16 sps:$4 sm:$0xff]   ;;  %v7929_v44 = vld [vmem:[#allocation10 + $0x7a8] ss:$16 sps:$4 sm:$0xff]  }
 0x1cf   :  { %v7934_v57 = vld [vmem:[#allocation10 + $0x58c] ss:$16 sps:$4 sm:$0xff]   ;;  %v7932_v45 = vld [vmem:[#allocation10 + $0x588] ss:$16 sps:$4 sm:$0xff]  }
 0x1d0   :  { %v7937_v40 = vld [vmem:[#allocation10 + $0x78c] ss:$16 sps:$4 sm:$0xff]   ;;  %v7935_v47 = vld [vmem:[#allocation10 + $0x788] ss:$16 sps:$4 sm:$0xff]  }
 0x1d1   :  { %3942 = vmatpush1.bf16.msra.mxu0 %v7878_v50  ;;  %3983 = vmatpush1.bf16.msra.mxu1 %v7881_v58  ;;  %v7940_v49 = vld [vmem:[#allocation10 + $0x56c] ss:$16 sps:$4 sm:$0xff]   ;;  %v7938_v58 = vld [vmem:[#allocation10 + $0x568] ss:$16 sps:$4 sm:$0xff]  }
 0x1d2   :  { %3943 = vmatprep.subr.bf16.mxu0 %v7886_v62  ;;  %3984 = vmatprep.subr.bf16.mxu1 %v7889_v63  ;;  %v7943_v50 = vld [vmem:[#allocation10 + $0x76c] ss:$16 sps:$4 sm:$0xff]   ;;  %v7941_v13 = vld [vmem:[#allocation10 + $0x768] ss:$16 sps:$4 sm:$0xff]  }
 0x1d3   :  { %v7946_v14 = vld [vmem:[#allocation10 + $0x54c] ss:$16 sps:$4 sm:$0xff]   ;;  %v7944_v61 = vld [vmem:[#allocation10 + $0x548] ss:$16 sps:$4 sm:$0xff]  }
 0x1d4   :  { %v7949_v60 = vld [vmem:[#allocation10 + $0x74c] ss:$16 sps:$4 sm:$0xff]   ;;  %v7947_v62 = vld [vmem:[#allocation10 + $0x748] ss:$16 sps:$4 sm:$0xff]  }
 0x1d5   :  { %3944 = vmatpush1.bf16.msra.mxu0 %v7884_v3  ;;  %3985 = vmatpush1.bf16.msra.mxu1 %v7887_v1  ;;  %v7952_v63 = vld [vmem:[#allocation10 + $0x52c] ss:$16 sps:$4 sm:$0xff]   ;;  %v7950_v1 = vld [vmem:[#allocation10 + $0x528] ss:$16 sps:$4 sm:$0xff]  }
 0x1d6   :  { %3945 = vmatprep.subr.bf16.mxu0 %v7892_v41  ;;  %3986 = vmatprep.subr.bf16.mxu1 %v7895_v42  ;;  %v7955_v3 = vld [vmem:[#allocation10 + $0x72c] ss:$16 sps:$4 sm:$0xff]   ;;  %v7953_v41 = vld [vmem:[#allocation10 + $0x728] ss:$16 sps:$4 sm:$0xff]  }
 0x1d7   :  { %v7958_v42 = vld [vmem:[#allocation10 + $0x50c] ss:$16 sps:$4 sm:$0xff]  }
 0x1d9   :  { %3946 = vmatpush1.bf16.msra.mxu0 %v7890_v4  ;;  %3987 = vmatpush1.bf16.msra.mxu1 %v7893_v5  ;;  %v7961_v4 = vld [vmem:[#allocation10 + $0x70c] ss:$16 sps:$4 sm:$0xff]   ;;  %v7956_v5 = vld [vmem:[#allocation10 + $0x508] ss:$16 sps:$4 sm:$0xff]  }
 0x1da   :  { %3947 = vmatprep.subr.bf16.mxu0 %v7898_v7  ;;  %3988 = vmatprep.subr.bf16.mxu1 %v7901_v8  ;;  %v7959_v7 = vld [vmem:[#allocation10 + $0x708] ss:$16 sps:$4 sm:$0xff]   ;;  %v7964_v8 = vld [vmem:[#allocation10 + $0x8ec] ss:$16 sps:$4 sm:$0xff]  }
 0x1dd   :  { %3948 = vmatpush1.bf16.msra.mxu0 %v7896_v9  ;;  %3989 = vmatpush1.bf16.msra.mxu1 %v7899_v10  ;;  %v7967_v9 = vld [vmem:[#allocation10 + $0xaec] ss:$16 sps:$4 sm:$0xff]   ;;  %v7962_v10 = vld [vmem:[#allocation10 + $0x8e8] ss:$16 sps:$4 sm:$0xff]  }
 0x1de   :  { %3949 = vmatprep.subr.bf16.mxu0 %v7904_v53  ;;  %3990 = vmatprep.subr.bf16.mxu1 %v7907_v55  ;;  %v7965_v53 = vld [vmem:[#allocation10 + $0xae8] ss:$16 sps:$4 sm:$0xff]   ;;  %v7970_v55 = vld [vmem:[#allocation10 + $0x8cc] ss:$16 sps:$4 sm:$0xff]  }
 0x1e1   :  { %3950 = vmatpush1.bf16.msra.mxu0 %v7902_v11  ;;  %3991 = vmatpush1.bf16.msra.mxu1 %v7905_v12  ;;  %v7973_v11 = vld [vmem:[#allocation10 + $0xacc] ss:$16 sps:$4 sm:$0xff]   ;;  %v7968_v12 = vld [vmem:[#allocation10 + $0x8c8] ss:$16 sps:$4 sm:$0xff]  }
 0x1e2   :  { %3951 = vmatprep.subr.bf16.mxu0 %v7910_v15  ;;  %3992 = vmatprep.subr.bf16.mxu1 %v7913_v16  ;;  %v7971_v15 = vld [vmem:[#allocation10 + $0xac8] ss:$16 sps:$4 sm:$0xff]  }
 0x1e5   :  { %3952 = vmatpush1.bf16.msra.mxu0 %v7908_v17  ;;  %3993 = vmatpush1.bf16.msra.mxu1 %v7911_v18  ;;  %v7976_v18 = vld [vmem:[#allocation10 + $0x8ac] ss:$16 sps:$4 sm:$0xff]  }
 0x1e6   :  { %3953 = vmatprep.subr.bf16.mxu0 %v7916_v19  ;;  %3994 = vmatprep.subr.bf16.mxu1 %v7919_v20 }
 0x1e9   :  { %3954 = vmatpush2.bf16.msra.mxu0 %v7914_v21  ;;  %3995 = vmatpush2.bf16.msra.mxu1 %v7917_v22  ;;  %v7979_v22 = vld [vmem:[#allocation10 + $0xaac] ss:$16 sps:$4 sm:$0xff]  }
 0x1ea   :  { %3955 = vmatprep.subr.bf16.mxu0 %v7922_v26  ;;  %3996 = vmatprep.subr.bf16.mxu1 %v7925_v34 }
 0x1ed   :  { %3956 = vmatpush2.bf16.msra.mxu0 %v7920_v35  ;;  %3997 = vmatpush2.bf16.msra.mxu1 %v7923_v37  ;;  %v7974_v35 = vld [vmem:[#allocation10 + $0x8a8] ss:$16 sps:$4 sm:$0xff]  }
 0x1ee   :  { %3957 = vmatprep.subr.bf16.mxu0 %v7928_v38  ;;  %3998 = vmatprep.subr.bf16.mxu1 %v7931_v56 }
 0x1f1   :  { %3958 = vmatpush2.bf16.msra.mxu0 %v7926_v43  ;;  %3999 = vmatpush2.bf16.msra.mxu1 %v7929_v44  ;;  %v7982_v43 = vld [vmem:[#allocation10 + $0x88c] ss:$16 sps:$4 sm:$0xff]  }
 0x1f2   :  { %3959 = vmatprep.subr.bf16.mxu0 %v7934_v57  ;;  %4000 = vmatprep.subr.bf16.mxu1 %v7937_v40  ;;  %v7985_v44 = vld [vmem:[#allocation10 + $0xa8c] ss:$16 sps:$4 sm:$0xff]   ;;  %v7980_v57 = vld [vmem:[#allocation10 + $0x888] ss:$16 sps:$4 sm:$0xff]  }
 0x1f3   :  { %v7991_v40 = vld [vmem:[#allocation10 + $0xa6c] ss:$16 sps:$4 sm:$0xff]  }
 0x1f5   :  { %3960 = vmatpush2.bf16.msra.mxu0 %v7932_v45  ;;  %4001 = vmatpush2.bf16.msra.mxu1 %v7935_v47  ;;  %v7989_v45 = vld [vmem:[#allocation10 + $0xa68] ss:$16 sps:$4 sm:$0xff]   ;;  %v7994_v47 = vld [vmem:[#allocation10 + $0x84c] ss:$16 sps:$4 sm:$0xff]  }
 0x1f6   :  { %3961 = vmatprep.subr.bf16.mxu0 %v7940_v49  ;;  %4002 = vmatprep.subr.bf16.mxu1 %v7943_v50  ;;  %v7997_v49 = vld [vmem:[#allocation10 + $0xa4c] ss:$16 sps:$4 sm:$0xff]   ;;  %v7992_v50 = vld [vmem:[#allocation10 + $0x848] ss:$16 sps:$4 sm:$0xff]  }
 0x1f9   :  { %3962 = vmatpush2.bf16.msra.mxu0 %v7938_v58  ;;  %4003 = vmatpush2.bf16.msra.mxu1 %v7941_v13  ;;  %v7995_v58 = vld [vmem:[#allocation10 + $0xa48] ss:$16 sps:$4 sm:$0xff]   ;;  %v8000_v13 = vld [vmem:[#allocation10 + $0x82c] ss:$16 sps:$4 sm:$0xff]  }
 0x1fa   :  { %3963 = vmatprep.subr.bf16.mxu0 %v7946_v14  ;;  %4004 = vmatprep.subr.bf16.mxu1 %v7949_v60  ;;  %v8003_v14 = vld [vmem:[#allocation10 + $0xa2c] ss:$16 sps:$4 sm:$0xff]   ;;  %v7998_v60 = vld [vmem:[#allocation10 + $0x828] ss:$16 sps:$4 sm:$0xff]  }
 0x1fd   :  { %3964 = vmatpush2.bf16.msra.mxu0 %v7944_v61  ;;  %4005 = vmatpush2.bf16.msra.mxu1 %v7947_v62  ;;  %v8001_v61 = vld [vmem:[#allocation10 + $0xa28] ss:$16 sps:$4 sm:$0xff]   ;;  %v8006_v62 = vld [vmem:[#allocation10 + $0x80c] ss:$16 sps:$4 sm:$0xff]  }
 0x1fe   :  { %3965 = vmatprep.subr.bf16.mxu0 %v7952_v63  ;;  %4006 = vmatprep.subr.bf16.mxu1 %v7955_v3  ;;  %v8009_v63 = vld [vmem:[#allocation10 + $0xa0c] ss:$16 sps:$4 sm:$0xff]   ;;  %v8004_v3 = vld [vmem:[#allocation10 + $0x808] ss:$16 sps:$4 sm:$0xff]  }
 0x201   :  { %3966 = vmatpush2.bf16.msra.mxu0 %v7950_v1  ;;  %4007 = vmatpush2.bf16.msra.mxu1 %v7953_v41  ;;  %v8007_v1 = vld [vmem:[#allocation10 + $0xa08] ss:$16 sps:$4 sm:$0xff]   ;;  %v8012_v41 = vld [vmem:[#allocation10 + $0x9ec] ss:$16 sps:$4 sm:$0xff]  }
 0x202   :  { %3967 = vmatprep.subr.bf16.mxu0 %v7958_v42  ;;  %4008 = vmatprep.subr.bf16.mxu1 %v7961_v4  ;;  %v8015_v42 = vld [vmem:[#allocation10 + $0xbec] ss:$16 sps:$4 sm:$0xff]   ;;  %v8010_v4 = vld [vmem:[#allocation10 + $0x9e8] ss:$16 sps:$4 sm:$0xff]  }
 0x205   :  { %3968 = vmatpush2.bf16.msra.mxu0 %v7956_v5  ;;  %4009 = vmatpush2.bf16.msra.mxu1 %v7959_v7  ;;  %v8013_v5 = vld [vmem:[#allocation10 + $0xbe8] ss:$16 sps:$4 sm:$0xff]   ;;  %v8018_v7 = vld [vmem:[#allocation10 + $0x9cc] ss:$16 sps:$4 sm:$0xff]  }
 0x206   :  { %4019 = vmatprep.subr.bf16.mxu0 %v7964_v8  ;;  %4060 = vmatprep.subr.bf16.mxu1 %v7967_v9  ;;  %v8021_v8 = vld [vmem:[#allocation10 + $0xbcc] ss:$16 sps:$4 sm:$0xff]   ;;  %v8016_v9 = vld [vmem:[#allocation10 + $0x9c8] ss:$16 sps:$4 sm:$0xff]  }
 0x208   :  { %v3725_v16 = vpop.f32.mrf.mxu0  ;;  %v3766_v17 = vpop.f32.mrf.mxu1  ;;  %3970 = vmatmul.mubr.bf16.vlgmr.msra.gmra.mxu0 %v8967_v24  ;;  %4011 = vmatmul.mubr.bf16.vlgmr.msra.gmra.mxu1 %v8971_v25 }
 0x209   :  { %v3726_v19 = vadd.f32 %v3725_v16, %v9058_v48  ;;  %4020 = vmatpush1.bf16.msra.mxu0 %v7962_v10  ;;  %4061 = vmatpush1.bf16.msra.mxu1 %v7965_v53  ;;  %v7977_v48 = vld [vmem:[#allocation10 + $0xaa8] ss:$16 sps:$4 sm:$0xff]   ;;  %v8024_v53 = vld [vmem:[#allocation10 + $0x9ac] ss:$16 sps:$4 sm:$0xff]  }
 0x20a   :  { %v3727_v20 = vpop.f32.mrf.mxu0  ;;  %v3768_v21 = vpop.f32.mrf.mxu1  ;;  %4021 = vmatprep.subr.bf16.mxu0 %v7970_v55  ;;  %4062 = vmatprep.subr.bf16.mxu1 %v7973_v11  ;;  %v8019_v10 = vld [vmem:[#allocation10 + $0xbc8] ss:$16 sps:$4 sm:$0xff]   ;;  %v8027_v55 = vld [vmem:[#allocation10 + $0xbac] ss:$16 sps:$4 sm:$0xff]  }
 0x20b   :  { %v9068_v26 = vadd.f32 %v3766_v17, %v3726_v19  ;;  %v3728_v34 = vadd.f32 %v3727_v20, %v9063_v59  ;;  %4051 = vmatprep.mubr.bf16.mxu0 %v8979_v32  ;;  %4092 = vmatprep.mubr.bf16.mxu1 %v8983_v33  ;;  %v7983_v59 = vld [vmem:[#allocation10 + $0xa88] ss:$16 sps:$4 sm:$0xff]   ;;  %v7988_v32 = vld [vmem:[#allocation10 + $0x86c] ss:$16 sps:$4 sm:$0xff]  }
 0x20c   :  { %v3729_v24 = vpop.f32.mrf.mxu0  ;;  %v3770_v25 = vpop.f32.mrf.mxu1  ;;  %v7986_v33 = vld [vmem:[#allocation10 + $0x868] ss:$16 sps:$4 sm:$0xff]   ;;  %v8033_v16 = vld [vmem:[#allocation10 + $0xb8c] ss:$16 sps:$4 sm:$0xff]  }
 0x20d   :  { %v9073_v37 = vadd.f32 %v3768_v21, %v3728_v34  ;;  %4022 = vmatpush1.bf16.msra.mxu0 %v7968_v12  ;;  %4063 = vmatpush1.bf16.msra.mxu1 %v7971_v15  ;;  %v8022_v11 = vld [vmem:[#allocation10 + $0x9a8] ss:$16 sps:$4 sm:$0xff]   ;;  %v8030_v15 = vld [vmem:[#allocation10 + $0x98c] ss:$16 sps:$4 sm:$0xff]  }
 0x20e   :  { %v3730_v38 = vpop.f32.mrf.mxu0  ;;  %v3771_v56 = vpop.f32.mrf.mxu1  ;;  %4023 = vmatprep.subr.bf16.mxu0 %v7976_v18  ;;  %4064 = vmatprep.subr.bf16.mxu1 %v7979_v22  ;;  %v8025_v12 = vld [vmem:[#allocation10 + $0xba8] ss:$16 sps:$4 sm:$0xff]   ;;  %v8036_v19 = vld [vmem:[#allocation10 + $0x96c] ss:$16 sps:$4 sm:$0xff]  }
 0x20f   :  { %v8028_v17 = vld [vmem:[#allocation10 + $0x988] ss:$16 sps:$4 sm:$0xff]   ;;  %v8039_v20 = vld [vmem:[#allocation10 + $0xb6c] ss:$16 sps:$4 sm:$0xff]  }
 0x210   :  { %v8031_v18 = vld [vmem:[#allocation10 + $0xb88] ss:$16 sps:$4 sm:$0xff]   ;;  %v8042_v34 = vld [vmem:[#allocation10 + $0x94c] ss:$16 sps:$4 sm:$0xff]  }
 0x211   :  { %4024 = vmatpush1.bf16.msra.mxu0 %v7974_v35  ;;  %4065 = vmatpush1.bf16.msra.mxu1 %v7977_v48  ;;  %v8034_v21 = vld [vmem:[#allocation10 + $0x968] ss:$16 sps:$4 sm:$0xff]   ;;  %v8045_v35 = vld [vmem:[#allocation10 + $0xb4c] ss:$16 sps:$4 sm:$0xff]  }
 0x212   :  { %4025 = vmatprep.subr.bf16.mxu0 %v7982_v43  ;;  %4066 = vmatprep.subr.bf16.mxu1 %v7985_v44  ;;  %v8037_v22 = vld [vmem:[#allocation10 + $0xb68] ss:$16 sps:$4 sm:$0xff]   ;;  %v8048_v48 = vld [vmem:[#allocation10 + $0x92c] ss:$16 sps:$4 sm:$0xff]  }
 0x213   :  { %v8040_v24 = vld [vmem:[#allocation10 + $0x948] ss:$16 sps:$4 sm:$0xff]   ;;  %v8051_v38 = vld [vmem:[#allocation10 + $0xb2c] ss:$16 sps:$4 sm:$0xff]  }
 0x214   :  { %v8043_v25 = vld [vmem:[#allocation10 + $0xb48] ss:$16 sps:$4 sm:$0xff]   ;;  %v8054_v44 = vld [vmem:[#allocation10 + $0x90c] ss:$16 sps:$4 sm:$0xff]  }
 0x215   :  { %4026 = vmatpush1.bf16.msra.mxu0 %v7980_v57  ;;  %4067 = vmatpush1.bf16.msra.mxu1 %v7983_v59  ;;  %v8046_v56 = vld [vmem:[#allocation10 + $0x928] ss:$16 sps:$4 sm:$0xff]   ;;  %v8057_v57 = vld [vmem:[#allocation10 + $0xb0c] ss:$16 sps:$4 sm:$0xff]  }
 0x216   :  { %4027 = vmatprep.subr.bf16.mxu0 %v7988_v32  ;;  %4068 = vmatprep.subr.bf16.mxu1 %v7991_v40  ;;  %v8049_v43 = vld [vmem:[#allocation10 + $0xb28] ss:$16 sps:$4 sm:$0xff]   ;;  %v8060_v40 = vld [vmem:[#allocation10 + $0xcec] ss:$16 sps:$4 sm:$0xff]  }
 0x217   :  { %v8052_v59 = vld [vmem:[#allocation10 + $0x908] ss:$16 sps:$4 sm:$0xff]  }
 0x218   :  { %v8055_v32 = vld [vmem:[#allocation10 + $0xb08] ss:$16 sps:$4 sm:$0xff]  }
 0x219   :  { %4028 = vmatpush1.bf16.msra.mxu0 %v7986_v33  ;;  %4069 = vmatpush1.bf16.msra.mxu1 %v7989_v45  ;;  %v8063_v33 = vld [vmem:[#allocation10 + $0xeec] ss:$16 sps:$4 sm:$0xff]   ;;  %v8058_v45 = vld [vmem:[#allocation10 + $0xce8] ss:$16 sps:$4 sm:$0xff]  }
 0x21a   :  { %4029 = vmatprep.subr.bf16.mxu0 %v7994_v47  ;;  %4070 = vmatprep.subr.bf16.mxu1 %v7997_v49  ;;  %v8061_v47 = vld [vmem:[#allocation10 + $0xee8] ss:$16 sps:$4 sm:$0xff]   ;;  %v8066_v49 = vld [vmem:[#allocation10 + $0xccc] ss:$16 sps:$4 sm:$0xff]  }
 0x21d   :  { %4030 = vmatpush1.bf16.msra.mxu0 %v7992_v50  ;;  %4071 = vmatpush1.bf16.msra.mxu1 %v7995_v58  ;;  %v8069_v50 = vld [vmem:[#allocation10 + $0xecc] ss:$16 sps:$4 sm:$0xff]  }
 0x21e   :  { %4031 = vmatprep.subr.bf16.mxu0 %v8000_v13  ;;  %4072 = vmatprep.subr.bf16.mxu1 %v8003_v14 }
 0x221   :  { %4032 = vmatpush1.bf16.msra.mxu0 %v7998_v60  ;;  %4073 = vmatpush1.bf16.msra.mxu1 %v8001_v61  ;;  %v8064_v60 = vld [vmem:[#allocation10 + $0xcc8] ss:$16 sps:$4 sm:$0xff]  }
 0x222   :  { %4033 = vmatprep.subr.bf16.mxu0 %v8006_v62  ;;  %4074 = vmatprep.subr.bf16.mxu1 %v8009_v63  ;;  %v8067_v61 = vld [vmem:[#allocation10 + $0xec8] ss:$16 sps:$4 sm:$0xff]  }
 0x225   :  { %4034 = vmatpush1.bf16.msra.mxu0 %v8004_v3  ;;  %4075 = vmatpush1.bf16.msra.mxu1 %v8007_v1  ;;  %v8072_v3 = vld [vmem:[#allocation10 + $0xcac] ss:$16 sps:$4 sm:$0xff]  }
 0x226   :  { %4035 = vmatprep.subr.bf16.mxu0 %v8012_v41  ;;  %4076 = vmatprep.subr.bf16.mxu1 %v8015_v42  ;;  %v8075_v1 = vld [vmem:[#allocation10 + $0xeac] ss:$16 sps:$4 sm:$0xff]  }
 0x229   :  { %4036 = vmatpush2.bf16.msra.mxu0 %v8010_v4  ;;  %4077 = vmatpush2.bf16.msra.mxu1 %v8013_v5  ;;  %v8070_v4 = vld [vmem:[#allocation10 + $0xca8] ss:$16 sps:$4 sm:$0xff]  }
 0x22a   :  { %4037 = vmatprep.subr.bf16.mxu0 %v8018_v7  ;;  %4078 = vmatprep.subr.bf16.mxu1 %v8021_v8  ;;  %v8073_v5 = vld [vmem:[#allocation10 + $0xea8] ss:$16 sps:$4 sm:$0xff]  }
 0x22d   :  { %4038 = vmatpush2.bf16.msra.mxu0 %v8016_v9  ;;  %4079 = vmatpush2.bf16.msra.mxu1 %v8019_v10  ;;  %v8078_v9 = vld [vmem:[#allocation10 + $0xc8c] ss:$16 sps:$4 sm:$0xff]  }
 0x22e   :  { %4039 = vmatprep.subr.bf16.mxu0 %v8024_v53  ;;  %4080 = vmatprep.subr.bf16.mxu1 %v8027_v55  ;;  %v8081_v10 = vld [vmem:[#allocation10 + $0xe8c] ss:$16 sps:$4 sm:$0xff]   ;;  %v8082_v55 = vld [vmem:[#allocation10 + $0xc68] ss:$16 sps:$4 sm:$0xff]  }
 0x22f   :  { %v8087_v53 = vld [vmem:[#allocation10 + $0xe6c] ss:$16 sps:$4 sm:$0xff]  }
 0x231   :  { %4040 = vmatpush2.bf16.msra.mxu0 %v8022_v11  ;;  %4081 = vmatpush2.bf16.msra.mxu1 %v8025_v12  ;;  %v8085_v11 = vld [vmem:[#allocation10 + $0xe68] ss:$16 sps:$4 sm:$0xff]   ;;  %v8090_v12 = vld [vmem:[#allocation10 + $0xc4c] ss:$16 sps:$4 sm:$0xff]  }
 0x232   :  { %4041 = vmatprep.subr.bf16.mxu0 %v8030_v15  ;;  %4082 = vmatprep.subr.bf16.mxu1 %v8033_v16  ;;  %v8093_v15 = vld [vmem:[#allocation10 + $0xe4c] ss:$16 sps:$4 sm:$0xff]   ;;  %v8088_v16 = vld [vmem:[#allocation10 + $0xc48] ss:$16 sps:$4 sm:$0xff]  }
 0x235   :  { %4042 = vmatpush2.bf16.msra.mxu0 %v8028_v17  ;;  %4083 = vmatpush2.bf16.msra.mxu1 %v8031_v18  ;;  %v8091_v17 = vld [vmem:[#allocation10 + $0xe48] ss:$16 sps:$4 sm:$0xff]   ;;  %v8096_v18 = vld [vmem:[#allocation10 + $0xc2c] ss:$16 sps:$4 sm:$0xff]  }
 0x236   :  { %4043 = vmatprep.subr.bf16.mxu0 %v8036_v19  ;;  %4084 = vmatprep.subr.bf16.mxu1 %v8039_v20  ;;  %v8099_v19 = vld [vmem:[#allocation10 + $0xe2c] ss:$16 sps:$4 sm:$0xff]   ;;  %v8094_v20 = vld [vmem:[#allocation10 + $0xc28] ss:$16 sps:$4 sm:$0xff]  }
 0x239   :  { %4044 = vmatpush2.bf16.msra.mxu0 %v8034_v21  ;;  %4085 = vmatpush2.bf16.msra.mxu1 %v8037_v22  ;;  %v8097_v21 = vld [vmem:[#allocation10 + $0xe28] ss:$16 sps:$4 sm:$0xff]   ;;  %v8102_v22 = vld [vmem:[#allocation10 + $0xc0c] ss:$16 sps:$4 sm:$0xff]  }
 0x23a   :  { %4045 = vmatprep.subr.bf16.mxu0 %v8042_v34  ;;  %4086 = vmatprep.subr.bf16.mxu1 %v8045_v35  ;;  %v8105_v34 = vld [vmem:[#allocation10 + $0xe0c] ss:$16 sps:$4 sm:$0xff]   ;;  %v8100_v35 = vld [vmem:[#allocation10 + $0xc08] ss:$16 sps:$4 sm:$0xff]  }
 0x23d   :  { %4046 = vmatpush2.bf16.msra.mxu0 %v8040_v24  ;;  %4087 = vmatpush2.bf16.msra.mxu1 %v8043_v25  ;;  %v8103_v24 = vld [vmem:[#allocation10 + $0xe08] ss:$16 sps:$4 sm:$0xff]   ;;  %v8108_v25 = vld [vmem:[#allocation10 + $0xdec] ss:$16 sps:$4 sm:$0xff]  }
 0x23e   :  { %4047 = vmatprep.subr.bf16.mxu0 %v8048_v48  ;;  %4088 = vmatprep.subr.bf16.mxu1 %v8051_v38  ;;  %v8111_v48 = vld [vmem:[#allocation10 + $0xfec] ss:$16 sps:$4 sm:$0xff]   ;;  %v8106_v38 = vld [vmem:[#allocation10 + $0xde8] ss:$16 sps:$4 sm:$0xff]  }
 0x241   :  { %4048 = vmatpush2.bf16.msra.mxu0 %v8046_v56  ;;  %4089 = vmatpush2.bf16.msra.mxu1 %v8049_v43  ;;  %v8109_v56 = vld [vmem:[#allocation10 + $0xfe8] ss:$16 sps:$4 sm:$0xff]   ;;  %v8114_v43 = vld [vmem:[#allocation10 + $0xdcc] ss:$16 sps:$4 sm:$0xff]  }
 0x242   :  { %4049 = vmatprep.subr.bf16.mxu0 %v8054_v44  ;;  %4090 = vmatprep.subr.bf16.mxu1 %v8057_v57  ;;  %v8117_v44 = vld [vmem:[#allocation10 + $0xfcc] ss:$16 sps:$4 sm:$0xff]   ;;  %v8112_v57 = vld [vmem:[#allocation10 + $0xdc8] ss:$16 sps:$4 sm:$0xff]  }
 0x245   :  { %4050 = vmatpush2.bf16.msra.mxu0 %v8052_v59  ;;  %4091 = vmatpush2.bf16.msra.mxu1 %v8055_v32  ;;  %v8115_v59 = vld [vmem:[#allocation10 + $0xfc8] ss:$16 sps:$4 sm:$0xff]   ;;  %v8120_v32 = vld [vmem:[#allocation10 + $0xdac] ss:$16 sps:$4 sm:$0xff]  }
 0x246   :  { %4101 = vmatprep.subr.bf16.mxu0 %v8060_v40  ;;  %4142 = vmatprep.subr.bf16.mxu1 %v8063_v33  ;;  %v8123_v40 = vld [vmem:[#allocation10 + $0xfac] ss:$16 sps:$4 sm:$0xff]   ;;  %v8118_v33 = vld [vmem:[#allocation10 + $0xda8] ss:$16 sps:$4 sm:$0xff]  }
 0x248   :  { %v3807_v58 = vpop.f32.mrf.mxu0  ;;  %v3848_v13 = vpop.f32.mrf.mxu1  ;;  %4052 = vmatmul.mubr.bf16.vlgmr.msra.gmra.mxu0 %v8999_v52  ;;  %4093 = vmatmul.mubr.bf16.vlgmr.msra.gmra.mxu1 %v9003_v54 }
 0x249   :  { %v3808_v14 = vadd.f32 %v3807_v58, %v9068_v26  ;;  %4102 = vmatpush1.bf16.msra.mxu0 %v8058_v45  ;;  %4143 = vmatpush1.bf16.msra.mxu1 %v8061_v47  ;;  %v8121_v45 = vld [vmem:[#allocation10 + $0xfa8] ss:$16 sps:$4 sm:$0xff]   ;;  %v8126_v47 = vld [vmem:[#allocation10 + $0xd8c] ss:$16 sps:$4 sm:$0xff]  }
 0x24a   :  { %v3809_v62 = vpop.f32.mrf.mxu0  ;;  %v3850_v63 = vpop.f32.mrf.mxu1  ;;  %4103 = vmatprep.subr.bf16.mxu0 %v8066_v49  ;;  %4144 = vmatprep.subr.bf16.mxu1 %v8069_v50  ;;  %v8129_v49 = vld [vmem:[#allocation10 + $0xf8c] ss:$16 sps:$4 sm:$0xff]   ;;  %v8124_v50 = vld [vmem:[#allocation10 + $0xd88] ss:$16 sps:$4 sm:$0xff]  }
 0x24b   :  { %v9078_v41 = vadd.f32 %v3848_v13, %v3808_v14  ;;  %v3810_v42 = vadd.f32 %v3809_v62, %v9073_v37  ;;  %4133 = vmatprep.mubr.bf16.mxu0 %v9013_v27  ;;  %4174 = vmatprep.mubr.bf16.mxu1 %v9017_v28  ;;  %v8076_v37 = vld [vmem:[#allocation10 + $0xc88] ss:$16 sps:$4 sm:$0xff]   ;;  %v8084_v28 = vld [vmem:[#allocation10 + $0xc6c] ss:$16 sps:$4 sm:$0xff]  }
 0x24c   :  { %v3811_v52 = vpop.f32.mrf.mxu0  ;;  %v3852_v54 = vpop.f32.mrf.mxu1  ;;  %v8079_v27 = vld [vmem:[#allocation10 + $0xe88] ss:$16 sps:$4 sm:$0xff]   ;;  %v8132_v13 = vld [vmem:[#allocation10 + $0xd6c] ss:$16 sps:$4 sm:$0xff]  }
 0x24d   :  { %v9083_v26 = vadd.f32 %v3850_v63, %v3810_v42  ;;  %4104 = vmatpush1.bf16.msra.mxu0 %v8064_v60  ;;  %4145 = vmatpush1.bf16.msra.mxu1 %v8067_v61  ;;  %v8127_v58 = vld [vmem:[#allocation10 + $0xf88] ss:$16 sps:$4 sm:$0xff]   ;;  %v8135_v14 = vld [vmem:[#allocation10 + $0xf6c] ss:$16 sps:$4 sm:$0xff]  }
 0x24e   :  { %v3812_v7 = vpop.f32.mrf.mxu0  ;;  %v3853_v8 = vpop.f32.mrf.mxu1  ;;  %4105 = vmatprep.subr.bf16.mxu0 %v8072_v3  ;;  %4146 = vmatprep.subr.bf16.mxu1 %v8075_v1  ;;  %v8130_v60 = vld [vmem:[#allocation10 + $0xd68] ss:$16 sps:$4 sm:$0xff]   ;;  %v8138_v62 = vld [vmem:[#allocation10 + $0xd4c] ss:$16 sps:$4 sm:$0xff]  }
 0x24f   :  { %v8133_v61 = vld [vmem:[#allocation10 + $0xf68] ss:$16 sps:$4 sm:$0xff]   ;;  %v8141_v63 = vld [vmem:[#allocation10 + $0xf4c] ss:$16 sps:$4 sm:$0xff]  }
 0x250   :  { %v8136_v3 = vld [vmem:[#allocation10 + $0xd48] ss:$16 sps:$4 sm:$0xff]   ;;  %v8144_v42 = vld [vmem:[#allocation10 + $0xd2c] ss:$16 sps:$4 sm:$0xff]  }
 0x251   :  { %4106 = vmatpush1.bf16.msra.mxu0 %v8070_v4  ;;  %4147 = vmatpush1.bf16.msra.mxu1 %v8073_v5  ;;  %v8139_v1 = vld [vmem:[#allocation10 + $0xf48] ss:$16 sps:$4 sm:$0xff]   ;;  %v8147_v52 = vld [vmem:[#allocation10 + $0xf2c] ss:$16 sps:$4 sm:$0xff]  }
 0x252   :  { %4107 = vmatprep.subr.bf16.mxu0 %v8078_v9  ;;  %4148 = vmatprep.subr.bf16.mxu1 %v8081_v10  ;;  %v8142_v54 = vld [vmem:[#allocation10 + $0xd28] ss:$16 sps:$4 sm:$0xff]   ;;  %v8150_v5 = vld [vmem:[#allocation10 + $0xd0c] ss:$16 sps:$4 sm:$0xff]  }
 0x253   :  { %v8145_v4 = vld [vmem:[#allocation10 + $0xf28] ss:$16 sps:$4 sm:$0xff]   ;;  %v8153_v7 = vld [vmem:[#allocation10 + $0xf0c] ss:$16 sps:$4 sm:$0xff]  }
 0x254   :  { %v4188_v8 = vld [vmem:[#allocation16] sm:$0xff] }
 0x255   :  { %4108 = vmatpush1.bf16.msra.mxu0 %v8076_v37  ;;  %4149 = vmatpush1.bf16.msra.mxu1 %v8079_v27  ;;  %v8148_v9 = vld [vmem:[#allocation10 + $0xd08] ss:$16 sps:$4 sm:$0xff]   ;;  %v4192_v37 = vcombine.high %v4188_v8, %v4188_v8  ;;  %v8540_v27 = vld [vmem:[#allocation11] sm:$0xf] }
 0x256   :  { %4109 = vmatprep.subr.bf16.mxu0 %v8084_v28  ;;  %4150 = vmatprep.subr.bf16.mxu1 %v8087_v53  ;;  %v8151_v10 = vld [vmem:[#allocation10 + $0xf08] ss:$16 sps:$4 sm:$0xff]   ;;  %v902_v28 = vrot.slane %v8540_v27, %v8992_v46 }
 0x257   :  { %v8157_v53 = vld [vmem:[#allocation14 + $0xe4] ss:$16 sps:$4 sm:$0xff]  }
 0x259   :  { %4110 = vmatpush1.bf16.msra.mxu0 %v8082_v55  ;;  %4151 = vmatpush1.bf16.msra.mxu1 %v8085_v11  ;;  %v906_v55 = vrot.slane %v8540_v27, %v8995_v51  ;;  %v8182_v27 = vld [vmem:[#allocation14 + $0x1c0] ss:$16 sps:$4 sm:$0xff]  }
 0x25a   :  { %4111 = vmatprep.subr.bf16.mxu0 %v8090_v12  ;;  %4152 = vmatprep.subr.bf16.mxu1 %v8093_v15 }
 0x25d   :  { %4112 = vmatpush1.bf16.msra.mxu0 %v8088_v16  ;;  %4153 = vmatpush1.bf16.msra.mxu1 %v8091_v17 }
 0x25e   :  { %4113 = vmatprep.subr.bf16.mxu0 %v8096_v18  ;;  %4154 = vmatprep.subr.bf16.mxu1 %v8099_v19  ;;  %v4184_v18 = vmax.f32 %v9083_v26, 0.0  ;;  %v8158_v26 = vld [vmem:[#allocation14 + $0xc0] ss:$16 sps:$4 sm:$0xff]  }
 0x261   :  { %4114 = vmatpush1.bf16.msra.mxu0 %v8094_v20  ;;  %4155 = vmatpush1.bf16.msra.mxu1 %v8097_v21 }
 0x262   :  { %4115 = vmatprep.subr.bf16.mxu0 %v8102_v22  ;;  %4156 = vmatprep.subr.bf16.mxu1 %v8105_v34  ;;  %v4187_v34 = vld [vmem:[%s9391_s1] sm:$0xff] }
 0x265   :  { %4116 = vmatpush1.bf16.msra.mxu0 %v8100_v35  ;;  %4157 = vmatpush1.bf16.msra.mxu1 %v8103_v24  ;;  %v4189_v35 = vld [vmem:[#allocation16 + $0x8] sm:$0xff] }
 0x266   :  { %4117 = vmatprep.subr.bf16.mxu0 %v8108_v25  ;;  %4158 = vmatprep.subr.bf16.mxu1 %v8111_v48  ;;  %v8160_v48 = vld [vmem:[#allocation14 + $0xc4] ss:$16 sps:$4 sm:$0xff]  }
 0x269   :  { %4118 = vmatpush2.bf16.msra.mxu0 %v8106_v38  ;;  %4159 = vmatpush2.bf16.msra.mxu1 %v8109_v56  ;;  %v4193_v38 = vcombine.high %v4189_v35, %v4189_v35  ;;  %v8255_v56 = vld [vmem:[#allocation14 + $0x2e0] ss:$16 sps:$4 sm:$0xff]  }
 0x26a   :  { %4119 = vmatprep.subr.bf16.mxu0 %v8114_v43  ;;  %4160 = vmatprep.subr.bf16.mxu1 %v8117_v44  ;;  %v8257_v43 = vld [vmem:[#allocation14 + $0x2e4] ss:$16 sps:$4 sm:$0xff]  }
 0x26b   :  { %v8163_v44 = vld [vmem:[#allocation14 + $0xa4] ss:$16 sps:$4 sm:$0xff]  }
 0x26d   :  { %4120 = vmatpush2.bf16.msra.mxu0 %v8112_v57  ;;  %4161 = vmatpush2.bf16.msra.mxu1 %v8115_v59  ;;  %v8161_v57 = vld [vmem:[#allocation14 + $0xa0] ss:$16 sps:$4 sm:$0xff]  }
 0x26e   :  { %4121 = vmatprep.subr.bf16.mxu0 %v8120_v32  ;;  %4162 = vmatprep.subr.bf16.mxu1 %v8123_v40  ;;  %v8261_v59 = vld [vmem:[#allocation14 + $0x2c0] ss:$16 sps:$4 sm:$0xff]   ;;  %v8263_v32 = vld [vmem:[#allocation14 + $0x2c4] ss:$16 sps:$4 sm:$0xff]  }
 0x26f   :  { %v8166_v40 = vld [vmem:[#allocation14 + $0x84] ss:$16 sps:$4 sm:$0xff]  }
 0x271   :  { %4122 = vmatpush2.bf16.msra.mxu0 %v8118_v33  ;;  %4163 = vmatpush2.bf16.msra.mxu1 %v8121_v45  ;;  %v8164_v33 = vld [vmem:[#allocation14 + $0x80] ss:$16 sps:$4 sm:$0xff]  }
 0x272   :  { %4123 = vmatprep.subr.bf16.mxu0 %v8126_v47  ;;  %4164 = vmatprep.subr.bf16.mxu1 %v8129_v49  ;;  %v8267_v45 = vld [vmem:[#allocation14 + $0x2a0] ss:$16 sps:$4 sm:$0xff]   ;;  %v8269_v47 = vld [vmem:[#allocation14 + $0x2a4] ss:$16 sps:$4 sm:$0xff]  }
 0x273   :  { %v8169_v49 = vld [vmem:[#allocation14 + $0x64] ss:$16 sps:$4 sm:$0xff]  }
 0x275   :  { %4124 = vmatpush2.bf16.msra.mxu0 %v8124_v50  ;;  %4165 = vmatpush2.bf16.msra.mxu1 %v8127_v58  ;;  %v8167_v50 = vld [vmem:[#allocation14 + $0x60] ss:$16 sps:$4 sm:$0xff]  }
 0x276   :  { %4125 = vmatprep.subr.bf16.mxu0 %v8132_v13  ;;  %4166 = vmatprep.subr.bf16.mxu1 %v8135_v14  ;;  %v8273_v58 = vld [vmem:[#allocation14 + $0x280] ss:$16 sps:$4 sm:$0xff]   ;;  %v8275_v13 = vld [vmem:[#allocation14 + $0x284] ss:$16 sps:$4 sm:$0xff]  }
 0x277   :  { %v8172_v14 = vld [vmem:[#allocation14 + $0x44] ss:$16 sps:$4 sm:$0xff]  }
 0x279   :  { %4126 = vmatpush2.bf16.msra.mxu0 %v8130_v60  ;;  %4167 = vmatpush2.bf16.msra.mxu1 %v8133_v61  ;;  %v8170_v60 = vld [vmem:[#allocation14 + $0x40] ss:$16 sps:$4 sm:$0xff]  }
 0x27a   :  { %4127 = vmatprep.subr.bf16.mxu0 %v8138_v62  ;;  %4168 = vmatprep.subr.bf16.mxu1 %v8141_v63  ;;  %v8279_v61 = vld [vmem:[#allocation14 + $0x260] ss:$16 sps:$4 sm:$0xff]   ;;  %v8281_v62 = vld [vmem:[#allocation14 + $0x264] ss:$16 sps:$4 sm:$0xff]  }
 0x27b   :  { %v8175_v63 = vld [vmem:[#allocation14 + $0x24] ss:$16 sps:$4 sm:$0xff]  }
 0x27d   :  { %4128 = vmatpush2.bf16.msra.mxu0 %v8136_v3  ;;  %4169 = vmatpush2.bf16.msra.mxu1 %v8139_v1  ;;  %v8173_v3 = vld [vmem:[#allocation14 + $0x20] ss:$16 sps:$4 sm:$0xff]  }
 0x27e   :  { %4129 = vmatprep.subr.bf16.mxu0 %v8144_v42  ;;  %4170 = vmatprep.subr.bf16.mxu1 %v8147_v52  ;;  %v8285_v1 = vld [vmem:[#allocation14 + $0x240] ss:$16 sps:$4 sm:$0xff]   ;;  %v8287_v42 = vld [vmem:[#allocation14 + $0x244] ss:$16 sps:$4 sm:$0xff]  }
 0x27f   :  { %v8178_v52 = vld [vmem:[#allocation14 + $0x4] ss:$16 sps:$4 sm:$0xff]  }
 0x281   :  { %4130 = vmatpush2.bf16.msra.mxu0 %v8142_v54  ;;  %4171 = vmatpush2.bf16.msra.mxu1 %v8145_v4  ;;  %v8176_v54 = vld [vmem:[#allocation14] ss:$16 sps:$4 sm:$0xff]  }
 0x282   :  { %4131 = vmatprep.subr.bf16.mxu0 %v8150_v5  ;;  %4172 = vmatprep.subr.bf16.mxu1 %v8153_v7  ;;  %v8291_v4 = vld [vmem:[#allocation14 + $0x220] ss:$16 sps:$4 sm:$0xff]   ;;  %v8293_v5 = vld [vmem:[#allocation14 + $0x224] ss:$16 sps:$4 sm:$0xff]  }
 0x283   :  { %v8181_v7 = vld [vmem:[#allocation14 + $0x1e4] ss:$16 sps:$4 sm:$0xff]  }
 0x285   :  { %4132 = vmatpush2.bf16.msra.mxu0 %v8148_v9  ;;  %4173 = vmatpush2.bf16.msra.mxu1 %v8151_v10  ;;  %v8297_v9 = vld [vmem:[#allocation14 + $0x200] ss:$16 sps:$4 sm:$0xff]   ;;  %v8299_v10 = vld [vmem:[#allocation14 + $0x204] ss:$16 sps:$4 sm:$0xff]  }
 0x286   :  { %7020 = vmatprep.subr.msk.mxu0 %vm214_vm0, %v4192_v37  ;;  %7023 = vmatprep.subr.msk.mxu1 %vm214_vm0, %v4193_v38  ;;  %v8184_v37 = vld [vmem:[#allocation14 + $0x1c4] ss:$16 sps:$4 sm:$0xff]  }
 0x287   :  { %v8199_v38 = vld [vmem:[#allocation14 + $0x124] ss:$16 sps:$4 sm:$0xff]  }
 0x288   :  { %v3889_v11 = vpop.f32.mrf.mxu0  ;;  %v3930_v12 = vpop.f32.mrf.mxu1  ;;  %4134 = vmatmul.mubr.bf16.vlgmr.msra.gmra.mxu0 %v9034_v30  ;;  %4175 = vmatmul.mubr.bf16.vlgmr.msra.gmra.mxu1 %v9038_v31  ;;  %v8155_v31 = vld [vmem:[#allocation14 + $0xe0] ss:$16 sps:$4 sm:$0xff]  }
 0x289   :  { %v3890_v15 = vadd.f32 %v3889_v11, %v902_v28  ;;  %7021 = vmatpush1.msk.msra.mxu0 %vm214_vm0, %v4188_v8  ;;  %4269 = vmatprep.mubr.f32.mxu0 %v8809_v0  ;;  %v8179_v8 = vld [vmem:[#allocation14 + $0x1e0] ss:$16 sps:$4 sm:$0xff]  }
 0x28a   :  { %v3891_v16 = vpop.f32.mrf.mxu0  ;;  %v3932_v17 = vpop.f32.mrf.mxu1  ;;  %5251 = vmatprep.subr.bf16.mxu0 %v8157_v53  ;;  %4340 = vmatprep.mubr.f32.mxu1 %v8809_v0  ;;  %v9101_v0 = vpack.c.bf16 %v4184_v18, %v4184_v18  ;;  %v8303_v28 = vld [vmem:[#allocation14 + $0x3e0] ss:$16 sps:$4 sm:$0xff]   ;;  %v8305_v53 = vld [vmem:[#allocation14 + $0x3e4] ss:$16 sps:$4 sm:$0xff]  }
 0x28b   :  { %v9094_v19 = vadd.f32 %v3930_v12, %v3890_v15  ;;  %v3892_v20 = vadd.f32 %v3891_v16, %v906_v55  ;;  %7024 = vmatpush1.msk.msra.mxu1 %vm214_vm0, %v4189_v35  ;;  %v8187_v55 = vld [vmem:[#allocation14 + $0x1a4] ss:$16 sps:$4 sm:$0xff]   ;;  %v8185_v11 = vld [vmem:[#allocation14 + $0x1a0] ss:$16 sps:$4 sm:$0xff]  }
 0x28c   :  { %v3893_v21 = vpop.f32.mrf.mxu0  ;;  %v3934_v22 = vpop.f32.mrf.mxu1  ;;  %5292 = vmatprep.subr.bf16.mxu1 %v8257_v43  ;;  %v8309_v12 = vld [vmem:[#allocation14 + $0x3c0] ss:$16 sps:$4 sm:$0xff]   ;;  %v8311_v15 = vld [vmem:[#allocation14 + $0x3c4] ss:$16 sps:$4 sm:$0xff]  }
 0x28d   :  { %v9096_v30 = vadd.f32 %v3932_v17, %v3892_v20  ;;  %v8190_v16 = vld [vmem:[#allocation14 + $0x184] ss:$16 sps:$4 sm:$0xff]   ;;  %v8188_v17 = vld [vmem:[#allocation14 + $0x180] ss:$16 sps:$4 sm:$0xff]  }
 0x28e   :  { %v3894_v24 = vpop.f32.mrf.mxu0  ;;  %v3935_v25 = vpop.f32.mrf.mxu1  ;;  %v8315_v18 = vld [vmem:[#allocation14 + $0x3a0] ss:$16 sps:$4 sm:$0xff]   ;;  %v8317_v20 = vld [vmem:[#allocation14 + $0x3a4] ss:$16 sps:$4 sm:$0xff]  }
 0x28f   :  { %v8193_v21 = vld [vmem:[#allocation14 + $0x164] ss:$16 sps:$4 sm:$0xff]   ;;  %v8191_v22 = vld [vmem:[#allocation14 + $0x160] ss:$16 sps:$4 sm:$0xff]  }
 0x290   :  { %7022 = vmatmul.mubr.msk.f32.vlgmr.msra.gmra.mxu0 %vm210_vm1, %v4187_v34  ;;  %7025 = vmatmul.mubr.msk.f32.vlgmr.msra.gmra.mxu1 %vm210_vm1, %v4187_v34  ;;  %v8323_v34 = vld [vmem:[#allocation14 + $0x384] ss:$16 sps:$4 sm:$0xff]   ;;  %v8194_v24 = vld [vmem:[#allocation14 + $0x140] ss:$16 sps:$4 sm:$0xff]  }
 0x291   :  { %5252 = vmatpush1.bf16.msra.mxu0 %v8155_v31  ;;  %5283 = vmatprep.mubr.bf16.mxu0 %v9101_v0  ;;  %v8321_v31 = vld [vmem:[#allocation14 + $0x380] ss:$16 sps:$4 sm:$0xff]   ;;  %v8196_v35 = vld [vmem:[#allocation14 + $0x144] ss:$16 sps:$4 sm:$0xff]  }
 0x292   :  { %5253 = vmatprep.subr.bf16.mxu0 %v8160_v48  ;;  %5293 = vmatpush1.bf16.msra.mxu1 %v8255_v56  ;;  %v8327_v25 = vld [vmem:[#allocation14 + $0x360] ss:$16 sps:$4 sm:$0xff]   ;;  %v8329_v48 = vld [vmem:[#allocation14 + $0x364] ss:$16 sps:$4 sm:$0xff]  }
 0x293   :  { %5294 = vmatprep.subr.bf16.mxu1 %v8263_v32  ;;  %v8333_v56 = vld [vmem:[#allocation14 + $0x340] ss:$16 sps:$4 sm:$0xff]   ;;  %v8335_v43 = vld [vmem:[#allocation14 + $0x344] ss:$16 sps:$4 sm:$0xff]  }
 0x295   :  { %5254 = vmatpush1.bf16.msra.mxu0 %v8158_v26  ;;  %v8197_v26 = vld [vmem:[#allocation14 + $0x120] ss:$16 sps:$4 sm:$0xff]  }
 0x296   :  { %5255 = vmatprep.subr.bf16.mxu0 %v8163_v44  ;;  %5295 = vmatpush1.bf16.msra.mxu1 %v8261_v59  ;;  %v8202_v44 = vld [vmem:[#allocation14 + $0x104] ss:$16 sps:$4 sm:$0xff]  }
 0x297   :  { %5296 = vmatprep.subr.bf16.mxu1 %v8269_v47 }
 0x299   :  { %5256 = vmatpush1.bf16.msra.mxu0 %v8161_v57 }
 0x29a   :  { %5257 = vmatprep.subr.bf16.mxu0 %v8166_v40  ;;  %5297 = vmatpush1.bf16.msra.mxu1 %v8267_v45  ;;  %v8200_v40 = vld [vmem:[#allocation14 + $0x100] ss:$16 sps:$4 sm:$0xff]  }
 0x29b   :  { %5298 = vmatprep.subr.bf16.mxu1 %v8275_v13 }
 0x29d   :  { %5258 = vmatpush1.bf16.msra.mxu0 %v8164_v33  ;;  %v4183_v33 = vmax.f32 %v9078_v41, 0.0 }
 0x29e   :  { %5259 = vmatprep.subr.bf16.mxu0 %v8169_v49  ;;  %5299 = vmatpush1.bf16.msra.mxu1 %v8273_v58  ;;  %v8205_v49 = vld [vmem:[#allocation14 + $0xec] ss:$16 sps:$4 sm:$0xff]  }
 0x29f   :  { %5300 = vmatprep.subr.bf16.mxu1 %v8281_v62 }
 0x2a1   :  { %5260 = vmatpush1.bf16.msra.mxu0 %v8167_v50  ;;  %v8341_v50 = vld [vmem:[#allocation14 + $0x324] ss:$16 sps:$4 sm:$0xff]  }
 0x2a2   :  { %5261 = vmatprep.subr.bf16.mxu0 %v8172_v14  ;;  %5301 = vmatpush1.bf16.msra.mxu1 %v8279_v61  ;;  %v8339_v14 = vld [vmem:[#allocation14 + $0x320] ss:$16 sps:$4 sm:$0xff]  }
 0x2a3   :  { %5302 = vmatprep.subr.bf16.mxu1 %v8287_v42  ;;  %v8347_v42 = vld [vmem:[#allocation14 + $0x304] ss:$16 sps:$4 sm:$0xff]  }
 0x2a5   :  { %5262 = vmatpush1.bf16.msra.mxu0 %v8170_v60 }
 0x2a6   :  { %5263 = vmatprep.subr.bf16.mxu0 %v8175_v63  ;;  %5303 = vmatpush1.bf16.msra.mxu1 %v8285_v1  ;;  %v9115_v63 = vpack.c.bf16 %v4183_v33, %v4183_v33  ;;  %v8208_v1 = vld [vmem:[#allocation14 + $0xcc] ss:$16 sps:$4 sm:$0xff]   ;;  %v8254_v33 = vld [vmem:[#allocation13 + $0xe4] ss:$16 sps:$4 sm:$0xff]  }
 0x2a7   :  { %5304 = vmatprep.subr.bf16.mxu1 %v8293_v5  ;;  %v8209_v5 = vld [vmem:[#allocation14 + $0xa8] ss:$16 sps:$4 sm:$0xff]  }
 0x2a9   :  { %5264 = vmatpush1.bf16.msra.mxu0 %v8173_v3 }
 0x2aa   :  { %5265 = vmatprep.subr.bf16.mxu0 %v8178_v52  ;;  %5305 = vmatpush1.bf16.msra.mxu1 %v8291_v4  ;;  %v8345_v52 = vld [vmem:[#allocation14 + $0x300] ss:$16 sps:$4 sm:$0xff]   ;;  %v8353_v4 = vld [vmem:[#allocation14 + $0x2ec] ss:$16 sps:$4 sm:$0xff]  }
 0x2ab   :  { %5306 = vmatprep.subr.bf16.mxu1 %v8299_v10  ;;  %v8215_v10 = vld [vmem:[#allocation14 + $0x68] ss:$16 sps:$4 sm:$0xff]  }
 0x2ad   :  { %5266 = vmatpush1.bf16.msra.mxu0 %v8176_v54  ;;  %v8211_v54 = vld [vmem:[#allocation14 + $0xac] ss:$16 sps:$4 sm:$0xff]  }
 0x2ae   :  { %5267 = vmatprep.subr.bf16.mxu0 %v8181_v7  ;;  %5307 = vmatpush1.bf16.msra.mxu1 %v8297_v9  ;;  %v8214_v7 = vld [vmem:[#allocation14 + $0x8c] ss:$16 sps:$4 sm:$0xff]  }
 0x2af   :  { %5308 = vmatprep.subr.bf16.mxu1 %v8305_v53  ;;  %v8217_v9 = vld [vmem:[#allocation14 + $0x6c] ss:$16 sps:$4 sm:$0xff]  }
 0x2b0   :  { %v8226_v53 = vld [vmem:[#allocation14 + $0xc] ss:$16 sps:$4 sm:$0xff]  }
 0x2b1   :  { %5268 = vmatpush2.bf16.msra.mxu0 %v8179_v8  ;;  %v8212_v8 = vld [vmem:[#allocation14 + $0x88] ss:$16 sps:$4 sm:$0xff]  }
 0x2b2   :  { %5269 = vmatprep.subr.bf16.mxu0 %v8184_v37  ;;  %5309 = vmatpush2.bf16.msra.mxu1 %v8303_v28  ;;  %v8220_v37 = vld [vmem:[#allocation14 + $0x4c] ss:$16 sps:$4 sm:$0xff]   ;;  %v8221_v28 = vld [vmem:[#allocation14 + $0x28] ss:$16 sps:$4 sm:$0xff]  }
 0x2b3   :  { %5310 = vmatprep.subr.bf16.mxu1 %v8311_v15  ;;  %v8232_v15 = vld [vmem:[#allocation14 + $0x1cc] ss:$16 sps:$4 sm:$0xff]  }
 0x2b5   :  { %5270 = vmatpush2.bf16.msra.mxu0 %v8182_v27  ;;  %v8223_v27 = vld [vmem:[#allocation14 + $0x2c] ss:$16 sps:$4 sm:$0xff]  }
 0x2b6   :  { %5271 = vmatprep.subr.bf16.mxu0 %v8187_v55  ;;  %5311 = vmatpush2.bf16.msra.mxu1 %v8309_v12  ;;  %v8224_v55 = vld [vmem:[#allocation14 + $0x8] ss:$16 sps:$4 sm:$0xff]  }
 0x2b7   :  { %5312 = vmatprep.subr.bf16.mxu1 %v8317_v20  ;;  %v8227_v12 = vld [vmem:[#allocation14 + $0x1e8] ss:$16 sps:$4 sm:$0xff]   ;;  %v8238_v20 = vld [vmem:[#allocation14 + $0x18c] ss:$16 sps:$4 sm:$0xff]  }
 0x2b9   :  { %5272 = vmatpush2.bf16.msra.mxu0 %v8185_v11  ;;  %v8229_v11 = vld [vmem:[#allocation14 + $0x1ec] ss:$16 sps:$4 sm:$0xff]  }
 0x2ba   :  { %5273 = vmatprep.subr.bf16.mxu0 %v8190_v16  ;;  %5313 = vmatpush2.bf16.msra.mxu1 %v8315_v18  ;;  %v8230_v16 = vld [vmem:[#allocation14 + $0x1c8] ss:$16 sps:$4 sm:$0xff]  }
 0x2bb   :  { %5314 = vmatprep.subr.bf16.mxu1 %v8323_v34  ;;  %v8233_v18 = vld [vmem:[#allocation14 + $0x1a8] ss:$16 sps:$4 sm:$0xff]   ;;  %v8244_v34 = vld [vmem:[#allocation14 + $0x14c] ss:$16 sps:$4 sm:$0xff]  }
 0x2bd   :  { %5274 = vmatpush2.bf16.msra.mxu0 %v8188_v17  ;;  %v8235_v17 = vld [vmem:[#allocation14 + $0x1ac] ss:$16 sps:$4 sm:$0xff]  }
 0x2be   :  { %5275 = vmatprep.subr.bf16.mxu0 %v8193_v21  ;;  %5315 = vmatpush2.bf16.msra.mxu1 %v8321_v31  ;;  %v8236_v21 = vld [vmem:[#allocation14 + $0x188] ss:$16 sps:$4 sm:$0xff]  }
 0x2bf   :  { %5316 = vmatprep.subr.bf16.mxu1 %v8329_v48  ;;  %v8239_v31 = vld [vmem:[#allocation14 + $0x168] ss:$16 sps:$4 sm:$0xff]  }
 0x2c1   :  { %5276 = vmatpush2.bf16.msra.mxu0 %v8191_v22  ;;  %v8241_v22 = vld [vmem:[#allocation14 + $0x16c] ss:$16 sps:$4 sm:$0xff]  }
 0x2c2   :  { %5277 = vmatprep.subr.bf16.mxu0 %v8196_v35  ;;  %5317 = vmatpush2.bf16.msra.mxu1 %v8327_v25  ;;  %v8242_v35 = vld [vmem:[#allocation14 + $0x148] ss:$16 sps:$4 sm:$0xff]  }
 0x2c3   :  { %5318 = vmatprep.subr.bf16.mxu1 %v8335_v43  ;;  %v9119_v25 = vld [vmem:[#allocation8] sm:$0xf] }
 0x2c4   :  { %v193_v48 = vrot.slane %v9119_v25, %v9041_v36 }
 0x2c5   :  { %5278 = vmatpush2.bf16.msra.mxu0 %v8194_v24  ;;  %v8247_v24 = vld [vmem:[#allocation14 + $0x12c] ss:$16 sps:$4 sm:$0xff]  }
 0x2c6   :  { %5279 = vmatprep.subr.bf16.mxu0 %v8199_v38  ;;  %5319 = vmatpush2.bf16.msra.mxu1 %v8333_v56  ;;  %v8245_v38 = vld [vmem:[#allocation14 + $0x128] ss:$16 sps:$4 sm:$0xff]   ;;  %v292_v56 = vadd.f32 %v9044_v39, %v193_v48  ;;  %v8342_v48 = vld [vmem:[#allocation13 + $0x100] ss:$16 sps:$4 sm:$0xff]  }
 0x2c7   :  { %5320 = vmatprep.subr.bf16.mxu1 %v8341_v50 }
 0x2c8   :  { %v3971_v57 = vpop.f32.mrf.mxu0  ;;  %v4012_v59 = vpop.f32.mrf.mxu1 }
 0x2c9   :  { %v3972_v32 = vadd.f32 %v3971_v57, %v9094_v19  ;;  %5280 = vmatpush2.bf16.msra.mxu0 %v8197_v26  ;;  %v8203_v19 = vld [vmem:[#allocation14 + $0xe8] ss:$16 sps:$4 sm:$0xff]   ;;  %v8251_v26 = vld [vmem:[#allocation14 + $0x10c] ss:$16 sps:$4 sm:$0xff]  }
 0x2ca   :  { %v3973_v45 = vpop.f32.mrf.mxu0  ;;  %v4014_v47 = vpop.f32.mrf.mxu1  ;;  %5281 = vmatprep.subr.bf16.mxu0 %v8202_v44  ;;  %5321 = vmatpush2.bf16.msra.mxu1 %v8339_v14 }
 0x2cb   :  { %v9110_v58 = vadd.f32 %v4012_v59, %v3972_v32  ;;  %v3974_v13 = vadd.f32 %v3973_v45, %v9096_v30  ;;  %5322 = vmatprep.subr.bf16.mxu1 %v8347_v42  ;;  %v8206_v30 = vld [vmem:[#allocation14 + $0xc8] ss:$16 sps:$4 sm:$0xff]   ;;  %v366_v45 = vmax.f32 %v292_v56, 0.0  ;;  %v8278_v42 = vld [vmem:[#allocation13 + $0x64] ss:$16 sps:$4 sm:$0xff]  }
 0x2cc   :  { %v3975_v60 = vpop.f32.mrf.mxu0  ;;  %v4016_v61 = vpop.f32.mrf.mxu1  ;;  %v8249_v59 = vld [vmem:[#allocation14 + $0x108] ss:$16 sps:$4 sm:$0xff]   ;;  %v8350_v56 = vld [vmem:[#allocation13 + $0xec] ss:$16 sps:$4 sm:$0xff]  }
 0x2cd   :  { %v9113_v62 = vadd.f32 %v4014_v47, %v3974_v13  ;;  %5282 = vmatpush2.bf16.msra.mxu0 %v8200_v40  ;;  %v8252_v13 = vld [vmem:[#allocation13 + $0xe0] ss:$16 sps:$4 sm:$0xff]   ;;  %v8260_v60 = vld [vmem:[#allocation13 + $0xc4] ss:$16 sps:$4 sm:$0xff]  }
 0x2ce   :  { %v3976_v41 = vpop.f32.mrf.mxu0  ;;  %v4017_v3 = vpop.f32.mrf.mxu1  ;;  %5333 = vmatprep.subr.bf16.mxu0 %v8205_v49  ;;  %5323 = vmatpush2.bf16.msra.mxu1 %v8345_v52  ;;  %v8258_v61 = vld [vmem:[#allocation13 + $0xc0] ss:$16 sps:$4 sm:$0xff]  }
 0x2cf   :  { %5374 = vmatprep.subr.bf16.mxu1 %v8353_v4  ;;  %v8264_v41 = vld [vmem:[#allocation13 + $0xa0] ss:$16 sps:$4 sm:$0xff]   ;;  %v8272_v3 = vld [vmem:[#allocation13 + $0x84] ss:$16 sps:$4 sm:$0xff]  }
 0x2d0   :  { %5284 = vmatmul.mubr.bf16.vlgmr.msra.gmra.mxu0 %v9115_v63  ;;  %v8276_v52 = vld [vmem:[#allocation13 + $0x60] ss:$16 sps:$4 sm:$0xff]  }
 0x2d1   :  { %5334 = vmatpush1.bf16.msra.mxu0 %v8203_v19  ;;  %5365 = vmatprep.mubr.bf16.mxu0 %v9101_v0  ;;  %v8218_v0 = vld [vmem:[#allocation14 + $0x48] ss:$16 sps:$4 sm:$0xff]   ;;  %v8266_v19 = vld [vmem:[#allocation13 + $0xa4] ss:$16 sps:$4 sm:$0xff]   ;;  %v8288_v4 = vld [vmem:[#allocation13 + $0x20] ss:$16 sps:$4 sm:$0xff]  }
 0x2d2   :  { %5335 = vmatprep.subr.bf16.mxu0 %v8208_v1  ;;  %v8270_v1 = vld [vmem:[#allocation13 + $0x80] ss:$16 sps:$4 sm:$0xff]  }
 0x2d5   :  { %5336 = vmatpush1.bf16.msra.mxu0 %v8206_v30  ;;  %v8284_v30 = vld [vmem:[#allocation13 + $0x44] ss:$16 sps:$4 sm:$0xff]  }
 0x2d6   :  { %5337 = vmatprep.subr.bf16.mxu0 %v8211_v54  ;;  %v8290_v54 = vld [vmem:[#allocation13 + $0x24] ss:$16 sps:$4 sm:$0xff]  }
 0x2d9   :  { %5338 = vmatpush1.bf16.msra.mxu0 %v8209_v5  ;;  %v8296_v5 = vld [vmem:[#allocation13 + $0x4] ss:$16 sps:$4 sm:$0xff]  }
 0x2da   :  { %5339 = vmatprep.subr.bf16.mxu0 %v8214_v7  ;;  %v8294_v7 = vld [vmem:[#allocation13] ss:$16 sps:$4 sm:$0xff]  }
 0x2dd   :  { %5340 = vmatpush1.bf16.msra.mxu0 %v8212_v8  ;;  %v8302_v8 = vld [vmem:[#allocation13 + $0x1e4] ss:$16 sps:$4 sm:$0xff]  }
 0x2de   :  { %5341 = vmatprep.subr.bf16.mxu0 %v8217_v9  ;;  %v8300_v9 = vld [vmem:[#allocation13 + $0x1e0] ss:$16 sps:$4 sm:$0xff]  }
 0x2e1   :  { %5342 = vmatpush1.bf16.msra.mxu0 %v8215_v10  ;;  %v8308_v10 = vld [vmem:[#allocation13 + $0x1c4] ss:$16 sps:$4 sm:$0xff]  }
 0x2e2   :  { %5343 = vmatprep.subr.bf16.mxu0 %v8220_v37  ;;  %v8306_v37 = vld [vmem:[#allocation13 + $0x1c0] ss:$16 sps:$4 sm:$0xff]  }
 0x2e5   :  { %5344 = vmatpush1.bf16.msra.mxu0 %v8218_v0  ;;  %v8314_v0 = vld [vmem:[#allocation13 + $0x1a4] ss:$16 sps:$4 sm:$0xff]  }
 0x2e6   :  { %5345 = vmatprep.subr.bf16.mxu0 %v8223_v27  ;;  %v8312_v27 = vld [vmem:[#allocation13 + $0x1a0] ss:$16 sps:$4 sm:$0xff]  }
 0x2e9   :  { %5346 = vmatpush1.bf16.msra.mxu0 %v8221_v28  ;;  %v8320_v28 = vld [vmem:[#allocation13 + $0x184] ss:$16 sps:$4 sm:$0xff]  }
 0x2ea   :  { %5347 = vmatprep.subr.bf16.mxu0 %v8226_v53  ;;  %v8318_v53 = vld [vmem:[#allocation13 + $0x180] ss:$16 sps:$4 sm:$0xff]  }
 0x2ed   :  { %5348 = vmatpush1.bf16.msra.mxu0 %v8224_v55  ;;  %v8326_v55 = vld [vmem:[#allocation13 + $0x164] ss:$16 sps:$4 sm:$0xff]  }
 0x2ee   :  { %5349 = vmatprep.subr.bf16.mxu0 %v8229_v11  ;;  %v8324_v11 = vld [vmem:[#allocation13 + $0x160] ss:$16 sps:$4 sm:$0xff]  }
 0x2f1   :  { %5350 = vmatpush2.bf16.msra.mxu0 %v8227_v12  ;;  %v8332_v12 = vld [vmem:[#allocation13 + $0x144] ss:$16 sps:$4 sm:$0xff]  }
 0x2f2   :  { %5351 = vmatprep.subr.bf16.mxu0 %v8232_v15  ;;  %v8330_v15 = vld [vmem:[#allocation13 + $0x140] ss:$16 sps:$4 sm:$0xff]  }
 0x2f5   :  { %5352 = vmatpush2.bf16.msra.mxu0 %v8230_v16  ;;  %v189_v16 = vrot.slane %v9119_v25, %v9030_v29 }
 0x2f6   :  { %5353 = vmatprep.subr.bf16.mxu0 %v8235_v17  ;;  %v8338_v17 = vld [vmem:[#allocation13 + $0x124] ss:$16 sps:$4 sm:$0xff]  }
 0x2f9   :  { %5354 = vmatpush2.bf16.msra.mxu0 %v8233_v18 }
 0x2fa   :  { %5355 = vmatprep.subr.bf16.mxu0 %v8238_v20  ;;  %v8336_v20 = vld [vmem:[#allocation13 + $0x120] ss:$16 sps:$4 sm:$0xff]  }
 0x2fd   :  { %5356 = vmatpush2.bf16.msra.mxu0 %v8236_v21  ;;  %v290_v21 = vadd.f32 %v9027_v23, %v189_v16  ;;  %v8396_v16 = vld [vmem:[#allocation13 + $0x1e8] ss:$16 sps:$4 sm:$0xff]  }
 0x2fe   :  { %5357 = vmatprep.subr.bf16.mxu0 %v8241_v22  ;;  %v8344_v22 = vld [vmem:[#allocation13 + $0x104] ss:$16 sps:$4 sm:$0xff]  }
 0x2ff   :  { %v365_v25 = vmax.f32 %v290_v21, 0.0  ;;  %v8402_v21 = vld [vmem:[#allocation13 + $0x1c8] ss:$16 sps:$4 sm:$0xff]  }
 0x301   :  { %5358 = vmatpush2.bf16.msra.mxu0 %v8239_v31 }
 0x302   :  { %5359 = vmatprep.subr.bf16.mxu0 %v8244_v34 }
 0x305   :  { %5360 = vmatpush2.bf16.msra.mxu0 %v8242_v35 }
 0x306   :  { %5361 = vmatprep.subr.bf16.mxu0 %v8247_v24 }
 0x308   :  { %v4053_v43 = vpop.f32.mrf.mxu0  ;;  %v4094_v44 = vpop.f32.mrf.mxu1 }
 0x309   :  { %v4054_v57 = vadd.f32 %v4053_v43, %v9110_v58  ;;  %5362 = vmatpush2.bf16.msra.mxu0 %v8245_v38  ;;  %v9131_v58 = vpack.c.bf16 %v366_v45, %v366_v45 }
 0x30a   :  { %v9125_v32 = vpop.f32.mrf.mxu0  ;;  %v9127_v40 = vpop.f32.mrf.mxu1  ;;  %5363 = vmatprep.subr.bf16.mxu0 %v8251_v26 }
 0x30b   :  { %v9129_v47 = vadd.f32 %v4094_v44, %v4054_v57  ;;  %v4056_v18 = vadd.f32 %v9125_v32, %v9113_v62  ;;  %v9142_v32 = vpack.c.bf16 %v365_v25, %v365_v25  ;;  %v8411_v25 = vld [vmem:[#allocation14 + $0x3a8] ss:$16 sps:$4 sm:$0xff]  }
 0x30c   :  { %v4057_v49 = vpop.f32.mrf.mxu0  ;;  %v4098_v50 = vpop.f32.mrf.mxu1 }
 0x30d   :  { %5364 = vmatpush2.bf16.msra.mxu0 %v8249_v59  ;;  %v4097_v35 = vadd.f32 %v9127_v40, %v4056_v18  ;;  %v8348_v59 = vld [vmem:[#allocation13 + $0xe8] ss:$16 sps:$4 sm:$0xff]   ;;  %v8404_v18 = vld [vmem:[#allocation13 + $0x1cc] ss:$16 sps:$4 sm:$0xff]  }
 0x30e   :  { %v4058_v39 = vpop.f32.mrf.mxu0  ;;  %v4099_v14 = vpop.f32.mrf.mxu1  ;;  %6055 = vmatprep.subr.bf16.mxu0 %v8254_v33 }
 0x30f   :  { %v8354_v39 = vld [vmem:[#allocation13 + $0xc8] ss:$16 sps:$4 sm:$0xff]  }
 0x310   :  { %5366 = vmatmul.mubr.bf16.vlgmr.msra.gmra.mxu0 %v9115_v63  ;;  %v8282_v63 = vld [vmem:[#allocation13 + $0x40] ss:$16 sps:$4 sm:$0xff]  }
 0x311   :  { %6056 = vmatpush1.bf16.msra.mxu0 %v8252_v13  ;;  %6087 = vmatprep.mubr.bf16.mxu0 %v9131_v58  ;;  %v8351_v13 = vld [vmem:[#allocation14 + $0x2e8] ss:$16 sps:$4 sm:$0xff]  }
 0x312   :  { %6057 = vmatprep.subr.bf16.mxu0 %v8260_v60  ;;  %v8359_v60 = vld [vmem:[#allocation14 + $0x2cc] ss:$16 sps:$4 sm:$0xff]  }
 0x315   :  { %6058 = vmatpush1.bf16.msra.mxu0 %v8258_v61  ;;  %v8362_v61 = vld [vmem:[#allocation13 + $0xac] ss:$16 sps:$4 sm:$0xff]  }
 0x316   :  { %6059 = vmatprep.subr.bf16.mxu0 %v8266_v19  ;;  %v8357_v19 = vld [vmem:[#allocation14 + $0x2c8] ss:$16 sps:$4 sm:$0xff]  }
 0x319   :  { %6060 = vmatpush1.bf16.msra.mxu0 %v8264_v41  ;;  %v8360_v41 = vld [vmem:[#allocation13 + $0xa8] ss:$16 sps:$4 sm:$0xff]  }
 0x31a   :  { %6061 = vmatprep.subr.bf16.mxu0 %v8272_v3  ;;  %v8365_v3 = vld [vmem:[#allocation14 + $0x2ac] ss:$16 sps:$4 sm:$0xff]  }
 0x31d   :  { %6062 = vmatpush1.bf16.msra.mxu0 %v8270_v1  ;;  %v8368_v1 = vld [vmem:[#allocation13 + $0x8c] ss:$16 sps:$4 sm:$0xff]  }
 0x31e   :  { %6063 = vmatprep.subr.bf16.mxu0 %v8278_v42  ;;  %v8366_v42 = vld [vmem:[#allocation13 + $0x88] ss:$16 sps:$4 sm:$0xff]  }
 0x321   :  { %6064 = vmatpush1.bf16.msra.mxu0 %v8276_v52  ;;  %v8371_v52 = vld [vmem:[#allocation14 + $0x28c] ss:$16 sps:$4 sm:$0xff]  }
 0x322   :  { %6065 = vmatprep.subr.bf16.mxu0 %v8284_v30  ;;  %v8374_v30 = vld [vmem:[#allocation13 + $0x6c] ss:$16 sps:$4 sm:$0xff]  }
 0x325   :  { %6066 = vmatpush1.bf16.msra.mxu0 %v8282_v63  ;;  %v8369_v63 = vld [vmem:[#allocation14 + $0x288] ss:$16 sps:$4 sm:$0xff]  }
 0x326   :  { %6067 = vmatprep.subr.bf16.mxu0 %v8290_v54  ;;  %v8372_v54 = vld [vmem:[#allocation13 + $0x68] ss:$16 sps:$4 sm:$0xff]  }
 0x329   :  { %6068 = vmatpush1.bf16.msra.mxu0 %v8288_v4  ;;  %v8377_v4 = vld [vmem:[#allocation14 + $0x26c] ss:$16 sps:$4 sm:$0xff]  }
 0x32a   :  { %6069 = vmatprep.subr.bf16.mxu0 %v8296_v5  ;;  %v8380_v5 = vld [vmem:[#allocation13 + $0x4c] ss:$16 sps:$4 sm:$0xff]  }
 0x32d   :  { %6070 = vmatpush1.bf16.msra.mxu0 %v8294_v7  ;;  %v8375_v7 = vld [vmem:[#allocation14 + $0x268] ss:$16 sps:$4 sm:$0xff]  }
 0x32e   :  { %6071 = vmatprep.subr.bf16.mxu0 %v8302_v8  ;;  %v8378_v8 = vld [vmem:[#allocation13 + $0x48] ss:$16 sps:$4 sm:$0xff]  }
 0x331   :  { %6072 = vmatpush2.bf16.msra.mxu0 %v8300_v9  ;;  %v8383_v9 = vld [vmem:[#allocation14 + $0x24c] ss:$16 sps:$4 sm:$0xff]  }
 0x332   :  { %6073 = vmatprep.subr.bf16.mxu0 %v8308_v10  ;;  %v8386_v10 = vld [vmem:[#allocation13 + $0x2c] ss:$16 sps:$4 sm:$0xff]  }
 0x335   :  { %6074 = vmatpush2.bf16.msra.mxu0 %v8306_v37  ;;  %v8381_v37 = vld [vmem:[#allocation14 + $0x248] ss:$16 sps:$4 sm:$0xff]  }
 0x336   :  { %6075 = vmatprep.subr.bf16.mxu0 %v8314_v0  ;;  %v8384_v0 = vld [vmem:[#allocation13 + $0x28] ss:$16 sps:$4 sm:$0xff]  }
 0x339   :  { %6076 = vmatpush2.bf16.msra.mxu0 %v8312_v27  ;;  %v8389_v27 = vld [vmem:[#allocation14 + $0x22c] ss:$16 sps:$4 sm:$0xff]  }
 0x33a   :  { %6077 = vmatprep.subr.bf16.mxu0 %v8320_v28  ;;  %v8392_v28 = vld [vmem:[#allocation13 + $0xc] ss:$16 sps:$4 sm:$0xff]  }
 0x33d   :  { %6078 = vmatpush2.bf16.msra.mxu0 %v8318_v53  ;;  %v8387_v53 = vld [vmem:[#allocation14 + $0x228] ss:$16 sps:$4 sm:$0xff]  }
 0x33e   :  { %6079 = vmatprep.subr.bf16.mxu0 %v8326_v55  ;;  %v8390_v55 = vld [vmem:[#allocation13 + $0x8] ss:$16 sps:$4 sm:$0xff]  }
 0x341   :  { %6080 = vmatpush2.bf16.msra.mxu0 %v8324_v11  ;;  %v8395_v11 = vld [vmem:[#allocation14 + $0x20c] ss:$16 sps:$4 sm:$0xff]  }
 0x342   :  { %6081 = vmatprep.subr.bf16.mxu0 %v8332_v12  ;;  %v8398_v12 = vld [vmem:[#allocation13 + $0x1ec] ss:$16 sps:$4 sm:$0xff]  }
 0x345   :  { %6082 = vmatpush2.bf16.msra.mxu0 %v8330_v15  ;;  %v8393_v15 = vld [vmem:[#allocation14 + $0x208] ss:$16 sps:$4 sm:$0xff]  }
 0x346   :  { %6083 = vmatprep.subr.bf16.mxu0 %v8338_v17  ;;  %v8401_v17 = vld [vmem:[#allocation14 + $0x3ec] ss:$16 sps:$4 sm:$0xff]  }
 0x348   :  { %v4135_v31 = vpop.f32.mrf.mxu0  ;;  %v4176_v34 = vpop.f32.mrf.mxu1 }
 0x349   :  { %v4136_v24 = vadd.f32 %v4135_v31, %v9129_v47  ;;  %6084 = vmatpush2.bf16.msra.mxu0 %v8336_v20  ;;  %v8356_v47 = vld [vmem:[#allocation13 + $0xcc] ss:$16 sps:$4 sm:$0xff]   ;;  %v8399_v20 = vld [vmem:[#allocation14 + $0x3e8] ss:$16 sps:$4 sm:$0xff]  }
 0x34a   :  { %v4137_v38 = vpop.f32.mrf.mxu0  ;;  %v4178_v26 = vpop.f32.mrf.mxu1  ;;  %6085 = vmatprep.subr.bf16.mxu0 %v8344_v22  ;;  %v8407_v22 = vld [vmem:[#allocation14 + $0x3cc] ss:$16 sps:$4 sm:$0xff]  }
 0x34b   :  { %v4177_v62 = vadd.f32 %v4176_v34, %v4136_v24  ;;  %v4138_v43 = vadd.f32 %v4137_v38, %v4097_v35  ;;  %v8410_v31 = vld [vmem:[#allocation13 + $0x1ac] ss:$16 sps:$4 sm:$0xff]   ;;  %v8405_v34 = vld [vmem:[#allocation14 + $0x3c8] ss:$16 sps:$4 sm:$0xff]  }
 0x34c   :  { %v4139_v44 = vpop.f32.mrf.mxu0  ;;  %v4180_v57 = vpop.f32.mrf.mxu1  ;;  %v8408_v35 = vld [vmem:[#allocation13 + $0x1a8] ss:$16 sps:$4 sm:$0xff]   ;;  %v8413_v24 = vld [vmem:[#allocation14 + $0x3ac] ss:$16 sps:$4 sm:$0xff]  }
 0x34d   :  { %v4179_v23 = vadd.f32 %v4178_v26, %v4138_v43  ;;  %6086 = vmatpush2.bf16.msra.mxu0 %v8342_v48  ;;  %v4185_v33 = vmax.f32 %v4177_v62, 0.0  ;;  %v8416_v48 = vld [vmem:[#allocation13 + $0x18c] ss:$16 sps:$4 sm:$0xff]   ;;  %v8414_v38 = vld [vmem:[#allocation13 + $0x188] ss:$16 sps:$4 sm:$0xff]  }
 0x34e   :  { %v4140_v40 = vpop.f32.mrf.mxu0  ;;  %v4181_v45 = vpop.f32.mrf.mxu1  ;;  %6137 = vmatprep.subr.bf16.mxu0 %v8350_v56  ;;  %v8419_v26 = vld [vmem:[#allocation14 + $0x38c] ss:$16 sps:$4 sm:$0xff]   ;;  %v8417_v62 = vld [vmem:[#allocation14 + $0x388] ss:$16 sps:$4 sm:$0xff]  }
 0x34f   :  { %v4186_v49 = vmax.f32 %v4179_v23, 0.0  ;;  %v9146_v14 = vpack.c.bf16 %v4185_v33, %v4185_v33  ;;  %v8422_v56 = vld [vmem:[#allocation13 + $0x16c] ss:$16 sps:$4 sm:$0xff]   ;;  %v8420_v43 = vld [vmem:[#allocation13 + $0x168] ss:$16 sps:$4 sm:$0xff]  }
 0x350   :  { %6088 = vmatmul.mubr.bf16.vlgmr.msra.gmra.mxu0 %v9142_v32  ;;  %v8425_v44 = vld [vmem:[#allocation14 + $0x36c] ss:$16 sps:$4 sm:$0xff]   ;;  %v8423_v23 = vld [vmem:[#allocation14 + $0x368] ss:$16 sps:$4 sm:$0xff]  }
 0x351   :  { %v4482_v50 = vpack.c.bf16 %v4186_v49, %v4186_v49  ;;  %6138 = vmatpush1.bf16.msra.mxu0 %v8348_v59  ;;  %6169 = vmatprep.mubr.bf16.mxu0 %v9131_v58  ;;  %v8363_v58 = vld [vmem:[#allocation14 + $0x2a8] ss:$16 sps:$4 sm:$0xff]   ;;  %v8428_v57 = vld [vmem:[#allocation13 + $0x14c] ss:$16 sps:$4 sm:$0xff]  }
 0x352   :  { %6139 = vmatprep.subr.bf16.mxu0 %v8356_v47  ;;  %v8426_v59 = vld [vmem:[#allocation13 + $0x148] ss:$16 sps:$4 sm:$0xff]   ;;  %v8431_v33 = vld [vmem:[#allocation14 + $0x34c] ss:$16 sps:$4 sm:$0xff]  }
 0x353   :  { %5324 = vmatprep.mubr.bf16.mxu1 %v4482_v50  ;;  %v8434_v40 = vld [vmem:[#allocation13 + $0x12c] ss:$16 sps:$4 sm:$0xff]   ;;  %v8429_v45 = vld [vmem:[#allocation14 + $0x348] ss:$16 sps:$4 sm:$0xff]  }
 0x354   :  { %5325 = vmatmul.mubr.bf16.vlgmr.msra.gmra.mxu1 %v9146_v14  ;;  %v8432_v47 = vld [vmem:[#allocation13 + $0x128] ss:$16 sps:$4 sm:$0xff]   ;;  %v8437_v49 = vld [vmem:[#allocation14 + $0x32c] ss:$16 sps:$4 sm:$0xff]  }
 0x355   :  { %5375 = vmatpush1.bf16.msra.mxu1 %v8351_v13  ;;  %6140 = vmatpush1.bf16.msra.mxu0 %v8354_v39  ;;  %v9149_v13 = vpop.f32.mrf.mxu0  ;;  %v8435_v39 = vld [vmem:[#allocation14 + $0x328] ss:$16 sps:$4 sm:$0xff]  }
 0x356   :  { %5406 = vmatprep.mubr.bf16.mxu1 %v4482_v50  ;;  %5376 = vmatprep.subr.bf16.mxu1 %v8359_v60  ;;  %v8440_v50 = vld [vmem:[#allocation13 + $0x10c] ss:$16 sps:$4 sm:$0xff]   ;;  %v8438_v60 = vld [vmem:[#allocation13 + $0x108] ss:$16 sps:$4 sm:$0xff]  }
 0x357   :  { %6141 = vmatprep.subr.bf16.mxu0 %v8362_v61  ;;  %v8443_v61 = vld [vmem:[#allocation14 + $0x30c] ss:$16 sps:$4 sm:$0xff]  }
 0x359   :  { %5377 = vmatpush1.bf16.msra.mxu1 %v8357_v19  ;;  %6142 = vmatpush1.bf16.msra.mxu0 %v8360_v41  ;;  %v9151_v19 = vpop.f32.mrf.mxu0  ;;  %v8441_v41 = vld [vmem:[#allocation14 + $0x308] ss:$16 sps:$4 sm:$0xff]  }
 0x35a   :  { %5378 = vmatprep.subr.bf16.mxu1 %v8365_v3  ;;  %6143 = vmatprep.subr.bf16.mxu0 %v8368_v1  ;;  %v8446_v3 = vld [vmem:[#allocation13 + $0x2e4] ss:$16 sps:$4 sm:$0xff]   ;;  %v368_v1 = vmax.f32 %v9023_v6, 0.0 }
 0x35d   :  { %5379 = vmatpush1.bf16.msra.mxu1 %v8363_v58  ;;  %6144 = vmatpush1.bf16.msra.mxu0 %v8366_v42  ;;  %v8444_v42 = vld [vmem:[#allocation13 + $0x2e0] ss:$16 sps:$4 sm:$0xff]  }
 0x35e   :  { %5380 = vmatprep.subr.bf16.mxu1 %v8371_v52  ;;  %6145 = vmatprep.subr.bf16.mxu0 %v8374_v30  ;;  %v8449_v30 = vld [vmem:[#allocation13 + $0x2c4] ss:$16 sps:$4 sm:$0xff]  }
 0x361   :  { %5381 = vmatpush1.bf16.msra.mxu1 %v8369_v63  ;;  %6146 = vmatpush1.bf16.msra.mxu0 %v8372_v54  ;;  %v9159_v63 = vpack.c.bf16 %v368_v1, %v368_v1  ;;  %v6281_v1 = vld [vmem:[%s9402_s12 + $0xe0] sm:$0xff] }
 0x362   :  { %5382 = vmatprep.subr.bf16.mxu1 %v8377_v4  ;;  %6147 = vmatprep.subr.bf16.mxu0 %v8380_v5  ;;  %v8447_v4 = vld [vmem:[#allocation13 + $0x2c0] ss:$16 sps:$4 sm:$0xff]   ;;  %v8452_v5 = vld [vmem:[#allocation13 + $0x2a4] ss:$16 sps:$4 sm:$0xff]  }
 0x365   :  { %5383 = vmatpush1.bf16.msra.mxu1 %v8375_v7  ;;  %6148 = vmatpush1.bf16.msra.mxu0 %v8378_v8  ;;  %v8455_v7 = vld [vmem:[#allocation13 + $0x284] ss:$16 sps:$4 sm:$0xff]   ;;  %v8453_v8 = vld [vmem:[#allocation13 + $0x280] ss:$16 sps:$4 sm:$0xff]  }
 0x366   :  { %5384 = vmatprep.subr.bf16.mxu1 %v8383_v9  ;;  %6149 = vmatprep.subr.bf16.mxu0 %v8386_v10  ;;  %v8458_v9 = vld [vmem:[#allocation13 + $0x264] ss:$16 sps:$4 sm:$0xff]   ;;  %v8456_v10 = vld [vmem:[#allocation13 + $0x260] ss:$16 sps:$4 sm:$0xff]  }
 0x369   :  { %5385 = vmatpush1.bf16.msra.mxu1 %v8381_v37  ;;  %6150 = vmatpush1.bf16.msra.mxu0 %v8384_v0  ;;  %v8461_v37 = vld [vmem:[#allocation13 + $0x244] ss:$16 sps:$4 sm:$0xff]  }
 0x36a   :  { %5386 = vmatprep.subr.bf16.mxu1 %v8389_v27  ;;  %6151 = vmatprep.subr.bf16.mxu0 %v8392_v28  ;;  %v8464_v0 = vld [vmem:[#allocation13 + $0x224] ss:$16 sps:$4 sm:$0xff]   ;;  %v8462_v27 = vld [vmem:[#allocation13 + $0x220] ss:$16 sps:$4 sm:$0xff]  }
 0x36b   :  { %v8467_v28 = vld [vmem:[#allocation13 + $0x204] ss:$16 sps:$4 sm:$0xff]  }
 0x36d   :  { %5387 = vmatpush1.bf16.msra.mxu1 %v8387_v53  ;;  %6152 = vmatpush1.bf16.msra.mxu0 %v8390_v55  ;;  %v8465_v53 = vld [vmem:[#allocation13 + $0x200] ss:$16 sps:$4 sm:$0xff]   ;;  %v8470_v55 = vld [vmem:[#allocation13 + $0x3e4] ss:$16 sps:$4 sm:$0xff]  }
 0x36e   :  { %5388 = vmatprep.subr.bf16.mxu1 %v8395_v11  ;;  %6153 = vmatprep.subr.bf16.mxu0 %v8398_v12  ;;  %v8468_v11 = vld [vmem:[#allocation13 + $0x3e0] ss:$16 sps:$4 sm:$0xff]   ;;  %v8473_v12 = vld [vmem:[#allocation13 + $0x3c4] ss:$16 sps:$4 sm:$0xff]  }
 0x371   :  { %5389 = vmatpush1.bf16.msra.mxu1 %v8393_v15  ;;  %6154 = vmatpush2.bf16.msra.mxu0 %v8396_v16  ;;  %v8471_v15 = vld [vmem:[#allocation13 + $0x3c0] ss:$16 sps:$4 sm:$0xff]   ;;  %v8476_v16 = vld [vmem:[#allocation13 + $0x3a4] ss:$16 sps:$4 sm:$0xff]  }
 0x372   :  { %5390 = vmatprep.subr.bf16.mxu1 %v8401_v17  ;;  %6155 = vmatprep.subr.bf16.mxu0 %v8404_v18  ;;  %v8474_v17 = vld [vmem:[#allocation13 + $0x3a0] ss:$16 sps:$4 sm:$0xff]   ;;  %v8479_v18 = vld [vmem:[#allocation13 + $0x384] ss:$16 sps:$4 sm:$0xff]  }
 0x375   :  { %5391 = vmatpush2.bf16.msra.mxu1 %v8399_v20  ;;  %6156 = vmatpush2.bf16.msra.mxu0 %v8402_v21  ;;  %v8477_v20 = vld [vmem:[#allocation13 + $0x380] ss:$16 sps:$4 sm:$0xff]   ;;  %v8482_v21 = vld [vmem:[#allocation13 + $0x364] ss:$16 sps:$4 sm:$0xff]  }
 0x376   :  { %5392 = vmatprep.subr.bf16.mxu1 %v8407_v22  ;;  %6157 = vmatprep.subr.bf16.mxu0 %v8410_v31  ;;  %v8480_v22 = vld [vmem:[#allocation13 + $0x360] ss:$16 sps:$4 sm:$0xff]   ;;  %v8485_v31 = vld [vmem:[#allocation13 + $0x344] ss:$16 sps:$4 sm:$0xff]  }
 0x379   :  { %5393 = vmatpush2.bf16.msra.mxu1 %v8405_v34  ;;  %6158 = vmatpush2.bf16.msra.mxu0 %v8408_v35  ;;  %v8483_v34 = vld [vmem:[#allocation13 + $0x340] ss:$16 sps:$4 sm:$0xff]   ;;  %v8488_v35 = vld [vmem:[#allocation13 + $0x324] ss:$16 sps:$4 sm:$0xff]  }
 0x37a   :  { %5394 = vmatprep.subr.bf16.mxu1 %v8413_v24  ;;  %6159 = vmatprep.subr.bf16.mxu0 %v8416_v48  ;;  %v8486_v24 = vld [vmem:[#allocation13 + $0x320] ss:$16 sps:$4 sm:$0xff]   ;;  %v8491_v48 = vld [vmem:[#allocation13 + $0x304] ss:$16 sps:$4 sm:$0xff]  }
 0x37d   :  { %5395 = vmatpush2.bf16.msra.mxu1 %v8411_v25  ;;  %6160 = vmatpush2.bf16.msra.mxu0 %v8414_v38  ;;  %v8489_v25 = vld [vmem:[#allocation13 + $0x300] ss:$16 sps:$4 sm:$0xff]   ;;  %v367_v38 = vmax.f32 %v9021_v2, 0.0 }
 0x37e   :  { %5396 = vmatprep.subr.bf16.mxu1 %v8419_v26  ;;  %6161 = vmatprep.subr.bf16.mxu0 %v8422_v56  ;;  %v8494_v26 = vld [vmem:[#allocation13 + $0x2ec] ss:$16 sps:$4 sm:$0xff]  }
 0x381   :  { %5397 = vmatpush2.bf16.msra.mxu1 %v8417_v62  ;;  %6162 = vmatpush2.bf16.msra.mxu0 %v8420_v43  ;;  %v8492_v62 = vld [vmem:[#allocation13 + $0x2e8] ss:$16 sps:$4 sm:$0xff]   ;;  %v9166_v43 = vpack.c.bf16 %v367_v38, %v367_v38  ;;  %v8539_v38 = vld [vmem:[#allocation13 + $0x30c] ss:$16 sps:$4 sm:$0xff]  }
 0x382   :  { %5398 = vmatprep.subr.bf16.mxu1 %v8425_v44  ;;  %6163 = vmatprep.subr.bf16.mxu0 %v8428_v57  ;;  %v8497_v57 = vld [vmem:[#allocation13 + $0x2cc] ss:$16 sps:$4 sm:$0xff]  }
 0x385   :  { %5399 = vmatpush2.bf16.msra.mxu1 %v8423_v23  ;;  %6164 = vmatpush2.bf16.msra.mxu0 %v8426_v59  ;;  %v8495_v59 = vld [vmem:[#allocation13 + $0x2c8] ss:$16 sps:$4 sm:$0xff]  }
 0x386   :  { %5400 = vmatprep.subr.bf16.mxu1 %v8431_v33  ;;  %6165 = vmatprep.subr.bf16.mxu0 %v8434_v40  ;;  %v8500_v33 = vld [vmem:[#allocation13 + $0x2ac] ss:$16 sps:$4 sm:$0xff]   ;;  %v8498_v40 = vld [vmem:[#allocation13 + $0x2a8] ss:$16 sps:$4 sm:$0xff]  }
 0x389   :  { %5401 = vmatpush2.bf16.msra.mxu1 %v8429_v45  ;;  %6166 = vmatpush2.bf16.msra.mxu0 %v8432_v47  ;;  %v8503_v45 = vld [vmem:[#allocation13 + $0x28c] ss:$16 sps:$4 sm:$0xff]   ;;  %v6284_v47 = vld [vmem:[%s9402_s12 + $0xf8] sm:$0xff] }
 0x38a   :  { %5402 = vmatprep.subr.bf16.mxu1 %v8437_v49  ;;  %6167 = vmatprep.subr.bf16.mxu0 %v8440_v50  ;;  %v6268_v49 = vld [vmem:[%s9402_s12 + $0x78] sm:$0xff]  ;;  %v6283_v50 = vld [vmem:[%s9402_s12 + $0xf0] sm:$0xff] }
 0x38d   :  { %5403 = vmatpush2.bf16.msra.mxu1 %v8435_v39  ;;  %6168 = vmatpush2.bf16.msra.mxu0 %v8438_v60  ;;  %v6267_v39 = vld [vmem:[%s9402_s12 + $0x70] sm:$0xff]  ;;  %v6282_v60 = vld [vmem:[%s9402_s12 + $0xe8] sm:$0xff] }
 0x38e   :  { %5404 = vmatprep.subr.bf16.mxu1 %v8443_v61  ;;  %7283 = vmatprep.subr.mxu0 %v6284_v47  ;;  %v8501_v61 = vld [vmem:[#allocation13 + $0x288] ss:$16 sps:$4 sm:$0xff]  }
 0x390   :  { %v9154_v58 = vpop.f32.mrf.mxu0  ;;  %6170 = vmatmul.mubr.bf16.vlgmr.msra.gmra.mxu0 %v9142_v32  ;;  %v8450_v32 = vld [vmem:[#allocation13 + $0x2a0] ss:$16 sps:$4 sm:$0xff]  }
 0x391   :  { %5405 = vmatpush2.bf16.msra.mxu1 %v8441_v41  ;;  %7284 = vmatpush3.msra.mxu0 %v6268_v49  ;;  %v6266_v41 = vld [vmem:[%s9402_s12 + $0x68] sm:$0xff]  ;;  %v6273_v49 = vld [vmem:[%s9402_s12 + $0xa0] sm:$0xff] }
 0x392   :  { %v9157_v52 = vpop.f32.mrf.mxu0  ;;  %6096 = vmatprep.subr.bf16.mxu1 %v8446_v3  ;;  %7285 = vmatprep.subr.mxu0 %v6283_v50  ;;  %v8506_v3 = vld [vmem:[#allocation13 + $0x26c] ss:$16 sps:$4 sm:$0xff]  }
 0x393   :  { %7286 = vmatpush3.msra.mxu0 %v6267_v39 }
 0x394   :  { %v5289_v54 = vpop.f32.mrf.mxu0  ;;  %5407 = vmatmul.mubr.bf16.vlgmr.msra.gmra.mxu1 %v9146_v14  ;;  %v8459_v14 = vld [vmem:[#allocation13 + $0x240] ss:$16 sps:$4 sm:$0xff]   ;;  %7287 = vmatprep.subr.mxu0 %v6282_v60 }
 0x395   :  { %6097 = vmatpush1.bf16.msra.mxu1 %v8444_v42  ;;  %6128 = vmatprep.mubr.bf16.mxu1 %v9159_v63  ;;  %v6265_v42 = vld [vmem:[%s9402_s12 + $0x60] sm:$0xff]  ;;  %v6264_v54 = vld [vmem:[%s9402_s12 + $0x58] sm:$0xff] }
 0x396   :  { %v5290_v6 = vpop.f32.mrf.mxu0  ;;  %6098 = vmatprep.subr.bf16.mxu1 %v8449_v30  ;;  %7288 = vmatpush3.msra.mxu0 %v6266_v41  ;;  %v6280_v30 = vld [vmem:[%s9402_s12 + $0xd8] sm:$0xff] }
 0x397   :  { %7289 = vmatprep.subr.mxu0 %v6281_v1  ;;  %v6279_v6 = vld [vmem:[%s9402_s12 + $0xd0] sm:$0xff] }
 0x398   :  { %7290 = vmatpush3.msra.mxu0 %v6265_v42 }
 0x399   :  { %6099 = vmatpush1.bf16.msra.mxu1 %v8447_v4  ;;  %v8509_v4 = vld [vmem:[#allocation13 + $0x24c] ss:$16 sps:$4 sm:$0xff]   ;;  %7291 = vmatprep.subr.mxu0 %v6280_v30 }
 0x39a   :  { %6100 = vmatprep.subr.bf16.mxu1 %v8452_v5  ;;  %v6263_v5 = vld [vmem:[%s9402_s12 + $0x50] sm:$0xff]  ;;  %7292 = vmatpush3.msra.mxu0 %v6264_v54  ;;  %v6254_v54 = vld [vmem:[%s9402_s12 + $0x8] sm:$0xff] }
 0x39b   :  { %7293 = vmatprep.subr.mxu0 %v6279_v6  ;;  %v6255_v30 = vld [vmem:[%s9402_s12 + $0x10] sm:$0xff]  ;;  %v6253_v6 = vld [vmem:[%s9402_s12] sm:$0xff] }
 0x39c   :  { %7294 = vmatpush3.msra.mxu0 %v6263_v5  ;;  %v6316_v5 = vld [vmem:[%s9402_s12 + $0x1f8] sm:$0xff] }
 0x39d   :  { %6101 = vmatpush1.bf16.msra.mxu1 %v8450_v32  ;;  %v6278_v32 = vld [vmem:[%s9402_s12 + $0xc8] sm:$0xff] }
 0x39e   :  { %6102 = vmatprep.subr.bf16.mxu1 %v8455_v7  ;;  %v8507_v7 = vld [vmem:[#allocation13 + $0x248] ss:$16 sps:$4 sm:$0xff]   ;;  %7295 = vmatprep.subr.mxu0 %v6278_v32  ;;  %v6300_v32 = vld [vmem:[%s9402_s12 + $0x178] sm:$0xff] }
 0x3a1   :  { %6103 = vmatpush1.bf16.msra.mxu1 %v8453_v8  ;;  %v6262_v8 = vld [vmem:[%s9402_s12 + $0x48] sm:$0xff] }
 0x3a2   :  { %6104 = vmatprep.subr.bf16.mxu1 %v8458_v9  ;;  %v8512_v9 = vld [vmem:[#allocation13 + $0x22c] ss:$16 sps:$4 sm:$0xff]   ;;  %7296 = vmatpush3.msra.mxu0 %v6262_v8 }
 0x3a3   :  { %v6299_v8 = vld [vmem:[%s9402_s12 + $0x170] sm:$0xff] }
 0x3a5   :  { %6105 = vmatpush1.bf16.msra.mxu1 %v8456_v10  ;;  %v6277_v10 = vld [vmem:[%s9402_s12 + $0xc0] sm:$0xff] }
 0x3a6   :  { %6106 = vmatprep.subr.bf16.mxu1 %v8461_v37  ;;  %v6261_v37 = vld [vmem:[%s9402_s12 + $0x40] sm:$0xff]  ;;  %7297 = vmatprep.subr.mxu0 %v6277_v10  ;;  %v6298_v10 = vld [vmem:[%s9402_s12 + $0x168] sm:$0xff] }
 0x3a7   :  { %7298 = vmatpush3.msra.mxu0 %v6261_v37  ;;  %v6313_v37 = vld [vmem:[%s9402_s12 + $0x1e0] sm:$0xff] }
 0x3a9   :  { %6107 = vmatpush1.bf16.msra.mxu1 %v8459_v14  ;;  %v6276_v14 = vld [vmem:[%s9402_s12 + $0xb8] sm:$0xff] }
 0x3aa   :  { %6108 = vmatprep.subr.bf16.mxu1 %v8464_v0  ;;  %v8510_v0 = vld [vmem:[#allocation13 + $0x228] ss:$16 sps:$4 sm:$0xff]   ;;  %7299 = vmatprep.subr.mxu0 %v6276_v14 }
 0x3ab   :  { %v6297_v14 = vld [vmem:[%s9402_s12 + $0x160] sm:$0xff] }
 0x3ad   :  { %6109 = vmatpush1.bf16.msra.mxu1 %v8462_v27  ;;  %v6260_v27 = vld [vmem:[%s9402_s12 + $0x38] sm:$0xff] }
 0x3ae   :  { %6110 = vmatprep.subr.bf16.mxu1 %v8467_v28  ;;  %v8515_v28 = vld [vmem:[#allocation13 + $0x20c] ss:$16 sps:$4 sm:$0xff]   ;;  %7300 = vmatpush3.msra.mxu0 %v6260_v27  ;;  %v6296_v27 = vld [vmem:[%s9402_s12 + $0x158] sm:$0xff] }
 0x3b1   :  { %6111 = vmatpush1.bf16.msra.mxu1 %v8465_v53  ;;  %v6275_v53 = vld [vmem:[%s9402_s12 + $0xb0] sm:$0xff] }
 0x3b2   :  { %6112 = vmatprep.subr.bf16.mxu1 %v8470_v55  ;;  %v6259_v55 = vld [vmem:[%s9402_s12 + $0x30] sm:$0xff]  ;;  %7301 = vmatprep.subr.mxu0 %v6275_v53 }
 0x3b3   :  { %7302 = vmatpush3.msra.mxu0 %v6259_v55  ;;  %v6295_v53 = vld [vmem:[%s9402_s12 + $0x150] sm:$0xff]  ;;  %v6310_v55 = vld [vmem:[%s9402_s12 + $0x1c8] sm:$0xff] }
 0x3b5   :  { %6113 = vmatpush2.bf16.msra.mxu1 %v8468_v11  ;;  %v8513_v11 = vld [vmem:[#allocation13 + $0x208] ss:$16 sps:$4 sm:$0xff]  }
 0x3b6   :  { %6114 = vmatprep.subr.bf16.mxu1 %v8473_v12  ;;  %v8518_v12 = vld [vmem:[#allocation13 + $0x3ec] ss:$16 sps:$4 sm:$0xff]  }
 0x3b9   :  { %6115 = vmatpush2.bf16.msra.mxu1 %v8471_v15  ;;  %v8516_v15 = vld [vmem:[#allocation13 + $0x3e8] ss:$16 sps:$4 sm:$0xff]  }
 0x3ba   :  { %6116 = vmatprep.subr.bf16.mxu1 %v8476_v16  ;;  %v8521_v16 = vld [vmem:[#allocation13 + $0x3cc] ss:$16 sps:$4 sm:$0xff]  }
 0x3bd   :  { %6117 = vmatpush2.bf16.msra.mxu1 %v8474_v17  ;;  %v8519_v17 = vld [vmem:[#allocation13 + $0x3c8] ss:$16 sps:$4 sm:$0xff]  }
 0x3be   :  { %6118 = vmatprep.subr.bf16.mxu1 %v8479_v18  ;;  %v8524_v18 = vld [vmem:[#allocation13 + $0x3ac] ss:$16 sps:$4 sm:$0xff]  }
 0x3c1   :  { %6119 = vmatpush2.bf16.msra.mxu1 %v8477_v20  ;;  %v8522_v20 = vld [vmem:[#allocation13 + $0x3a8] ss:$16 sps:$4 sm:$0xff]  }
 0x3c2   :  { %6120 = vmatprep.subr.bf16.mxu1 %v8482_v21  ;;  %v8527_v21 = vld [vmem:[#allocation13 + $0x38c] ss:$16 sps:$4 sm:$0xff]  }
 0x3c5   :  { %6121 = vmatpush2.bf16.msra.mxu1 %v8480_v22  ;;  %v8525_v22 = vld [vmem:[#allocation13 + $0x388] ss:$16 sps:$4 sm:$0xff]  }
 0x3c6   :  { %6122 = vmatprep.subr.bf16.mxu1 %v8485_v31  ;;  %v8530_v31 = vld [vmem:[#allocation13 + $0x36c] ss:$16 sps:$4 sm:$0xff]  }
 0x3c9   :  { %6123 = vmatpush2.bf16.msra.mxu1 %v8483_v34  ;;  %v8528_v34 = vld [vmem:[#allocation13 + $0x368] ss:$16 sps:$4 sm:$0xff]  }
 0x3ca   :  { %6124 = vmatprep.subr.bf16.mxu1 %v8488_v35  ;;  %v8533_v35 = vld [vmem:[#allocation13 + $0x34c] ss:$16 sps:$4 sm:$0xff]  }
 0x3cd   :  { %6125 = vmatpush2.bf16.msra.mxu1 %v8486_v24  ;;  %v8531_v24 = vld [vmem:[#allocation13 + $0x348] ss:$16 sps:$4 sm:$0xff]  }
 0x3ce   :  { %6126 = vmatprep.subr.bf16.mxu1 %v8491_v48  ;;  %v8536_v48 = vld [vmem:[#allocation13 + $0x32c] ss:$16 sps:$4 sm:$0xff]  }
 0x3d0   :  { %v9164_v56 = vpop.f32.mrf.mxu0 }
 0x3d1   :  { %6127 = vmatpush2.bf16.msra.mxu1 %v8489_v25  ;;  %v8534_v25 = vld [vmem:[#allocation13 + $0x328] ss:$16 sps:$4 sm:$0xff]  }
 0x3d2   :  { %v9168_v44 = vpop.f32.mrf.mxu0  ;;  %6178 = vmatprep.subr.bf16.mxu1 %v8494_v26  ;;  %v8537_v26 = vld [vmem:[#allocation13 + $0x308] ss:$16 sps:$4 sm:$0xff]  }
 0x3d4   :  { %v5371_v23 = vpop.f32.mrf.mxu0  ;;  %6129 = vmatmul.mubr.bf16.vlgmr.msra.gmra.mxu1 %v9166_v43 }
 0x3d5   :  { %6179 = vmatpush1.bf16.msra.mxu1 %v8492_v62  ;;  %6210 = vmatprep.mubr.bf16.mxu1 %v9159_v63  ;;  %v8504_v63 = vld [vmem:[#allocation13 + $0x268] ss:$16 sps:$4 sm:$0xff]   ;;  %v9232_v62 = vpop.f32.mrf.mxu1 }
 0x3d6   :  { %v5372_v2 = vpop.f32.mrf.mxu0  ;;  %6180 = vmatprep.subr.bf16.mxu1 %v8497_v57 }
 0x3d7   :  { %v9234_v23 = vpop.f32.mrf.mxu1  ;;  %v6274_v2 = vld [vmem:[%s9402_s12 + $0xa8] sm:$0xff] }
 0x3d8   :  { %7303 = vmatprep.subr.mxu0 %v6274_v2 }
 0x3d9   :  { %6181 = vmatpush1.bf16.msra.mxu1 %v8495_v59 }
 0x3da   :  { %6182 = vmatprep.subr.bf16.mxu1 %v8500_v33 }
 0x3dd   :  { %6183 = vmatpush1.bf16.msra.mxu1 %v8498_v40 }
 0x3de   :  { %6184 = vmatprep.subr.bf16.mxu1 %v8503_v45  ;;  %v6258_v45 = vld [vmem:[%s9402_s12 + $0x28] sm:$0xff] }
 0x3df   :  { %7304 = vmatpush3.msra.mxu0 %v6258_v45 }
 0x3e0   :  { %7305 = vmatprep.subr.mxu0 %v6273_v49 }
 0x3e1   :  { %6185 = vmatpush1.bf16.msra.mxu1 %v8501_v61 }
 0x3e2   :  { %6186 = vmatprep.subr.bf16.mxu1 %v8506_v3  ;;  %v6256_v3 = vld [vmem:[%s9402_s12 + $0x18] sm:$0xff] }
 0x3e5   :  { %6187 = vmatpush1.bf16.msra.mxu1 %v8504_v63  ;;  %v6270_v63 = vld [vmem:[%s9402_s12 + $0x88] sm:$0xff] }
 0x3e6   :  { %6188 = vmatprep.subr.bf16.mxu1 %v8509_v4  ;;  %v6269_v4 = vld [vmem:[%s9402_s12 + $0x80] sm:$0xff] }
 0x3e9   :  { %6189 = vmatpush1.bf16.msra.mxu1 %v8507_v7  ;;  %v6315_v7 = vld [vmem:[%s9402_s12 + $0x1f0] sm:$0xff] }
 0x3ea   :  { %6190 = vmatprep.subr.bf16.mxu1 %v8512_v9  ;;  %v6314_v9 = vld [vmem:[%s9402_s12 + $0x1e8] sm:$0xff] }
 0x3ed   :  { %6191 = vmatpush1.bf16.msra.mxu1 %v8510_v0  ;;  %v6312_v0 = vld [vmem:[%s9402_s12 + $0x1d8] sm:$0xff] }
 0x3ee   :  { %6192 = vmatprep.subr.bf16.mxu1 %v8515_v28  ;;  %v6311_v28 = vld [vmem:[%s9402_s12 + $0x1d0] sm:$0xff] }
 0x3f1   :  { %6193 = vmatpush1.bf16.msra.mxu1 %v8513_v11  ;;  %v6294_v11 = vld [vmem:[%s9402_s12 + $0x148] sm:$0xff] }
 0x3f2   :  { %6194 = vmatprep.subr.bf16.mxu1 %v8518_v12  ;;  %v6309_v12 = vld [vmem:[%s9402_s12 + $0x1c0] sm:$0xff] }
 0x3f5   :  { %6195 = vmatpush2.bf16.msra.mxu1 %v8516_v15  ;;  %v6293_v15 = vld [vmem:[%s9402_s12 + $0x140] sm:$0xff] }
 0x3f6   :  { %6196 = vmatprep.subr.bf16.mxu1 %v8521_v16  ;;  %v6308_v16 = vld [vmem:[%s9402_s12 + $0x1b8] sm:$0xff] }
 0x3f9   :  { %6197 = vmatpush2.bf16.msra.mxu1 %v8519_v17  ;;  %v6292_v17 = vld [vmem:[%s9402_s12 + $0x138] sm:$0xff] }
 0x3fa   :  { %6198 = vmatprep.subr.bf16.mxu1 %v8524_v18  ;;  %v6307_v18 = vld [vmem:[%s9402_s12 + $0x1b0] sm:$0xff] }
 0x3fd   :  { %6199 = vmatpush2.bf16.msra.mxu1 %v8522_v20  ;;  %v6291_v20 = vld [vmem:[%s9402_s12 + $0x130] sm:$0xff] }
 0x3fe   :  { %6200 = vmatprep.subr.bf16.mxu1 %v8527_v21 }
 0x401   :  { %6201 = vmatpush2.bf16.msra.mxu1 %v8525_v22 }
 0x402   :  { %6202 = vmatprep.subr.bf16.mxu1 %v8530_v31  ;;  %v6306_v31 = vld [vmem:[%s9402_s12 + $0x1a8] sm:$0xff] }
 0x405   :  { %6203 = vmatpush2.bf16.msra.mxu1 %v8528_v34 }
 0x406   :  { %6204 = vmatprep.subr.bf16.mxu1 %v8533_v35 }
 0x409   :  { %6205 = vmatpush2.bf16.msra.mxu1 %v8531_v24  ;;  %v6290_v24 = vld [vmem:[%s9402_s12 + $0x128] sm:$0xff] }
 0x40a   :  { %6206 = vmatprep.subr.bf16.mxu1 %v8536_v48 }
 0x40d   :  { %6207 = vmatpush2.bf16.msra.mxu1 %v8534_v25  ;;  %v6305_v25 = vld [vmem:[%s9402_s12 + $0x1a0] sm:$0xff] }
 0x40e   :  { %6208 = vmatprep.subr.bf16.mxu1 %v8539_v38 }
 0x410   :  { %v6089_v57 = vpop.f32.mrf.mxu0 }
 0x411   :  { %6209 = vmatpush2.bf16.msra.mxu1 %v8537_v26 }
 0x412   :  { %v6091_v59 = vpop.f32.mrf.mxu0  ;;  %7318 = vmatprep.subr.mxu1 %v6316_v5 }
 0x414   :  { %v6093_v33 = vpop.f32.mrf.mxu0  ;;  %6211 = vmatmul.mubr.bf16.vlgmr.msra.gmra.mxu1 %v9166_v43  ;;  %v5326_v40 = vpop.f32.mrf.mxu1  ;;  %v6257_v43 = vld [vmem:[%s9402_s12 + $0x20] sm:$0xff] }
 0x415   :  { %v5327_v47 = vadd.f32 %v5326_v40, %v9154_v58  ;;  %7306 = vmatpush3.msra.mxu0 %v6257_v43  ;;  %v6272_v58 = vld [vmem:[%s9402_s12 + $0x98] sm:$0xff]  ;;  %7319 = vmatpush3.msra.mxu1 %v6300_v32  ;;  %v6301_v43 = vld [vmem:[%s9402_s12 + $0x180] sm:$0xff] }
 0x416   :  { %v6094_v50 = vpop.f32.mrf.mxu0  ;;  %v5328_v39 = vpop.f32.mrf.mxu1  ;;  %7307 = vmatprep.subr.mxu0 %v6272_v58  ;;  %7320 = vmatprep.subr.mxu1 %v6315_v7  ;;  %v6288_v40 = vld [vmem:[%s9402_s12 + $0x118] sm:$0xff]  ;;  %v6223_v58 = vld [vmem:[#allocation17] sm:$0xf] }
 0x417   :  { %v5329_v60 = vadd.f32 %v5328_v39, %v9157_v52  ;;  %v9251_v61 = vadd.f32 %v6089_v57, %v5327_v47  ;;  %7308 = vmatpush3.msra.mxu0 %v6256_v3  ;;  %v6271_v52 = vld [vmem:[%s9402_s12 + $0x90] sm:$0xff]  ;;  %7321 = vmatpush3.msra.mxu1 %v6299_v8  ;;  %v6289_v57 = vld [vmem:[%s9402_s12 + $0x120] sm:$0xff]  ;;  %v6302_v50 = vld [vmem:[%s9402_s12 + $0x188] sm:$0xff] }
 0x418   :  { %v5330_v41 = vpop.f32.mrf.mxu1  ;;  %7309 = vmatprep.subr.mxu0 %v6271_v52  ;;  %7322 = vmatprep.subr.mxu1 %v6314_v9  ;;  %v6303_v47 = vld [vmem:[%s9402_s12 + $0x190] sm:$0xff]  ;;  %v6286_v39 = vld [vmem:[%s9402_s12 + $0x108] sm:$0xff]  ;;  %v6228_v52 = vrot.slane %v6223_v58, %v9030_v29  ;;  %v6236_v29 = vrot.slane %v6223_v58, %v8992_v46 }
 0x419   :  { %v9259_v1 = vadd.f32 %v6091_v59, %v5329_v60  ;;  %7310 = vmatpush3.msra.mxu0 %v6255_v30  ;;  %7323 = vmatpush3.msra.mxu1 %v6298_v10  ;;  %v6285_v60 = vld [vmem:[%s9402_s12 + $0x100] sm:$0xff]  ;;  %v7282_v46 = vld [vmem:[#allocation19] ss:$0 sm:$0xff] }
 0x41a   :  { %v5331_v42 = vpop.f32.mrf.mxu1  ;;  %7311 = vmatprep.subr.mxu0 %v6270_v63  ;;  %7324 = vmatprep.subr.mxu1 %v6313_v37 }
 0x41b   :  { %7312 = vmatpush3.msra.mxu0 %v6254_v54  ;;  %7325 = vmatpush3.msra.mxu1 %v6297_v14  ;;  %v6232_v54 = vrot.slane %v6223_v58, %v9041_v36  ;;  %v6240_v36 = vrot.slane %v6223_v58, %v8995_v51 }
 0x41c   :  { %7313 = vmatprep.subr.mxu0 %v6269_v4  ;;  %7326 = vmatprep.subr.mxu1 %v6312_v0 }
 0x41d   :  { %7314 = vmatpush3.msra.mxu0 %v6253_v6  ;;  %7327 = vmatpush3.msra.mxu1 %v6296_v27 }
 0x41e   :  { %7328 = vmatprep.subr.mxu1 %v6311_v28 }
 0x41f   :  { %7329 = vmatpush3.msra.mxu1 %v6295_v53 }
 0x420   :  { %7330 = vmatprep.subr.mxu1 %v6310_v55 }
 0x421   :  { %7331 = vmatpush3.msra.mxu1 %v6294_v11 }
 0x422   :  { %7332 = vmatprep.subr.mxu1 %v6309_v12 }
 0x423   :  { %7333 = vmatpush3.msra.mxu1 %v6293_v15 }
 0x424   :  { %7334 = vmatprep.subr.mxu1 %v6308_v16 }
 0x425   :  { %7335 = vmatpush3.msra.mxu1 %v6292_v17 }
 0x426   :  { %7336 = vmatprep.subr.mxu1 %v6307_v18 }
 0x427   :  { %7337 = vmatpush3.msra.mxu1 %v6291_v20 }
 0x428   :  { %7338 = vmatprep.subr.mxu1 %v6306_v31 }
 0x429   :  { %7339 = vmatpush3.msra.mxu1 %v6290_v24 }
 0x42a   :  { %7340 = vmatprep.subr.mxu1 %v6305_v25 }
 0x42b   :  { %7341 = vmatpush3.msra.mxu1 %v6289_v57 }
 0x450   :  { %v6171_v21 = vpop.f32.mrf.mxu0 }
 0x452   :  { %v6173_v22 = vpop.f32.mrf.mxu0 }
 0x454   :  { %v5408_v34 = vpop.f32.mrf.mxu1  ;;  %v6175_v35 = vpop.f32.mrf.mxu0 }
 0x455   :  { %v5409_v48 = vadd.f32 %v5408_v34, %v9164_v56  ;;  %v6304_v56 = vld [vmem:[%s9402_s12 + $0x198] sm:$0xff] }
 0x456   :  { %v5410_v38 = vpop.f32.mrf.mxu1  ;;  %v6176_v26 = vpop.f32.mrf.mxu0  ;;  %7342 = vmatprep.subr.mxu1 %v6304_v56 }
 0x457   :  { %v5411_v59 = vadd.f32 %v5410_v38, %v9168_v44  ;;  %v6172_v2 = vadd.f32 %v6171_v21, %v5409_v48  ;;  %7343 = vmatpush3.msra.mxu1 %v6288_v40  ;;  %v6287_v44 = vld [vmem:[%s9402_s12 + $0x110] sm:$0xff]  ;;  %s8810_s12 = smov [#allocation20]  }
 0x458   :  { %v5412_v33 = vpop.f32.mrf.mxu1  ;;  %7344 = vmatprep.subr.mxu1 %v6303_v47  ;;  %s6472_s7 = sshll.u32 %s8810_s12, 4  ;;  %s6473_s7 = int_to_ptr.vmem [resolvable:$true] %s6472_s7 }
 0x459   :  { %v6174_v45 = vadd.f32 %v6173_v22, %v5411_v59  ;;  %7345 = vmatpush3.msra.mxu1 %v6287_v44  ;;  %s8762_s19 = scalar_lea.vmem %s6473_s7, 128  ;;  %p8767_p0 = scmp.lt.s32.totalorder %s6473_s7, %s6473_s7 }
 0x45a   :  { %v5413_v49 = vpop.f32.mrf.mxu1  ;;  %7346 = vmatprep.subr.mxu1 %v6302_v50  ;;  %p8763_p13 = scmp.ne.s32.totalorder %s6473_s7, %s8762_s19  ;;  %p8768_p1 = scmp.lt.s32.totalorder %s8762_s19, %s8762_s19 }
 0x45b   :  { %7347 = vmatpush3.msra.mxu1 %v6286_v39 }
 0x45c   :  { %7348 = vmatprep.subr.mxu1 %v6301_v43  ;;  %p8769_p2 = por %p8768_p1, %p8767_p0 }
 0x45d   :  { %7349 = vmatpush3.msra.mxu1 %v6285_v60 }
 0x45e   :  { %p8770_p3 = pnand %p8769_p2, %p8763_p13 }
 0x494   :  { %v6130_v41 = vpop.f32.mrf.mxu1 }
 0x495   :  { %v6131_v3 = vadd.f32 %v6130_v41, %v9251_v61 }
 0x496   :  { %v6132_v42 = vpop.f32.mrf.mxu1 }
 0x497   :  { %v6219_v30 = vadd.f32 %v6131_v3, %v9149_v13  ;;  %v6133_v63 = vadd.f32 %v6132_v42, %v9259_v1 }
 0x498   :  { %v6134_v4 = vpop.f32.mrf.mxu1 }
 0x499   :  { %v6220_v6 = vadd.f32 %v6133_v63, %v9151_v19  ;;  %v6245_v5 = vadd.f32 %v6228_v52, %v6219_v30 }
 0x49a   :  { %v6135_v32 = vpop.f32.mrf.mxu1 }
 0x49b   :  { %v6246_v7 = vadd.f32 %v6232_v54, %v6220_v6  ;;  %v6249_v9 = vmax.f32 %v6245_v5, 0.0 }
 0x49d   :  { %v6250_v8 = vmax.f32 %v6246_v7, 0.0 }
 0x49f   :  { %6388 = vmatprep.mubr.f32.mxu0 %v6250_v8 }
 0x4a0   :  { %6389 = vmatmul.mubr.f32.vlgmr.msra.gmra.mxu0 %v6249_v9 }
 0x4d4   :  { %v6212_v61 = vpop.f32.mrf.mxu1 }
 0x4d5   :  { %v6213_v10 = vadd.f32 %v6212_v61, %v6172_v2 }
 0x4d6   :  { %v6214_v37 = vpop.f32.mrf.mxu1 }
 0x4d7   :  { %v6221_v13 = vadd.f32 %v6213_v10, %v9232_v62  ;;  %v6215_v1 = vadd.f32 %v6214_v37, %v6174_v45 }
 0x4d8   :  { %v6216_v14 = vpop.f32.mrf.mxu1 }
 0x4d9   :  { %v6222_v19 = vadd.f32 %v6215_v1, %v9234_v23  ;;  %v6247_v0 = vadd.f32 %v6236_v29, %v6221_v13 }
 0x4da   :  { %v6217_v27 = vpop.f32.mrf.mxu1 }
 0x4db   :  { %v6248_v28 = vadd.f32 %v6240_v36, %v6222_v19  ;;  %v6251_v55 = vmax.f32 %v6247_v0, 0.0 }
 0x4dd   :  { %v6252_v53 = vmax.f32 %v6248_v28, 0.0 }
 0x4df   :  { %6458 = vmatprep.mubr.f32.mxu1 %v6252_v53 }
 0x4e0   :  { %6459 = vmatmul.mubr.f32.vlgmr.msra.gmra.mxu1 %v6251_v55 }
 0x560   :  { %v7315_v11 = vpop.f32.mrf.mxu0 }
 0x562   :  { %v7316_v12 = vpop.f32.mrf.mxu0 }
 0x563   :  { %v7317_v15 = vadd.f32 %v7316_v12, %v7315_v11 }
 0x565   :  { %v6391_v62 = vadd.f32 %v7317_v15, %v7282_v46 }
 0x5a0   :  { %v7350_v16 = vpop.f32.mrf.mxu1 }
 0x5a2   :  { %v7351_v17 = vpop.f32.mrf.mxu1 }
 0x5a3   :  { %v7352_v51 = vadd.f32 %v7351_v17, %v7350_v16 }
 0x5a5   :  { %v6461_v18 = vadd.f32 %v7352_v51, %v6391_v62 }
 0x5a7   :  { %6465 = vst.msk [vmem:[#allocation20] sm:$0xff] %vm6464_vm2, %v6461_v18 }
 0x5a8   :  { %8773 = shalt.err (!%p8770_p3)
}
 0x5a9   :  { %6475 = dma.vmem_to_hbm [thread:$0]  %s6473_s7, 128, %s9404_s14, [#allocation4]  }
 0x5aa   :  { %8794 = dma.done.wait [#allocation4], 128  }
 0x5ab   :  { %8795 = vsyncadd [#allocation4], 4294967168 }
 0x5ac   :  { %6479 = vsyncpa [#allocation3], 1 }
 0x5ad   :  { %6480 = vsyncpa [#allocation6], 1 }
 0x5ae   :  { %6481 = vsyncpa [#allocation9], 1 }
 0x5af   :  { %6482 = vsyncpa [#allocation12], 1 }
 0x5b0   :  { %6483 = vsyncpa [#allocation15], 1 }
 0x5b1   :  { %6484 = vsyncpa [#allocation18], 1 }
 0x5b2   :  { %6485 = vsyncpa [#allocation4], 1 }

</bundles_post_ra>
